<compile_context>
chip_gen: v7x
topology: tpu7x:2x2x1
jax: 0.10.0
libtpu: 0.0.40
codegen_flags: <defaults>
</compile_context>

<pallas_src>
import math
import functools

import jax
import jax.numpy as jnp
from jax.experimental import pallas as pl
from jax.experimental.pallas import tpu as pltpu


_VMEM_LIMIT = 32 * 1024 * 1024   # explicit scoped-VMEM budget (safe on v5e/v6e/v7x)


# ----------------------------------------------------------------------------
# tiling helpers
# ----------------------------------------------------------------------------
def _divisor_tile(dim, pref, base):
    """Largest tile <= pref that divides dim and is a multiple of `base`.
    Falls back to the full dim (always legal as a block size)."""
    if dim <= pref:
        return dim
    start = pref - (pref % base)
    for t in range(start, 0, -base):
        if dim % t == 0:
            return t
    return dim


# ----------------------------------------------------------------------------
# Pallas kernels
# ----------------------------------------------------------------------------
def _linear_kernel(x_ref, w_ref, b_ref, o_ref, acc_ref, *, act_in, act_out):
    """K/N-tiled linear: bf16 MXU inputs, fp32 accumulator, fused prologue/epilogue."""
    k = pl.program_id(2)

    @pl.when(k == 0)
    def _():
        acc_ref[...] = jnp.zeros_like(acc_ref)

    x = x_ref[...]
    if act_in == "silu":
        x = jax.nn.silu(x.astype(jnp.float32))
    acc_ref[...] += jnp.dot(x.astype(jnp.bfloat16),
                            w_ref[...].astype(jnp.bfloat16),
                            preferred_element_type=jnp.float32)

    @pl.when(k == pl.num_programs(2) - 1)
    def _():
        out = acc_ref[...] + b_ref[...].astype(jnp.float32)
        if act_out == "gelu":
            out = jax.nn.gelu(out, approximate=True)
        elif act_out == "silu":
            out = jax.nn.silu(out)
        o_ref[...] = out.astype(o_ref.dtype)


def pallas_linear(x, w, b, *, act_in=None, act_out=None,
                  out_dtype=jnp.bfloat16, tm=256, tn=512, tk=512):
    """y = act_out(act_in(x) @ w + b).  x: (..., K), w: (K, N), b: (N,)."""
    K, N = w.shape
    lead = x.shape[:-1]
    x2 = x.reshape(-1, K)
    M = x2.shape[0]

    # no jnp.pad on M: partial last M-block is handled by masked stores.
    tm_e = M if M <= tm else tm                 # small M (e.g. modulation, M=B) -> tiny tile
    tn_e = _divisor_tile(N, tn, 128)            # 256-aligned tiles preferred (v6e/v7x MXU)
    tk_e = _divisor_tile(K, tk, 128)            # K tiles must divide K (accumulator)

    grid = (pl.cdiv(M, tm_e), N // tn_e, K // tk_e)
    out = pl.pallas_call(
        functools.partial(_linear_kernel, act_in=act_in, act_out=act_out),
        out_shape=jax.ShapeDtypeStruct((M, N), out_dtype),
        grid=grid,
        in_specs=[
            pl.BlockSpec((tm_e, tk_e), lambda i, j, k: (i, k)),
            pl.BlockSpec((tk_e, tn_e), lambda i, j, k: (k, j)),
            pl.BlockSpec((1, tn_e), lambda i, j, k: (0, j)),
        ],
        out_specs=pl.BlockSpec((tm_e, tn_e), lambda i, j, k: (i, j)),
        scratch_shapes=[pltpu.VMEM((tm_e, tn_e), jnp.float32)],
        compiler_params=pltpu.CompilerParams(
            dimension_semantics=("parallel", "parallel", "arbitrary"),
            vmem_limit_bytes=_VMEM_LIMIT),
    )(x2, w, b.reshape(1, N))
    return out.reshape(*lead, N)


def _flash_attn_kernel(q_ref, k_ref, v_ref, o_ref, m_scr, l_scr, acc_scr,
                       *, num_heads, head_dim):
    """Flash attention over a KV grid axis.  q/k/v/o tiles are (1, T, H*D);
    heads are a small static loop inside the kernel (keeps all slices static and
    lets the kernel write the lane-dense (B, L, H*D) output layout directly)."""
    j = pl.program_id(2)

    @pl.when(j == 0)
    def _():
        m_scr[...] = jnp.full_like(m_scr, -1e30)
        l_scr[...] = jnp.zeros_like(l_scr)
        acc_scr[...] = jnp.zeros_like(acc_scr)

    scale = 1.0 / math.sqrt(head_dim)
    for h in range(num_heads):                       # static unroll (H is small/static)
        lo = h * head_dim
        q = (q_ref[0, :, lo:lo + head_dim].astype(jnp.float32) * scale)   # scale q, not (L,L)
        k = k_ref[0, :, lo:lo + head_dim]
        v = v_ref[0, :, lo:lo + head_dim]
        s = jax.lax.dot_general(q.astype(jnp.bfloat16), k.astype(jnp.bfloat16),
                                (((1,), (1,)), ((), ())),
                                preferred_element_type=jnp.float32)        # (tq, tk)
        m_prev = m_scr[h]
        m_new = jnp.maximum(m_prev, jnp.max(s, axis=-1, keepdims=True))
        alpha = jnp.exp(m_prev - m_new)
        p = jnp.exp(s - m_new)
        l_scr[h] = alpha * l_scr[h] + jnp.sum(p, axis=-1, keepdims=True)
        acc_scr[h] = alpha * acc_scr[h] + jnp.dot(
            p.astype(jnp.bfloat16), v.astype(jnp.bfloat16),
            preferred_element_type=jnp.float32)
        m_scr[h] = m_new

    @pl.when(j == pl.num_programs(2) - 1)
    def _():
        for h in range(num_heads):
            lo = h * head_dim
            inv_l = pl.reciprocal(l_scr[h], approx=True)     # EUP divide
            o_ref[0, :, lo:lo + head_dim] = (acc_scr[h] * inv_l).astype(o_ref.dtype)


def pallas_flash_attention(q, k, v, num_heads, *, tq=256, tk=512):
    """q, k, v: (B, L, H*D) bf16 -> (B, L, H*D) bf16 (== torch SDPA + merge heads)."""
    B, L, HD = q.shape
    D = HD // num_heads
    tq_e = L if L <= tq else tq              # partial q blocks are fine (masked writes)
    tk_e = _divisor_tile(L, tk, 8)           # kv tiles must divide L (no OOB columns)

    qspec = pl.BlockSpec((1, tq_e, HD), lambda b, i, j: (b, i, 0))
    kvspec = pl.BlockSpec((1, tk_e, HD), lambda b, i, j: (b, j, 0))
    return pl.pallas_call(
        functools.partial(_flash_attn_kernel, num_heads=num_heads, head_dim=D),
        out_shape=jax.ShapeDtypeStruct((B, L, HD), jnp.bfloat16),
        grid=(B, pl.cdiv(L, tq_e), L // tk_e),
        in_specs=[qspec, kvspec, kvspec],
        out_specs=qspec,
        scratch_shapes=[pltpu.VMEM((num_heads, tq_e, 1), jnp.float32),
                        pltpu.VMEM((num_heads, tq_e, 1), jnp.float32),
                        pltpu.VMEM((num_heads, tq_e, D), jnp.float32)],
        compiler_params=pltpu.CompilerParams(
            dimension_semantics=("parallel", "parallel", "arbitrary"),
            vmem_limit_bytes=_VMEM_LIMIT),
    )(q, k, v)


def _ln_mod_kernel(x_ref, sc_ref, sh_ref, o_ref):
    x = x_ref[0].astype(jnp.float32)                 # (tl, D)
    mu = jnp.mean(x, axis=-1, keepdims=True)
    var = jnp.mean(jnp.square(x - mu), axis=-1, keepdims=True)
    xn = (x - mu) * jax.lax.rsqrt(var + 1e-6)
    o_ref[0] = ((1.0 + sc_ref[0].astype(jnp.float32)) * xn
                + sh_ref[0].astype(jnp.float32)).astype(o_ref.dtype)


def layernorm_modulate(x, scale, shift, *, tl=256):
    """(1 + scale) * LayerNorm(x, no affine, eps=1e-6) + shift, tiled over L.
    x: (B, L, D), scale/shift: (B, D)."""
    B, L, D = x.shape
    tl_e = L if L <= tl else tl
    return pl.pallas_call(
        _ln_mod_kernel,
        out_shape=jax.ShapeDtypeStruct((B, L, D), jnp.bfloat16),
        grid=(B, pl.cdiv(L, tl_e)),
        in_specs=[
            pl.BlockSpec((1, tl_e, D), lambda b, i: (b, i, 0)),
            pl.BlockSpec((1, 1, D), lambda b, i: (b, 0, 0)),
            pl.BlockSpec((1, 1, D), lambda b, i: (b, 0, 0)),
        ],
        out_specs=pl.BlockSpec((1, tl_e, D), lambda b, i: (b, i, 0)),
        compiler_params=pltpu.CompilerParams(
            dimension_semantics=("parallel", "parallel"),
            vmem_limit_bytes=_VMEM_LIMIT),
    )(x, scale.reshape(B, 1, D), shift.reshape(B, 1, D))


# ----------------------------------------------------------------------------
# JAX glue (layout transforms, rope, small elementwise helpers)
# ----------------------------------------------------------------------------
def conv2d(x, w, b, stride=1):
    # Hint convs are tiny and lane-sparse for MXU tiling; per perf review they
    # are routed through XLA's native conv instead of im2col + Pallas matmul.
    out = jax.lax.conv_general_dilated(
        x, w, window_strides=(stride, stride), padding=((1, 1), (1, 1)),
        dimension_numbers=("NCHW", "OIHW", "NCHW"))
    return out + b.reshape(1, -1, 1, 1)


def timestep_embedding(t, dim, max_period=10000, time_factor=1000.0):
    t = time_factor * t.astype(jnp.float32)
    half = dim // 2
    freqs = jnp.exp(-math.log(max_period) * jnp.arange(half, dtype=jnp.float32) / half)
    args = t[:, None] * freqs[None]
    return jnp.concatenate([jnp.cos(args), jnp.sin(args)], axis=-1)


def rope(pos, dim, theta):
    scale = jnp.arange(0, dim, 2, dtype=jnp.float32) / dim
    omega = 1.0 / (theta ** scale)
    out = jnp.einsum("...n,d->...nd", pos.astype(jnp.float32), omega)
    out = jnp.stack([jnp.cos(out), -jnp.sin(out), jnp.sin(out), jnp.cos(out)], axis=-1)
    return out.reshape(out.shape[:-1] + (2, 2)).astype(jnp.float32)


def embed_nd(ids, axes_dim, theta):
    n_axes = ids.shape[-1]
    emb = jnp.concatenate(
        [rope(ids[..., i], axes_dim[i], theta) for i in range(n_axes)], axis=-3)
    return emb[:, None]                                    # (B, 1, L, pe_dim//2, 2, 2)


def apply_rope_blhd(x, freqs_cis):
    """x: (B, L, H, Dh) fp32; freqs_cis: (B, 1, L, Dh//2, 2, 2) -> (B, L, H, Dh)."""
    B, L, H, Dh = x.shape
    xf = x.reshape(B, L, H, Dh // 2, 1, 2)
    fc = jnp.swapaxes(freqs_cis, 1, 2)                     # (B, L, 1, Dh//2, 2, 2)
    out = fc[..., 0] * xf[..., 0] + fc[..., 1] * xf[..., 1]
    return out.reshape(B, L, H, Dh)


def rms_norm_heads(x, scale, num_heads):
    """Per-head RMSNorm in the flat (B, L, H*Dh) layout -> (B, L, H, Dh) fp32."""
    B, L, HD = x.shape
    Dh = HD // num_heads
    xf = x.astype(jnp.float32).reshape(B, L, num_heads, Dh)
    rrms = jax.lax.rsqrt(jnp.mean(xf * xf, axis=-1, keepdims=True) + 1e-6)
    return xf * rrms * scale.astype(jnp.float32)


def mlp_embedder(p, x):
    # Linear -> SiLU (fused epilogue) -> Linear
    h = pallas_linear(x, *p["in"], act_out="silu", out_dtype=jnp.float32)
    return pallas_linear(h, *p["out"], out_dtype=jnp.float32)


def _gated_residual(x, gate, update):
    return (x.astype(jnp.float32)
            + gate[:, None, :].astype(jnp.float32) * update.astype(jnp.float32)
            ).astype(jnp.bfloat16)


# ----------------------------------------------------------------------------
# Transformer blocks
# ----------------------------------------------------------------------------
def double_block(bp, img, txt, vec, pe, num_heads):
    B, Lt, D = txt.shape
    Li = img.shape[1]
    L = Lt + Li

    # modulation: SiLU prologue fused into the linear kernel; M = B (tiny tile)
    img_mod = pallas_linear(vec, *bp["img_mod"], act_in="silu", out_dtype=jnp.float32)
    txt_mod = pallas_linear(vec, *bp["txt_mod"], act_in="silu", out_dtype=jnp.float32)
    i_sh1, i_sc1, i_g1, i_sh2, i_sc2, i_g2 = jnp.split(img_mod, 6, axis=-1)
    t_sh1, t_sc1, t_g1, t_sh2, t_sc2, t_g2 = jnp.split(txt_mod, 6, axis=-1)

    img_m = layernorm_modulate(img, i_sc1, i_sh1)
    iqkv = pallas_linear(img_m, *bp["img_qkv"])
    iq, ik, iv = iqkv[..., :D], iqkv[..., D:2 * D], iqkv[..., 2 * D:]
    iq = rms_norm_heads(iq, bp["img_q_scale"], num_heads)
    ik = rms_norm_heads(ik, bp["img_k_scale"], num_heads)

    txt_m = layernorm_modulate(txt, t_sc1, t_sh1)
    tqkv = pallas_linear(txt_m, *bp["txt_qkv"])
    tq, tk, tv = tqkv[..., :D], tqkv[..., D:2 * D], tqkv[..., 2 * D:]
    tq = rms_norm_heads(tq, bp["txt_q_scale"], num_heads)
    tk = rms_norm_heads(tk, bp["txt_k_scale"], num_heads)

    # TODO(synk): rms_norm + rope are applied in JAX glue (flat-layout, no head
    # transposes); fusing them into the attention prologue would need in-kernel
    # even/odd pair rotation.
    q = jnp.concatenate([tq, iq], axis=1)                  # (B, L, H, Dh) fp32
    k = jnp.concatenate([tk, ik], axis=1)
    q = apply_rope_blhd(q, pe).reshape(B, L, D).astype(jnp.bfloat16)
    k = apply_rope_blhd(k, pe).reshape(B, L, D).astype(jnp.bfloat16)
    v = jnp.concatenate([tv, iv], axis=1)                  # (B, L, D) bf16

    attn = pallas_flash_attention(q, k, v, num_heads)      # (B, L, D) bf16
    txt_attn, img_attn = attn[:, :Lt], attn[:, Lt:]

    img = _gated_residual(img, i_g1, pallas_linear(img_attn, *bp["img_proj"]))
    h = layernorm_modulate(img, i_sc2, i_sh2)
    h = pallas_linear(h, *bp["img_mlp0"], act_out="gelu")  # GELU fused epilogue
    h = pallas_linear(h, *bp["img_mlp2"])
    img = _gated_residual(img, i_g2, h)

    txt = _gated_residual(txt, t_g1, pallas_linear(txt_attn, *bp["txt_proj"]))
    h = layernorm_modulate(txt, t_sc2, t_sh2)
    h = pallas_linear(h, *bp["txt_mlp0"], act_out="gelu")
    h = pallas_linear(h, *bp["txt_mlp2"])
    txt = _gated_residual(txt, t_g2, h)
    return img, txt


def single_block(bp, x, vec, pe, num_heads):
    B, L, D = x.shape
    mod = pallas_linear(vec, *bp["mod"], act_in="silu", out_dtype=jnp.float32)
    shift, scale, gate = jnp.split(mod, 3, axis=-1)
    x_mod = layernorm_modulate(x, scale, shift)

    # split lin1 into qkv / mlp column blocks so GELU fuses onto the mlp branch only
    w1, b1 = bp["lin1"]
    qkv = pallas_linear(x_mod, w1[:, :3 * D], b1[:3 * D])
    mlp = pallas_linear(x_mod, w1[:, 3 * D:], b1[3 * D:], act_out="gelu")

    q, k, v = qkv[..., :D], qkv[..., D:2 * D], qkv[..., 2 * D:]
    q = rms_norm_heads(q, bp["q_scale"], num_heads)
    k = rms_norm_heads(k, bp["k_scale"], num_heads)
    q = apply_rope_blhd(q, pe).reshape(B, L, D).astype(jnp.bfloat16)
    k = apply_rope_blhd(k, pe).reshape(B, L, D).astype(jnp.bfloat16)

    attn = pallas_flash_attention(q, k, v, num_heads)
    out = pallas_linear(jnp.concatenate([attn, mlp], axis=-1), *bp["lin2"])
    return _gated_residual(x, gate, out)


# ----------------------------------------------------------------------------
# Hint conv stacks
# ----------------------------------------------------------------------------
def hint_moe_forward(convs, x):
    x = jax.nn.silu(conv2d(x, *convs[0], stride=1))
    x = jax.nn.silu(conv2d(x, *convs[1], stride=1))
    x = jax.nn.silu(conv2d(x, *convs[2], stride=2))
    return x


def hint_share_forward(convs, x):
    x = jax.nn.silu(conv2d(x, *convs[0], stride=1))
    x = jax.nn.silu(conv2d(x, *convs[1], stride=2))
    x = jax.nn.silu(conv2d(x, *convs[2], stride=1))
    x = jax.nn.silu(conv2d(x, *convs[3], stride=2))
    x = conv2d(x, *convs[4], stride=1)        # zero_module() in torch (see NOTE above)
    return x


# ----------------------------------------------------------------------------
# Full ControlNetFlux forward
# ----------------------------------------------------------------------------
def controlnet_flux_forward(p, cfg, img, img_ids, controlnet_cond, txt, txt_ids,
                            timesteps, y, guidance=None):
    ids = jnp.concatenate([txt_ids, img_ids], axis=1)
    pe = embed_nd(ids, cfg["axes_dim"], cfg["theta"])

    vec = mlp_embedder(p["time_in"], timestep_embedding(timesteps, 256))
    if cfg["guidance_embed"]:
        vec = vec + mlp_embedder(p["guidance_in"], timestep_embedding(guidance, 256))
    vec = vec + mlp_embedder(p["vector_in"], y)

    txt = pallas_linear(txt, *p["txt_in"])
    img = pallas_linear(img, *p["img_in"])

    conds = {}
    for k, v in controlnet_cond.items():
        idx = cfg["type2id"][k]
        v = hint_moe_forward(p["hint_moe"][idx], v)
        v = hint_share_forward(p["hint_share"], v)
        conds[k] = v
    # TODO(synk): PatchSelectNetwork (select_net) source not provided; approximated by
    #             summing the per-type hint features (txt/pe/vec conditioning omitted).
    cond = functools.reduce(lambda a, b: a + b, conds.values())

    # rearrange 'b c (h ph) (w pw) -> b (h w) (c ph pw)', ph=pw=2
    B, C, Hc, Wc = cond.shape
    cond = cond.reshape(B, C, Hc // 2, 2, Wc // 2, 2)
    cond = cond.transpose(0, 2, 4, 1, 3, 5).reshape(B, (Hc // 2) * (Wc // 2), C * 4)
    cond = pallas_linear(cond, *p["pos_embed_input"])
    img = (img.astype(jnp.float32) + cond.astype(jnp.float32)).astype(jnp.bfloat16)

    res = ()
    for bp in p["double"]:
        img, txt = double_block(bp, img, txt, vec, pe, cfg["num_heads"])
        res = res + (img,)
    img = jnp.concatenate([img, txt], axis=1)
    for bp in p["single"]:
        img = single_block(bp, img, vec, pe, cfg["num_heads"])
        res = res + (img,)
    return res


# ----------------------------------------------------------------------------
# Deterministic parameter init (linear weights stored bf16, biases fp32)
# ----------------------------------------------------------------------------
class _PInit:
    def __init__(self, key, scale=0.02):
        self._key, self._n, self._scale = key, 0, scale

    def _next(self):
        self._n += 1
        return jax.random.fold_in(self._key, self._n)

    def lin(self, fan_in, fan_out):
        w = (jax.random.normal(self._next(), (fan_in, fan_out), jnp.float32)
             * self._scale).astype(jnp.bfloat16)
        b = jax.random.normal(self._next(), (fan_out,), jnp.float32) * self._scale
        return (w, b)

    def conv(self, cin, cout, k=3):
        w = jax.random.normal(self._next(), (cout, cin, k, k), jnp.float32) * self._scale
        b = jax.random.normal(self._next(), (cout,), jnp.float32) * self._scale
        return (w, b)

    def ones(self, dim):
        return jnp.ones((dim,), jnp.float32)


def init_params(key, cfg):
    pi = _PInit(key)
    D = cfg["hidden_size"]
    hd = D // cfg["num_heads"]
    mlp_hidden = int(D * cfg["mlp_ratio"])

    def dblock():
        return dict(
            img_mod=pi.lin(D, 6 * D), txt_mod=pi.lin(D, 6 * D),
            img_qkv=pi.lin(D, 3 * D), txt_qkv=pi.lin(D, 3 * D),
            img_q_scale=pi.ones(hd), img_k_scale=pi.ones(hd),
            txt_q_scale=pi.ones(hd), txt_k_scale=pi.ones(hd),
            img_proj=pi.lin(D, D), txt_proj=pi.lin(D, D),
            img_mlp0=pi.lin(D, mlp_hidden), img_mlp2=pi.lin(mlp_hidden, D),
            txt_mlp0=pi.lin(D, mlp_hidden), txt_mlp2=pi.lin(mlp_hidden, D),
        )

    def sblock():
        return dict(
            mod=pi.lin(D, 3 * D),
            lin1=pi.lin(D, 3 * D + mlp_hidden),
            lin2=pi.lin(D + mlp_hidden, D),
            q_scale=pi.ones(hd), k_scale=pi.ones(hd),
        )

    p = dict(
        img_in=pi.lin(cfg["in_channels"], D),
        time_in=dict(**{"in": pi.lin(256, D), "out": pi.lin(D, D)}),
        vector_in=dict(**{"in": pi.lin(cfg["vec_in_dim"], D), "out": pi.lin(D, D)}),
        guidance_in=dict(**{"in": pi.lin(256, D), "out": pi.lin(D, D)}),
        txt_in=pi.lin(cfg["context_in_dim"], D),
        pos_embed_input=pi.lin(cfg["in_channels"], D),
        double=[dblock() for _ in range(cfg["controlnet_depth"])],
        single=[sblock() for _ in range(cfg["controlnet_depth"] * 2)],
        hint_moe=[[pi.conv(3, 16), pi.conv(16, 16), pi.conv(16, 16)]
                  for _ in range(len(cfg["type2id"]))],
        hint_share=[pi.conv(16, 16) for _ in range(5)],
    )
    return p


# ----------------------------------------------------------------------------
if __name__ == "__main__":
    cfg = dict(
        in_channels=64, vec_in_dim=32, context_in_dim=48, hidden_size=64,
        mlp_ratio=2.0, num_heads=2, depth=2, depth_single_blocks=4,
        axes_dim=[8, 12, 12], theta=10000, qkv_bias=True, guidance_embed=True,
        controlnet_depth=2, patch_size=2,
        type2id={"canny": 0, "openpose": 1, "depth": 2, "hed": 3},
    )
    assert sum(cfg["axes_dim"]) == cfg["hidden_size"] // cfg["num_heads"]

    key = jax.random.PRNGKey(0)
    params = init_params(key, cfg)

    B = 2
    Hh = Wh = 64                               # hint image spatial size (NCHW)
    L_img = (Hh // 16) * (Wh // 16)            # 16 tokens after hint downsample+patchify
    L_txt = 8

    k = jax.random.split(key, 8)
    img = jax.random.normal(k[0], (B, L_img, cfg["in_channels"]), jnp.float32)
    txt = jax.random.normal(k[1], (B, L_txt, cfg["context_in_dim"]), jnp.float32)
    y = jax.random.normal(k[2], (B, cfg["vec_in_dim"]), jnp.float32)
    timesteps = jax.random.uniform(k[3], (B,), jnp.float32)
    guidance = jnp.full((B,), 4.0, jnp.float32)
    hint1 = jax.random.normal(k[4], (B, 3, Hh, Wh), jnp.float32)
    hint2 = jax.random.normal(k[5], (B, 3, Hh, Wh), jnp.float32)
    controlnet_cond = {"canny": hint1, "depth": hint2}

    # positional ids (Flux convention: (.., h, w) grid for img, zeros for txt)
    gh = Hh // 16
    gw = Wh // 16
    img_ids = jnp.zeros((gh, gw, 3), jnp.float32)
    img_ids = img_ids.at[..., 1].set(jnp.arange(gh, dtype=jnp.float32)[:, None])
    img_ids = img_ids.at[..., 2].set(jnp.arange(gw, dtype=jnp.float32)[None, :])
    img_ids = jnp.tile(img_ids.reshape(1, gh * gw, 3), (B, 1, 1))
    txt_ids = jnp.zeros((B, L_txt, 3), jnp.float32)

    fwd = jax.jit(lambda im, iid, cc, tx, tid, ts, yv, g:
                  controlnet_flux_forward(params, cfg, im, iid, cc, tx, tid, ts, yv, g))
    out = fwd(img, img_ids, controlnet_cond, txt, txt_ids, timesteps, y, guidance)
    jax.block_until_ready(out)

    assert len(out) == 6
    assert out[0].shape == (B, L_img, cfg["hidden_size"])
    assert out[-1].shape == (B, L_img + L_txt, cfg["hidden_size"])
    print("KERNEL_OK")
</pallas_src>

<mosaic_0001>
module attributes {stable_mosaic.version = 11 : i64} {
  func.func @_linear_kernel(%arg0: i32, %arg1: i32, %arg2: i32, %arg3: memref<32x64xf32, #tpu.memory_space<vmem>>, %arg4: memref<64x64xbf16, #tpu.memory_space<vmem>>, %arg5: memref<1x64xf32, #tpu.memory_space<vmem>>, %arg6: memref<32x64xbf16, #tpu.memory_space<vmem>>, %arg7: memref<32x64xf32, #tpu.memory_space<vmem>>) attributes {dimension_semantics = [#tpu.dimension_semantics<parallel>, #tpu.dimension_semantics<parallel>, #tpu.dimension_semantics<arbitrary>], iteration_bounds = array<i64: 1, 1, 1>, scalar_prefetch = 0 : i64, scratch_operands = 1 : i64, tpu.core_type = #tpu.core_type<tc>, window_params = [{transform_indices = @transform_0, window_bounds = array<i64: 32, 64>}, {transform_indices = @transform_1, window_bounds = array<i64: 64, 64>}, {transform_indices = @transform_2, window_bounds = array<i64: 1, 64>}, {transform_indices = @transform_3, window_bounds = array<i64: 32, 64>}]} {
    %c0_i32 = arith.constant 0 : i32
    %0 = arith.cmpi eq, %arg2, %c0_i32 : i32
    %1 = arith.extui %0 : i1 to i32
    %c0_i32_0 = arith.constant 0 : i32
    %2 = arith.cmpi ne, %1, %c0_i32_0 : i32
    scf.if %2 {
      %cst_10 = arith.constant 0.000000e+00 : f32
      %13 = vector.broadcast %cst_10 : f32 to vector<32x64xf32>
      %c0_11 = arith.constant 0 : index
      %c0_12 = arith.constant 0 : index
      %14 = vector.load %arg7[%c0_11, %c0_12] : memref<32x64xf32, #tpu.memory_space<vmem>>, vector<32x64xf32>
      tpu.vector_store %arg7[%c0_11, %c0_12], %13 {strides = array<i32>} : memref<32x64xf32, #tpu.memory_space<vmem>>, vector<32x64xf32>,
    } else {
    }
    %c0 = arith.constant 0 : index
    %c0_1 = arith.constant 0 : index
    %3 = vector.load %arg3[%c0, %c0_1] : memref<32x64xf32, #tpu.memory_space<vmem>>, vector<32x64xf32>
    %c0_2 = arith.constant 0 : index
    %c0_3 = arith.constant 0 : index
    %4 = vector.load %arg7[%c0_2, %c0_3] : memref<32x64xf32, #tpu.memory_space<vmem>>, vector<32x64xf32>
    %5 = arith.truncf %3 : vector<32x64xf32> to vector<32x64xbf16>
    %c0_4 = arith.constant 0 : index
    %c0_5 = arith.constant 0 : index
    %6 = vector.load %arg4[%c0_4, %c0_5] : memref<64x64xbf16, #tpu.memory_space<vmem>>, vector<64x64xbf16>
    %cst = arith.constant dense<0.000000e+00> : vector<32x64xf32>
    %7 = tpu.matmul %5, %6, %cst {dimension_numbers = #tpu.dot_dimension_numbers<[1], [0], [0], [1], [0, 0, 1, 1], [], []>} : vector<32x64xbf16>, vector<64x64xbf16>, vector<32x64xf32> -> vector<32x64xf32>
    %8 = arith.addf %4, %7 : vector<32x64xf32>
    %c0_6 = arith.constant 0 : index
    %c0_7 = arith.constant 0 : index
    %9 = vector.load %arg7[%c0_6, %c0_7] : memref<32x64xf32, #tpu.memory_space<vmem>>, vector<32x64xf32>
    tpu.vector_store %arg7[%c0_6, %c0_7], %8 {strides = array<i32>} : memref<32x64xf32, #tpu.memory_space<vmem>>, vector<32x64xf32>,
    %c0_i32_8 = arith.constant 0 : i32
    %10 = arith.cmpi eq, %arg2, %c0_i32_8 : i32
    %11 = arith.extui %10 : i1 to i32
    %c0_i32_9 = arith.constant 0 : i32
    %12 = arith.cmpi ne, %11, %c0_i32_9 : i32
    scf.if %12 {
      %c0_10 = arith.constant 0 : index
      %c0_11 = arith.constant 0 : index
      %13 = vector.load %arg7[%c0_10, %c0_11] : memref<32x64xf32, #tpu.memory_space<vmem>>, vector<32x64xf32>
      %c0_12 = arith.constant 0 : index
      %c0_13 = arith.constant 0 : index
      %14 = vector.load %arg5[%c0_12, %c0_13] : memref<1x64xf32, #tpu.memory_space<vmem>>, vector<1x64xf32>
      %15 = vector.broadcast %14 : vector<1x64xf32> to vector<32x64xf32>
      %16 = arith.addf %13, %15 : vector<32x64xf32>
      %17 = arith.truncf %16 : vector<32x64xf32> to vector<32x64xbf16>
      %c0_14 = arith.constant 0 : index
      %c0_15 = arith.constant 0 : index
      %18 = vector.load %arg6[%c0_14, %c0_15] : memref<32x64xbf16, #tpu.memory_space<vmem>>, vector<32x64xbf16>
      tpu.vector_store %arg6[%c0_14, %c0_15], %17 {strides = array<i32>} : memref<32x64xbf16, #tpu.memory_space<vmem>>, vector<32x64xbf16>,
    } else {
    }
    return
  }
  func.func @transform_0(%arg0: i32, %arg1: i32, %arg2: i32) -> (i32, i32) {
    %c0_i32 = arith.constant 0 : i32
    return %arg0, %arg2 : i32, i32
  }
  func.func @transform_1(%arg0: i32, %arg1: i32, %arg2: i32) -> (i32, i32) {
    %c0_i32 = arith.constant 0 : i32
    return %arg2, %arg1 : i32, i32
  }
  func.func @transform_2(%arg0: i32, %arg1: i32, %arg2: i32) -> (i32, i32) {
    %c0_i32 = arith.constant 0 : i32
    %c0_i32_0 = arith.constant 0 : i32
    return %c0_i32, %arg1 : i32, i32
  }
  func.func @transform_3(%arg0: i32, %arg1: i32, %arg2: i32) -> (i32, i32) {
    %c0_i32 = arith.constant 0 : i32
    return %arg0, %arg1 : i32, i32
  }
}

module attributes {stable_mosaic.version = 11 : i64} {
  func.func @_linear_kernel(%arg0: i32, %arg1: i32, %arg2: i32, %arg3: memref<32x64xf32, #tpu.memory_space<vmem>>, %arg4: memref<64x64xbf16, #tpu.memory_space<vmem>>, %arg5: memref<1x64xf32, #tpu.memory_space<vmem>>, %arg6: memref<32x64xbf16, #tpu.memory_space<vmem>>, %arg7: memref<32x64xf32, #tpu.memory_space<vmem>>) attributes {dimension_semantics = [#tpu.dimension_semantics<parallel>, #tpu.dimension_semantics<parallel>, #tpu.dimension_semantics<arbitrary>], iteration_bounds = array<i64: 1, 1, 1>, scalar_prefetch = 0 : i64, scratch_operands = 1 : i64, tpu.core_type = #tpu.core_type<tc>, window_params = [{transform_indices = @transform_0, window_bounds = array<i64: 32, 64>}, {transform_indices = @transform_1, window_bounds = array<i64: 64, 64>}, {transform_indices = @transform_2, window_bounds = array<i64: 1, 64>}, {transform_indices = @transform_3, window_bounds = array<i64: 32, 64>}]} {
    %c0_i32 = arith.constant 0 : i32
    %0 = arith.cmpi eq, %arg2, %c0_i32 : i32
    %1 = arith.extui %0 : i1 to i32
    %c0_i32_0 = arith.constant 0 : i32
    %2 = arith.cmpi ne, %1, %c0_i32_0 : i32
    scf.if %2 {
      %cst_10 = arith.constant 0.000000e+00 : f32
      %13 = vector.broadcast %cst_10 : f32 to vector<32x64xf32>
      %c0_11 = arith.constant 0 : index
      %c0_12 = arith.constant 0 : index
      %14 = vector.load %arg7[%c0_11, %c0_12] : memref<32x64xf32, #tpu.memory_space<vmem>>, vector<32x64xf32>
      tpu.vector_store %arg7[%c0_11, %c0_12], %13 {strides = array<i32>} : memref<32x64xf32, #tpu.memory_space<vmem>>, vector<32x64xf32>,
    } else {
    }
    %c0 = arith.constant 0 : index
    %c0_1 = arith.constant 0 : index
    %3 = vector.load %arg3[%c0, %c0_1] : memref<32x64xf32, #tpu.memory_space<vmem>>, vector<32x64xf32>
    %c0_2 = arith.constant 0 : index
    %c0_3 = arith.constant 0 : index
    %4 = vector.load %arg7[%c0_2, %c0_3] : memref<32x64xf32, #tpu.memory_space<vmem>>, vector<32x64xf32>
    %5 = arith.truncf %3 : vector<32x64xf32> to vector<32x64xbf16>
    %c0_4 = arith.constant 0 : index
    %c0_5 = arith.constant 0 : index
    %6 = vector.load %arg4[%c0_4, %c0_5] : memref<64x64xbf16, #tpu.memory_space<vmem>>, vector<64x64xbf16>
    %cst = arith.constant dense<0.000000e+00> : vector<32x64xf32>
    %7 = tpu.matmul %5, %6, %cst {dimension_numbers = #tpu.dot_dimension_numbers<[1], [0], [0], [1], [0, 0, 1, 1], [], []>} : vector<32x64xbf16>, vector<64x64xbf16>, vector<32x64xf32> -> vector<32x64xf32>
    %8 = arith.addf %4, %7 : vector<32x64xf32>
    %c0_6 = arith.constant 0 : index
    %c0_7 = arith.constant 0 : index
    %9 = vector.load %arg7[%c0_6, %c0_7] : memref<32x64xf32, #tpu.memory_space<vmem>>, vector<32x64xf32>
    tpu.vector_store %arg7[%c0_6, %c0_7], %8 {strides = array<i32>} : memref<32x64xf32, #tpu.memory_space<vmem>>, vector<32x64xf32>,
    %c0_i32_8 = arith.constant 0 : i32
    %10 = arith.cmpi eq, %arg2, %c0_i32_8 : i32
    %11 = arith.extui %10 : i1 to i32
    %c0_i32_9 = arith.constant 0 : i32
    %12 = arith.cmpi ne, %11, %c0_i32_9 : i32
    scf.if %12 {
      %c0_10 = arith.constant 0 : index
      %c0_11 = arith.constant 0 : index
      %13 = vector.load %arg7[%c0_10, %c0_11] : memref<32x64xf32, #tpu.memory_space<vmem>>, vector<32x64xf32>
      %c0_12 = arith.constant 0 : index
      %c0_13 = arith.constant 0 : index
      %14 = vector.load %arg5[%c0_12, %c0_13] : memref<1x64xf32, #tpu.memory_space<vmem>>, vector<1x64xf32>
      %15 = vector.broadcast %14 : vector<1x64xf32> to vector<32x64xf32>
      %16 = arith.addf %13, %15 : vector<32x64xf32>
      %17 = arith.truncf %16 : vector<32x64xf32> to vector<32x64xbf16>
      %c0_14 = arith.constant 0 : index
      %c0_15 = arith.constant 0 : index
      %18 = vector.load %arg6[%c0_14, %c0_15] : memref<32x64xbf16, #tpu.memory_space<vmem>>, vector<32x64xbf16>
      tpu.vector_store %arg6[%c0_14, %c0_15], %17 {strides = array<i32>} : memref<32x64xbf16, #tpu.memory_space<vmem>>, vector<32x64xbf16>,
    } else {
    }
    return
  }
  func.func @transform_0(%arg0: i32, %arg1: i32, %arg2: i32) -> (i32, i32) {
    %c0_i32 = arith.constant 0 : i32
    return %arg0, %arg2 : i32, i32
  }
  func.func @transform_1(%arg0: i32, %arg1: i32, %arg2: i32) -> (i32, i32) {
    %c0_i32 = arith.constant 0 : i32
    return %arg2, %arg1 : i32, i32
  }
  func.func @transform_2(%arg0: i32, %arg1: i32, %arg2: i32) -> (i32, i32) {
    %c0_i32 = arith.constant 0 : i32
    %c0_i32_0 = arith.constant 0 : i32
    return %c0_i32, %arg1 : i32, i32
  }
  func.func @transform_3(%arg0: i32, %arg1: i32, %arg2: i32) -> (i32, i32) {
    %c0_i32 = arith.constant 0 : i32
    return %arg0, %arg1 : i32, i32
  }
}

module attributes {stable_mosaic.version = 11 : i64} {
  func.func @_linear_kernel(%arg0: i32, %arg1: i32, %arg2: i32, %arg3: memref<2x256xf32, #tpu.memory_space<vmem>>, %arg4: memref<256x64xbf16, #tpu.memory_space<vmem>>, %arg5: memref<1x64xf32, #tpu.memory_space<vmem>>, %arg6: memref<2x64xf32, #tpu.memory_space<vmem>>, %arg7: memref<2x64xf32, #tpu.memory_space<vmem>>) attributes {dimension_semantics = [#tpu.dimension_semantics<parallel>, #tpu.dimension_semantics<parallel>, #tpu.dimension_semantics<arbitrary>], iteration_bounds = array<i64: 1, 1, 1>, scalar_prefetch = 0 : i64, scratch_operands = 1 : i64, tpu.core_type = #tpu.core_type<tc>, window_params = [{transform_indices = @transform_0, window_bounds = array<i64: 2, 256>}, {transform_indices = @transform_1, window_bounds = array<i64: 256, 64>}, {transform_indices = @transform_2, window_bounds = array<i64: 1, 64>}, {transform_indices = @transform_3, window_bounds = array<i64: 2, 64>}]} {
    %c0_i32 = arith.constant 0 : i32
    %0 = arith.cmpi eq, %arg2, %c0_i32 : i32
    %1 = arith.extui %0 : i1 to i32
    %c0_i32_0 = arith.constant 0 : i32
    %2 = arith.cmpi ne, %1, %c0_i32_0 : i32
    scf.if %2 {
      %cst_10 = arith.constant 0.000000e+00 : f32
      %13 = vector.broadcast %cst_10 : f32 to vector<2x64xf32>
      %c0_11 = arith.constant 0 : index
      %c0_12 = arith.constant 0 : index
      %14 = vector.load %arg7[%c0_11, %c0_12] : memref<2x64xf32, #tpu.memory_space<vmem>>, vector<2x64xf32>
      tpu.vector_store %arg7[%c0_11, %c0_12], %13 {strides = array<i32>} : memref<2x64xf32, #tpu.memory_space<vmem>>, vector<2x64xf32>,
    } else {
    }
    %c0 = arith.constant 0 : index
    %c0_1 = arith.constant 0 : index
    %3 = vector.load %arg3[%c0, %c0_1] : memref<2x256xf32, #tpu.memory_space<vmem>>, vector<2x256xf32>
    %c0_2 = arith.constant 0 : index
    %c0_3 = arith.constant 0 : index
    %4 = vector.load %arg7[%c0_2, %c0_3] : memref<2x64xf32, #tpu.memory_space<vmem>>, vector<2x64xf32>
    %5 = arith.truncf %3 : vector<2x256xf32> to vector<2x256xbf16>
    %c0_4 = arith.constant 0 : index
    %c0_5 = arith.constant 0 : index
    %6 = vector.load %arg4[%c0_4, %c0_5] : memref<256x64xbf16, #tpu.memory_space<vmem>>, vector<256x64xbf16>
    %cst = arith.constant dense<0.000000e+00> : vector<2x64xf32>
    %7 = tpu.matmul %5, %6, %cst {dimension_numbers = #tpu.dot_dimension_numbers<[1], [0], [0], [1], [0, 0, 1, 1], [], []>} : vector<2x256xbf16>, vector<256x64xbf16>, vector<2x64xf32> -> vector<2x64xf32>
    %8 = arith.addf %4, %7 : vector<2x64xf32>
    %c0_6 = arith.constant 0 : index
    %c0_7 = arith.constant 0 : index
    %9 = vector.load %arg7[%c0_6, %c0_7] : memref<2x64xf32, #tpu.memory_space<vmem>>, vector<2x64xf32>
    tpu.vector_store %arg7[%c0_6, %c0_7], %8 {strides = array<i32>} : memref<2x64xf32, #tpu.memory_space<vmem>>, vector<2x64xf32>,
    %c0_i32_8 = arith.constant 0 : i32
    %10 = arith.cmpi eq, %arg2, %c0_i32_8 : i32
    %11 = arith.extui %10 : i1 to i32
    %c0_i32_9 = arith.constant 0 : i32
    %12 = arith.cmpi ne, %11, %c0_i32_9 : i32
    scf.if %12 {
      %c0_10 = arith.constant 0 : index
      %c0_11 = arith.constant 0 : index
      %13 = vector.load %arg7[%c0_10, %c0_11] : memref<2x64xf32, #tpu.memory_space<vmem>>, vector<2x64xf32>
      %c0_12 = arith.constant 0 : index
      %c0_13 = arith.constant 0 : index
      %14 = vector.load %arg5[%c0_12, %c0_13] : memref<1x64xf32, #tpu.memory_space<vmem>>, vector<1x64xf32>
      %15 = vector.broadcast %14 : vector<1x64xf32> to vector<2x64xf32>
      %16 = arith.addf %13, %15 : vector<2x64xf32>
      %17 = arith.negf %16 : vector<2x64xf32>
      %18 = math.exp %17 : vector<2x64xf32>
      %cst_14 = arith.constant 1.000000e+00 : f32
      %19 = vector.broadcast %cst_14 : f32 to vector<2x64xf32>
      %20 = arith.addf %19, %18 : vector<2x64xf32>
      %21 = arith.divf %19, %20 : vector<2x64xf32>
      %22 = arith.mulf %16, %21 : vector<2x64xf32>
      %c0_15 = arith.constant 0 : index
      %c0_16 = arith.constant 0 : index
      %23 = vector.load %arg6[%c0_15, %c0_16] : memref<2x64xf32, #tpu.memory_space<vmem>>, vector<2x64xf32>
      tpu.vector_store %arg6[%c0_15, %c0_16], %22 {strides = array<i32>} : memref<2x64xf32, #tpu.memory_space<vmem>>, vector<2x64xf32>,
    } else {
    }
    return
  }
  func.func @transform_0(%arg0: i32, %arg1: i32, %arg2: i32) -> (i32, i32) {
    %c0_i32 = arith.constant 0 : i32
    return %arg0, %arg2 : i32, i32
  }
  func.func @transform_1(%arg0: i32, %arg1: i32, %arg2: i32) -> (i32, i32) {
    %c0_i32 = arith.constant 0 : i32
    return %arg2, %arg1 : i32, i32
  }
  func.func @transform_2(%arg0: i32, %arg1: i32, %arg2: i32) -> (i32, i32) {
    %c0_i32 = arith.constant 0 : i32
    %c0_i32_0 = arith.constant 0 : i32
    return %c0_i32, %arg1 : i32, i32
  }
  func.func @transform_3(%arg0: i32, %arg1: i32, %arg2: i32) -> (i32, i32) {
    %c0_i32 = arith.constant 0 : i32
    return %arg0, %arg1 : i32, i32
  }
}

module attributes {stable_mosaic.version = 11 : i64} {
  func.func @_linear_kernel(%arg0: i32, %arg1: i32, %arg2: i32, %arg3: memref<2x64xf32, #tpu.memory_space<vmem>>, %arg4: memref<64x64xbf16, #tpu.memory_space<vmem>>, %arg5: memref<1x64xf32, #tpu.memory_space<vmem>>, %arg6: memref<2x64xf32, #tpu.memory_space<vmem>>, %arg7: memref<2x64xf32, #tpu.memory_space<vmem>>) attributes {dimension_semantics = [#tpu.dimension_semantics<parallel>, #tpu.dimension_semantics<parallel>, #tpu.dimension_semantics<arbitrary>], iteration_bounds = array<i64: 1, 1, 1>, scalar_prefetch = 0 : i64, scratch_operands = 1 : i64, tpu.core_type = #tpu.core_type<tc>, window_params = [{transform_indices = @transform_0, window_bounds = array<i64: 2, 64>}, {transform_indices = @transform_1, window_bounds = array<i64: 64, 64>}, {transform_indices = @transform_2, window_bounds = array<i64: 1, 64>}, {transform_indices = @transform_3, window_bounds = array<i64: 2, 64>}]} {
    %c0_i32 = arith.constant 0 : i32
    %0 = arith.cmpi eq, %arg2, %c0_i32 : i32
    %1 = arith.extui %0 : i1 to i32
    %c0_i32_0 = arith.constant 0 : i32
    %2 = arith.cmpi ne, %1, %c0_i32_0 : i32
    scf.if %2 {
      %cst_10 = arith.constant 0.000000e+00 : f32
      %13 = vector.broadcast %cst_10 : f32 to vector<2x64xf32>
      %c0_11 = arith.constant 0 : index
      %c0_12 = arith.constant 0 : index
      %14 = vector.load %arg7[%c0_11, %c0_12] : memref<2x64xf32, #tpu.memory_space<vmem>>, vector<2x64xf32>
      tpu.vector_store %arg7[%c0_11, %c0_12], %13 {strides = array<i32>} : memref<2x64xf32, #tpu.memory_space<vmem>>, vector<2x64xf32>,
    } else {
    }
    %c0 = arith.constant 0 : index
    %c0_1 = arith.constant 0 : index
    %3 = vector.load %arg3[%c0, %c0_1] : memref<2x64xf32, #tpu.memory_space<vmem>>, vector<2x64xf32>
    %c0_2 = arith.constant 0 : index
    %c0_3 = arith.constant 0 : index
    %4 = vector.load %arg7[%c0_2, %c0_3] : memref<2x64xf32, #tpu.memory_space<vmem>>, vector<2x64xf32>
    %5 = arith.truncf %3 : vector<2x64xf32> to vector<2x64xbf16>
    %c0_4 = arith.constant 0 : index
    %c0_5 = arith.constant 0 : index
    %6 = vector.load %arg4[%c0_4, %c0_5] : memref<64x64xbf16, #tpu.memory_space<vmem>>, vector<64x64xbf16>
    %cst = arith.constant dense<0.000000e+00> : vector<2x64xf32>
    %7 = tpu.matmul %5, %6, %cst {dimension_numbers = #tpu.dot_dimension_numbers<[1], [0], [0], [1], [0, 0, 1, 1], [], []>} : vector<2x64xbf16>, vector<64x64xbf16>, vector<2x64xf32> -> vector<2x64xf32>
    %8 = arith.addf %4, %7 : vector<2x64xf32>
    %c0_6 = arith.constant 0 : index
    %c0_7 = arith.constant 0 : index
    %9 = vector.load %arg7[%c0_6, %c0_7] : memref<2x64xf32, #tpu.memory_space<vmem>>, vector<2x64xf32>
    tpu.vector_store %arg7[%c0_6, %c0_7], %8 {strides = array<i32>} : memref<2x64xf32, #tpu.memory_space<vmem>>, vector<2x64xf32>,
    %c0_i32_8 = arith.constant 0 : i32
    %10 = arith.cmpi eq, %arg2, %c0_i32_8 : i32
    %11 = arith.extui %10 : i1 to i32
    %c0_i32_9 = arith.constant 0 : i32
    %12 = arith.cmpi ne, %11, %c0_i32_9 : i32
    scf.if %12 {
      %c0_10 = arith.constant 0 : index
      %c0_11 = arith.constant 0 : index
      %13 = vector.load %arg7[%c0_10, %c0_11] : memref<2x64xf32, #tpu.memory_space<vmem>>, vector<2x64xf32>
      %c0_12 = arith.constant 0 : index
      %c0_13 = arith.constant 0 : index
      %14 = vector.load %arg5[%c0_12, %c0_13] : memref<1x64xf32, #tpu.memory_space<vmem>>, vector<1x64xf32>
      %15 = vector.broadcast %14 : vector<1x64xf32> to vector<2x64xf32>
      %16 = arith.addf %13, %15 : vector<2x64xf32>
      %c0_14 = arith.constant 0 : index
      %c0_15 = arith.constant 0 : index
      %17 = vector.load %arg6[%c0_14, %c0_15] : memref<2x64xf32, #tpu.memory_space<vmem>>, vector<2x64xf32>
      tpu.vector_store %arg6[%c0_14, %c0_15], %16 {strides = array<i32>} : memref<2x64xf32, #tpu.memory_space<vmem>>, vector<2x64xf32>,
    } else {
    }
    return
  }
  func.func @transform_0(%arg0: i32, %arg1: i32, %arg2: i32) -> (i32, i32) {
    %c0_i32 = arith.constant 0 : i32
    return %arg0, %arg2 : i32, i32
  }
  func.func @transform_1(%arg0: i32, %arg1: i32, %arg2: i32) -> (i32, i32) {
    %c0_i32 = arith.constant 0 : i32
    return %arg2, %arg1 : i32, i32
  }
  func.func @transform_2(%arg0: i32, %arg1: i32, %arg2: i32) -> (i32, i32) {
    %c0_i32 = arith.constant 0 : i32
    %c0_i32_0 = arith.constant 0 : i32
    return %c0_i32, %arg1 : i32, i32
  }
  func.func @transform_3(%arg0: i32, %arg1: i32, %arg2: i32) -> (i32, i32) {
    %c0_i32 = arith.constant 0 : i32
    return %arg0, %arg1 : i32, i32
  }
}

module attributes {stable_mosaic.version = 11 : i64} {
  func.func @_linear_kernel(%arg0: i32, %arg1: i32, %arg2: i32, %arg3: memref<2x32xf32, #tpu.memory_space<vmem>>, %arg4: memref<32x64xbf16, #tpu.memory_space<vmem>>, %arg5: memref<1x64xf32, #tpu.memory_space<vmem>>, %arg6: memref<2x64xf32, #tpu.memory_space<vmem>>, %arg7: memref<2x64xf32, #tpu.memory_space<vmem>>) attributes {dimension_semantics = [#tpu.dimension_semantics<parallel>, #tpu.dimension_semantics<parallel>, #tpu.dimension_semantics<arbitrary>], iteration_bounds = array<i64: 1, 1, 1>, scalar_prefetch = 0 : i64, scratch_operands = 1 : i64, tpu.core_type = #tpu.core_type<tc>, window_params = [{transform_indices = @transform_0, window_bounds = array<i64: 2, 32>}, {transform_indices = @transform_1, window_bounds = array<i64: 32, 64>}, {transform_indices = @transform_2, window_bounds = array<i64: 1, 64>}, {transform_indices = @transform_3, window_bounds = array<i64: 2, 64>}]} {
    %c0_i32 = arith.constant 0 : i32
    %0 = arith.cmpi eq, %arg2, %c0_i32 : i32
    %1 = arith.extui %0 : i1 to i32
    %c0_i32_0 = arith.constant 0 : i32
    %2 = arith.cmpi ne, %1, %c0_i32_0 : i32
    scf.if %2 {
      %cst_10 = arith.constant 0.000000e+00 : f32
      %13 = vector.broadcast %cst_10 : f32 to vector<2x64xf32>
      %c0_11 = arith.constant 0 : index
      %c0_12 = arith.constant 0 : index
      %14 = vector.load %arg7[%c0_11, %c0_12] : memref<2x64xf32, #tpu.memory_space<vmem>>, vector<2x64xf32>
      tpu.vector_store %arg7[%c0_11, %c0_12], %13 {strides = array<i32>} : memref<2x64xf32, #tpu.memory_space<vmem>>, vector<2x64xf32>,
    } else {
    }
    %c0 = arith.constant 0 : index
    %c0_1 = arith.constant 0 : index
    %3 = vector.load %arg3[%c0, %c0_1] : memref<2x32xf32, #tpu.memory_space<vmem>>, vector<2x32xf32>
    %c0_2 = arith.constant 0 : index
    %c0_3 = arith.constant 0 : index
    %4 = vector.load %arg7[%c0_2, %c0_3] : memref<2x64xf32, #tpu.memory_space<vmem>>, vector<2x64xf32>
    %5 = arith.truncf %3 : vector<2x32xf32> to vector<2x32xbf16>
    %c0_4 = arith.constant 0 : index
    %c0_5 = arith.constant 0 : index
    %6 = vector.load %arg4[%c0_4, %c0_5] : memref<32x64xbf16, #tpu.memory_space<vmem>>, vector<32x64xbf16>
    %cst = arith.constant dense<0.000000e+00> : vector<2x64xf32>
    %7 = tpu.matmul %5, %6, %cst {dimension_numbers = #tpu.dot_dimension_numbers<[1], [0], [0], [1], [0, 0, 1, 1], [], []>} : vector<2x32xbf16>, vector<32x64xbf16>, vector<2x64xf32> -> vector<2x64xf32>
    %8 = arith.addf %4, %7 : vector<2x64xf32>
    %c0_6 = arith.constant 0 : index
    %c0_7 = arith.constant 0 : index
    %9 = vector.load %arg7[%c0_6, %c0_7] : memref<2x64xf32, #tpu.memory_space<vmem>>, vector<2x64xf32>
    tpu.vector_store %arg7[%c0_6, %c0_7], %8 {strides = array<i32>} : memref<2x64xf32, #tpu.memory_space<vmem>>, vector<2x64xf32>,
    %c0_i32_8 = arith.constant 0 : i32
    %10 = arith.cmpi eq, %arg2, %c0_i32_8 : i32
    %11 = arith.extui %10 : i1 to i32
    %c0_i32_9 = arith.constant 0 : i32
    %12 = arith.cmpi ne, %11, %c0_i32_9 : i32
    scf.if %12 {
      %c0_10 = arith.constant 0 : index
      %c0_11 = arith.constant 0 : index
      %13 = vector.load %arg7[%c0_10, %c0_11] : memref<2x64xf32, #tpu.memory_space<vmem>>, vector<2x64xf32>
      %c0_12 = arith.constant 0 : index
      %c0_13 = arith.constant 0 : index
      %14 = vector.load %arg5[%c0_12, %c0_13] : memref<1x64xf32, #tpu.memory_space<vmem>>, vector<1x64xf32>
      %15 = vector.broadcast %14 : vector<1x64xf32> to vector<2x64xf32>
      %16 = arith.addf %13, %15 : vector<2x64xf32>
      %17 = arith.negf %16 : vector<2x64xf32>
      %18 = math.exp %17 : vector<2x64xf32>
      %cst_14 = arith.constant 1.000000e+00 : f32
      %19 = vector.broadcast %cst_14 : f32 to vector<2x64xf32>
      %20 = arith.addf %19, %18 : vector<2x64xf32>
      %21 = arith.divf %19, %20 : vector<2x64xf32>
      %22 = arith.mulf %16, %21 : vector<2x64xf32>
      %c0_15 = arith.constant 0 : index
      %c0_16 = arith.constant 0 : index
      %23 = vector.load %arg6[%c0_15, %c0_16] : memref<2x64xf32, #tpu.memory_space<vmem>>, vector<2x64xf32>
      tpu.vector_store %arg6[%c0_15, %c0_16], %22 {strides = array<i32>} : memref<2x64xf32, #tpu.memory_space<vmem>>, vector<2x64xf32>,
    } else {
    }
    return
  }
  func.func @transform_0(%arg0: i32, %arg1: i32, %arg2: i32) -> (i32, i32) {
    %c0_i32 = arith.constant 0 : i32
    return %arg0, %arg2 : i32, i32
  }
  func.func @transform_1(%arg0: i32, %arg1: i32, %arg2: i32) -> (i32, i32) {
    %c0_i32 = arith.constant 0 : i32
    return %arg2, %arg1 : i32, i32
  }
  func.func @transform_2(%arg0: i32, %arg1: i32, %arg2: i32) -> (i32, i32) {
    %c0_i32 = arith.constant 0 : i32
    %c0_i32_0 = arith.constant 0 : i32
    return %c0_i32, %arg1 : i32, i32
  }
  func.func @transform_3(%arg0: i32, %arg1: i32, %arg2: i32) -> (i32, i32) {
    %c0_i32 = arith.constant 0 : i32
    return %arg0, %arg1 : i32, i32
  }
}

module attributes {stable_mosaic.version = 11 : i64} {
  func.func @_linear_kernel(%arg0: i32, %arg1: i32, %arg2: i32, %arg3: memref<2x64xf32, #tpu.memory_space<vmem>>, %arg4: memref<64x384xbf16, #tpu.memory_space<vmem>>, %arg5: memref<1x384xf32, #tpu.memory_space<vmem>>, %arg6: memref<2x384xf32, #tpu.memory_space<vmem>>, %arg7: memref<2x384xf32, #tpu.memory_space<vmem>>) attributes {dimension_semantics = [#tpu.dimension_semantics<parallel>, #tpu.dimension_semantics<parallel>, #tpu.dimension_semantics<arbitrary>], iteration_bounds = array<i64: 1, 1, 1>, scalar_prefetch = 0 : i64, scratch_operands = 1 : i64, tpu.core_type = #tpu.core_type<tc>, window_params = [{transform_indices = @transform_0, window_bounds = array<i64: 2, 64>}, {transform_indices = @transform_1, window_bounds = array<i64: 64, 384>}, {transform_indices = @transform_2, window_bounds = array<i64: 1, 384>}, {transform_indices = @transform_3, window_bounds = array<i64: 2, 384>}]} {
    %c0_i32 = arith.constant 0 : i32
    %0 = arith.cmpi eq, %arg2, %c0_i32 : i32
    %1 = arith.extui %0 : i1 to i32
    %c0_i32_0 = arith.constant 0 : i32
    %2 = arith.cmpi ne, %1, %c0_i32_0 : i32
    scf.if %2 {
      %cst_11 = arith.constant 0.000000e+00 : f32
      %19 = vector.broadcast %cst_11 : f32 to vector<2x384xf32>
      %c0_12 = arith.constant 0 : index
      %c0_13 = arith.constant 0 : index
      %20 = vector.load %arg7[%c0_12, %c0_13] : memref<2x384xf32, #tpu.memory_space<vmem>>, vector<2x384xf32>
      tpu.vector_store %arg7[%c0_12, %c0_13], %19 {strides = array<i32>} : memref<2x384xf32, #tpu.memory_space<vmem>>, vector<2x384xf32>,
    } else {
    }
    %c0 = arith.constant 0 : index
    %c0_1 = arith.constant 0 : index
    %3 = vector.load %arg3[%c0, %c0_1] : memref<2x64xf32, #tpu.memory_space<vmem>>, vector<2x64xf32>
    %4 = arith.negf %3 : vector<2x64xf32>
    %5 = math.exp %4 : vector<2x64xf32>
    %cst = arith.constant 1.000000e+00 : f32
    %6 = vector.broadcast %cst : f32 to vector<2x64xf32>
    %7 = arith.addf %6, %5 : vector<2x64xf32>
    %8 = arith.divf %6, %7 : vector<2x64xf32>
    %9 = arith.mulf %3, %8 : vector<2x64xf32>
    %c0_2 = arith.constant 0 : index
    %c0_3 = arith.constant 0 : index
    %10 = vector.load %arg7[%c0_2, %c0_3] : memref<2x384xf32, #tpu.memory_space<vmem>>, vector<2x384xf32>
    %11 = arith.truncf %9 : vector<2x64xf32> to vector<2x64xbf16>
    %c0_4 = arith.constant 0 : index
    %c0_5 = arith.constant 0 : index
    %12 = vector.load %arg4[%c0_4, %c0_5] : memref<64x384xbf16, #tpu.memory_space<vmem>>, vector<64x384xbf16>
    %cst_6 = arith.constant dense<0.000000e+00> : vector<2x384xf32>
    %13 = tpu.matmul %11, %12, %cst_6 {dimension_numbers = #tpu.dot_dimension_numbers<[1], [0], [0], [1], [0, 0, 1, 1], [], []>} : vector<2x64xbf16>, vector<64x384xbf16>, vector<2x384xf32> -> vector<2x384xf32>
    %14 = arith.addf %10, %13 : vector<2x384xf32>
    %c0_7 = arith.constant 0 : index
    %c0_8 = arith.constant 0 : index
    %15 = vector.load %arg7[%c0_7, %c0_8] : memref<2x384xf32, #tpu.memory_space<vmem>>, vector<2x384xf32>
    tpu.vector_store %arg7[%c0_7, %c0_8], %14 {strides = array<i32>} : memref<2x384xf32, #tpu.memory_space<vmem>>, vector<2x384xf32>,
    %c0_i32_9 = arith.constant 0 : i32
    %16 = arith.cmpi eq, %arg2, %c0_i32_9 : i32
    %17 = arith.extui %16 : i1 to i32
    %c0_i32_10 = arith.constant 0 : i32
    %18 = arith.cmpi ne, %17, %c0_i32_10 : i32
    scf.if %18 {
      %c0_11 = arith.constant 0 : index
      %c0_12 = arith.constant 0 : index
      %19 = vector.load %arg7[%c0_11, %c0_12] : memref<2x384xf32, #tpu.memory_space<vmem>>, vector<2x384xf32>
      %c0_13 = arith.constant 0 : index
      %c0_14 = arith.constant 0 : index
      %20 = vector.load %arg5[%c0_13, %c0_14] : memref<1x384xf32, #tpu.memory_space<vmem>>, vector<1x384xf32>
      %21 = vector.broadcast %20 : vector<1x384xf32> to vector<2x384xf32>
      %22 = arith.addf %19, %21 : vector<2x384xf32>
      %c0_15 = arith.constant 0 : index
      %c0_16 = arith.constant 0 : index
      %23 = vector.load %arg6[%c0_15, %c0_16] : memref<2x384xf32, #tpu.memory_space<vmem>>, vector<2x384xf32>
      tpu.vector_store %arg6[%c0_15, %c0_16], %22 {strides = array<i32>} : memref<2x384xf32, #tpu.memory_space<vmem>>, vector<2x384xf32>,
    } else {
    }
    return
  }
  func.func @transform_0(%arg0: i32, %arg1: i32, %arg2: i32) -> (i32, i32) {
    %c0_i32 = arith.constant 0 : i32
    return %arg0, %arg2 : i32, i32
  }
  func.func @transform_1(%arg0: i32, %arg1: i32, %arg2: i32) -> (i32, i32) {
    %c0_i32 = arith.constant 0 : i32
    return %arg2, %arg1 : i32, i32
  }
  func.func @transform_2(%arg0: i32, %arg1: i32, %arg2: i32) -> (i32, i32) {
    %c0_i32 = arith.constant 0 : i32
    %c0_i32_0 = arith.constant 0 : i32
    return %c0_i32, %arg1 : i32, i32
  }
  func.func @transform_3(%arg0: i32, %arg1: i32, %arg2: i32) -> (i32, i32) {
    %c0_i32 = arith.constant 0 : i32
    return %arg0, %arg1 : i32, i32
  }
}

module attributes {stable_mosaic.version = 11 : i64} {
  func.func @_ln_mod_kernel(%arg0: i32, %arg1: i32, %arg2: memref<1x16x64xbf16, #tpu.memory_space<vmem>>, %arg3: memref<1x1x64xf32, #tpu.memory_space<vmem>>, %arg4: memref<1x1x64xf32, #tpu.memory_space<vmem>>, %arg5: memref<1x16x64xbf16, #tpu.memory_space<vmem>>) attributes {dimension_semantics = [#tpu.dimension_semantics<parallel>, #tpu.dimension_semantics<parallel>], iteration_bounds = array<i64: 2, 1>, scalar_prefetch = 0 : i64, scratch_operands = 0 : i64, tpu.core_type = #tpu.core_type<tc>, window_params = [{transform_indices = @transform_0, window_bounds = array<i64: 1, 16, 64>}, {transform_indices = @transform_1, window_bounds = array<i64: 1, 1, 64>}, {transform_indices = @transform_2, window_bounds = array<i64: 1, 1, 64>}, {transform_indices = @transform_3, window_bounds = array<i64: 1, 16, 64>}]} {
    %c0 = arith.constant 0 : index
    %c0_0 = arith.constant 0 : index
    %c0_1 = arith.constant 0 : index
    %0 = vector.load %arg2[%c0, %c0_0, %c0_1] : memref<1x16x64xbf16, #tpu.memory_space<vmem>>, vector<1x16x64xbf16>
    %1 = vector.shape_cast %0 : vector<1x16x64xbf16> to vector<16x64xbf16>
    %2 = arith.extf %1 : vector<16x64xbf16> to vector<16x64xf32>
    %cst = arith.constant dense<0.000000e+00> : vector<16xf32>
    %3 = vector.multi_reduction <add>, %2, %cst [1] : vector<16x64xf32> to vector<16xf32>
    %4 = vector.shape_cast %3 : vector<16xf32> to vector<16x1xf32>
    %cst_2 = arith.constant 6.400000e+01 : f32
    %5 = vector.broadcast %cst_2 : f32 to vector<16x1xf32>
    %6 = arith.divf %4, %5 : vector<16x1xf32>
    %7 = vector.broadcast %6 : vector<16x1xf32> to vector<16x64xf32>
    %8 = arith.subf %2, %7 : vector<16x64xf32>
    %9 = arith.mulf %8, %8 : vector<16x64xf32>
    %cst_3 = arith.constant dense<0.000000e+00> : vector<16xf32>
    %10 = vector.multi_reduction <add>, %9, %cst_3 [1] : vector<16x64xf32> to vector<16xf32>
    %11 = vector.shape_cast %10 : vector<16xf32> to vector<16x1xf32>
    %cst_4 = arith.constant 6.400000e+01 : f32
    %12 = vector.broadcast %cst_4 : f32 to vector<16x1xf32>
    %13 = arith.divf %11, %12 : vector<16x1xf32>
    %14 = vector.broadcast %6 : vector<16x1xf32> to vector<16x64xf32>
    %15 = arith.subf %2, %14 : vector<16x64xf32>
    %cst_5 = arith.constant 9.99999997E-7 : f32
    %16 = vector.broadcast %cst_5 : f32 to vector<16x1xf32>
    %17 = arith.addf %13, %16 : vector<16x1xf32>
    %18 = math.rsqrt %17 : vector<16x1xf32>
    %19 = vector.broadcast %18 : vector<16x1xf32> to vector<16x64xf32>
    %20 = arith.mulf %15, %19 : vector<16x64xf32>
    %c0_6 = arith.constant 0 : index
    %c0_7 = arith.constant 0 : index
    %c0_8 = arith.constant 0 : index
    %21 = vector.load %arg3[%c0_6, %c0_7, %c0_8] : memref<1x1x64xf32, #tpu.memory_space<vmem>>, vector<1x1x64xf32>
    %22 = vector.shape_cast %21 : vector<1x1x64xf32> to vector<1x64xf32>
    %cst_9 = arith.constant 1.000000e+00 : f32
    %23 = vector.broadcast %cst_9 : f32 to vector<1x64xf32>
    %24 = arith.addf %23, %22 : vector<1x64xf32>
    %25 = vector.broadcast %24 : vector<1x64xf32> to vector<16x64xf32>
    %26 = arith.mulf %25, %20 : vector<16x64xf32>
    %c0_10 = arith.constant 0 : index
    %c0_11 = arith.constant 0 : index
    %c0_12 = arith.constant 0 : index
    %27 = vector.load %arg4[%c0_10, %c0_11, %c0_12] : memref<1x1x64xf32, #tpu.memory_space<vmem>>, vector<1x1x64xf32>
    %28 = vector.shape_cast %27 : vector<1x1x64xf32> to vector<1x64xf32>
    %29 = vector.broadcast %28 : vector<1x64xf32> to vector<16x64xf32>
    %30 = arith.addf %26, %29 : vector<16x64xf32>
    %31 = arith.truncf %30 : vector<16x64xf32> to vector<16x64xbf16>
    %c0_13 = arith.constant 0 : index
    %c0_14 = arith.constant 0 : index
    %c0_15 = arith.constant 0 : index
    %32 = vector.load %arg5[%c0_13, %c0_14, %c0_15] : memref<1x16x64xbf16, #tpu.memory_space<vmem>>, vector<1x16x64xbf16>
    %33 = vector.shape_cast %32 : vector<1x16x64xbf16> to vector<16x64xbf16>
    %34 = vector.shape_cast %31 : vector<16x64xbf16> to vector<1x16x64xbf16>
    tpu.vector_store %arg5[%c0_13, %c0_14, %c0_15], %34 {strides = array<i32>} : memref<1x16x64xbf16, #tpu.memory_space<vmem>>, vector<1x16x64xbf16>,
    return
  }
  func.func @transform_0(%arg0: i32, %arg1: i32) -> (i32, i32, i32) {
    %c0_i32 = arith.constant 0 : i32
    %c0_i32_0 = arith.constant 0 : i32
    return %arg0, %arg1, %c0_i32 : i32, i32, i32
  }
  func.func @transform_1(%arg0: i32, %arg1: i32) -> (i32, i32, i32) {
    %c0_i32 = arith.constant 0 : i32
    %c0_i32_0 = arith.constant 0 : i32
    %c0_i32_1 = arith.constant 0 : i32
    return %arg0, %c0_i32, %c0_i32_0 : i32, i32, i32
  }
  func.func @transform_2(%arg0: i32, %arg1: i32) -> (i32, i32, i32) {
    %c0_i32 = arith.constant 0 : i32
    %c0_i32_0 = arith.constant 0 : i32
    %c0_i32_1 = arith.constant 0 : i32
    return %arg0, %c0_i32, %c0_i32_0 : i32, i32, i32
  }
  func.func @transform_3(%arg0: i32, %arg1: i32) -> (i32, i32, i32) {
    %c0_i32 = arith.constant 0 : i32
    %c0_i32_0 = arith.constant 0 : i32
    return %arg0, %arg1, %c0_i32 : i32, i32, i32
  }
}

module attributes {stable_mosaic.version = 11 : i64} {
  func.func @_linear_kernel(%arg0: i32, %arg1: i32, %arg2: i32, %arg3: memref<32x64xbf16, #tpu.memory_space<vmem>>, %arg4: memref<64x192xbf16, #tpu.memory_space<vmem>>, %arg5: memref<1x192xf32, #tpu.memory_space<vmem>>, %arg6: memref<32x192xbf16, #tpu.memory_space<vmem>>, %arg7: memref<32x192xf32, #tpu.memory_space<vmem>>) attributes {dimension_semantics = [#tpu.dimension_semantics<parallel>, #tpu.dimension_semantics<parallel>, #tpu.dimension_semantics<arbitrary>], iteration_bounds = array<i64: 1, 1, 1>, scalar_prefetch = 0 : i64, scratch_operands = 1 : i64, tpu.core_type = #tpu.core_type<tc>, window_params = [{transform_indices = @transform_0, window_bounds = array<i64: 32, 64>}, {transform_indices = @transform_1, window_bounds = array<i64: 64, 192>}, {transform_indices = @transform_2, window_bounds = array<i64: 1, 192>}, {transform_indices = @transform_3, window_bounds = array<i64: 32, 192>}]} {
    %c0_i32 = arith.constant 0 : i32
    %0 = arith.cmpi eq, %arg2, %c0_i32 : i32
    %1 = arith.extui %0 : i1 to i32
    %c0_i32_0 = arith.constant 0 : i32
    %2 = arith.cmpi ne, %1, %c0_i32_0 : i32
    scf.if %2 {
      %cst_10 = arith.constant 0.000000e+00 : f32
      %12 = vector.broadcast %cst_10 : f32 to vector<32x192xf32>
      %c0_11 = arith.constant 0 : index
      %c0_12 = arith.constant 0 : index
      %13 = vector.load %arg7[%c0_11, %c0_12] : memref<32x192xf32, #tpu.memory_space<vmem>>, vector<32x192xf32>
      tpu.vector_store %arg7[%c0_11, %c0_12], %12 {strides = array<i32>} : memref<32x192xf32, #tpu.memory_space<vmem>>, vector<32x192xf32>,
    } else {
    }
    %c0 = arith.constant 0 : index
    %c0_1 = arith.constant 0 : index
    %3 = vector.load %arg3[%c0, %c0_1] : memref<32x64xbf16, #tpu.memory_space<vmem>>, vector<32x64xbf16>
    %c0_2 = arith.constant 0 : index
    %c0_3 = arith.constant 0 : index
    %4 = vector.load %arg7[%c0_2, %c0_3] : memref<32x192xf32, #tpu.memory_space<vmem>>, vector<32x192xf32>
    %c0_4 = arith.constant 0 : index
    %c0_5 = arith.constant 0 : index
    %5 = vector.load %arg4[%c0_4, %c0_5] : memref<64x192xbf16, #tpu.memory_space<vmem>>, vector<64x192xbf16>
    %cst = arith.constant dense<0.000000e+00> : vector<32x192xf32>
    %6 = tpu.matmul %3, %5, %cst {dimension_numbers = #tpu.dot_dimension_numbers<[1], [0], [0], [1], [0, 0, 1, 1], [], []>} : vector<32x64xbf16>, vector<64x192xbf16>, vector<32x192xf32> -> vector<32x192xf32>
    %7 = arith.addf %4, %6 : vector<32x192xf32>
    %c0_6 = arith.constant 0 : index
    %c0_7 = arith.constant 0 : index
    %8 = vector.load %arg7[%c0_6, %c0_7] : memref<32x192xf32, #tpu.memory_space<vmem>>, vector<32x192xf32>
    tpu.vector_store %arg7[%c0_6, %c0_7], %7 {strides = array<i32>} : memref<32x192xf32, #tpu.memory_space<vmem>>, vector<32x192xf32>,
    %c0_i32_8 = arith.constant 0 : i32
    %9 = arith.cmpi eq, %arg2, %c0_i32_8 : i32
    %10 = arith.extui %9 : i1 to i32
    %c0_i32_9 = arith.constant 0 : i32
    %11 = arith.cmpi ne, %10, %c0_i32_9 : i32
    scf.if %11 {
      %c0_10 = arith.constant 0 : index
      %c0_11 = arith.constant 0 : index
      %12 = vector.load %arg7[%c0_10, %c0_11] : memref<32x192xf32, #tpu.memory_space<vmem>>, vector<32x192xf32>
      %c0_12 = arith.constant 0 : index
      %c0_13 = arith.constant 0 : index
      %13 = vector.load %arg5[%c0_12, %c0_13] : memref<1x192xf32, #tpu.memory_space<vmem>>, vector<1x192xf32>
      %14 = vector.broadcast %13 : vector<1x192xf32> to vector<32x192xf32>
      %15 = arith.addf %12, %14 : vector<32x192xf32>
      %16 = arith.truncf %15 : vector<32x192xf32> to vector<32x192xbf16>
      %c0_14 = arith.constant 0 : index
      %c0_15 = arith.constant 0 : index
      %17 = vector.load %arg6[%c0_14, %c0_15] : memref<32x192xbf16, #tpu.memory_space<vmem>>, vector<32x192xbf16>
      tpu.vector_store %arg6[%c0_14, %c0_15], %16 {strides = array<i32>} : memref<32x192xbf16, #tpu.memory_space<vmem>>, vector<32x192xbf16>,
    } else {
    }
    return
  }
  func.func @transform_0(%arg0: i32, %arg1: i32, %arg2: i32) -> (i32, i32) {
    %c0_i32 = arith.constant 0 : i32
    return %arg0, %arg2 : i32, i32
  }
  func.func @transform_1(%arg0: i32, %arg1: i32, %arg2: i32) -> (i32, i32) {
    %c0_i32 = arith.constant 0 : i32
    return %arg2, %arg1 : i32, i32
  }
  func.func @transform_2(%arg0: i32, %arg1: i32, %arg2: i32) -> (i32, i32) {
    %c0_i32 = arith.constant 0 : i32
    %c0_i32_0 = arith.constant 0 : i32
    return %c0_i32, %arg1 : i32, i32
  }
  func.func @transform_3(%arg0: i32, %arg1: i32, %arg2: i32) -> (i32, i32) {
    %c0_i32 = arith.constant 0 : i32
    return %arg0, %arg1 : i32, i32
  }
}

module attributes {stable_mosaic.version = 11 : i64} {
  func.func @_ln_mod_kernel(%arg0: i32, %arg1: i32, %arg2: memref<1x8x64xbf16, #tpu.memory_space<vmem>>, %arg3: memref<1x1x64xf32, #tpu.memory_space<vmem>>, %arg4: memref<1x1x64xf32, #tpu.memory_space<vmem>>, %arg5: memref<1x8x64xbf16, #tpu.memory_space<vmem>>) attributes {dimension_semantics = [#tpu.dimension_semantics<parallel>, #tpu.dimension_semantics<parallel>], iteration_bounds = array<i64: 2, 1>, scalar_prefetch = 0 : i64, scratch_operands = 0 : i64, tpu.core_type = #tpu.core_type<tc>, window_params = [{transform_indices = @transform_0, window_bounds = array<i64: 1, 8, 64>}, {transform_indices = @transform_1, window_bounds = array<i64: 1, 1, 64>}, {transform_indices = @transform_2, window_bounds = array<i64: 1, 1, 64>}, {transform_indices = @transform_3, window_bounds = array<i64: 1, 8, 64>}]} {
    %c0 = arith.constant 0 : index
    %c0_0 = arith.constant 0 : index
    %c0_1 = arith.constant 0 : index
    %0 = vector.load %arg2[%c0, %c0_0, %c0_1] : memref<1x8x64xbf16, #tpu.memory_space<vmem>>, vector<1x8x64xbf16>
    %1 = vector.shape_cast %0 : vector<1x8x64xbf16> to vector<8x64xbf16>
    %2 = arith.extf %1 : vector<8x64xbf16> to vector<8x64xf32>
    %cst = arith.constant dense<0.000000e+00> : vector<8xf32>
    %3 = vector.multi_reduction <add>, %2, %cst [1] : vector<8x64xf32> to vector<8xf32>
    %4 = vector.shape_cast %3 : vector<8xf32> to vector<8x1xf32>
    %cst_2 = arith.constant 6.400000e+01 : f32
    %5 = vector.broadcast %cst_2 : f32 to vector<8x1xf32>
    %6 = arith.divf %4, %5 : vector<8x1xf32>
    %7 = vector.broadcast %6 : vector<8x1xf32> to vector<8x64xf32>
    %8 = arith.subf %2, %7 : vector<8x64xf32>
    %9 = arith.mulf %8, %8 : vector<8x64xf32>
    %cst_3 = arith.constant dense<0.000000e+00> : vector<8xf32>
    %10 = vector.multi_reduction <add>, %9, %cst_3 [1] : vector<8x64xf32> to vector<8xf32>
    %11 = vector.shape_cast %10 : vector<8xf32> to vector<8x1xf32>
    %cst_4 = arith.constant 6.400000e+01 : f32
    %12 = vector.broadcast %cst_4 : f32 to vector<8x1xf32>
    %13 = arith.divf %11, %12 : vector<8x1xf32>
    %14 = vector.broadcast %6 : vector<8x1xf32> to vector<8x64xf32>
    %15 = arith.subf %2, %14 : vector<8x64xf32>
    %cst_5 = arith.constant 9.99999997E-7 : f32
    %16 = vector.broadcast %cst_5 : f32 to vector<8x1xf32>
    %17 = arith.addf %13, %16 : vector<8x1xf32>
    %18 = math.rsqrt %17 : vector<8x1xf32>
    %19 = vector.broadcast %18 : vector<8x1xf32> to vector<8x64xf32>
    %20 = arith.mulf %15, %19 : vector<8x64xf32>
    %c0_6 = arith.constant 0 : index
    %c0_7 = arith.constant 0 : index
    %c0_8 = arith.constant 0 : index
    %21 = vector.load %arg3[%c0_6, %c0_7, %c0_8] : memref<1x1x64xf32, #tpu.memory_space<vmem>>, vector<1x1x64xf32>
    %22 = vector.shape_cast %21 : vector<1x1x64xf32> to vector<1x64xf32>
    %cst_9 = arith.constant 1.000000e+00 : f32
    %23 = vector.broadcast %cst_9 : f32 to vector<1x64xf32>
    %24 = arith.addf %23, %22 : vector<1x64xf32>
    %25 = vector.broadcast %24 : vector<1x64xf32> to vector<8x64xf32>
    %26 = arith.mulf %25, %20 : vector<8x64xf32>
    %c0_10 = arith.constant 0 : index
    %c0_11 = arith.constant 0 : index
    %c0_12 = arith.constant 0 : index
    %27 = vector.load %arg4[%c0_10, %c0_11, %c0_12] : memref<1x1x64xf32, #tpu.memory_space<vmem>>, vector<1x1x64xf32>
    %28 = vector.shape_cast %27 : vector<1x1x64xf32> to vector<1x64xf32>
    %29 = vector.broadcast %28 : vector<1x64xf32> to vector<8x64xf32>
    %30 = arith.addf %26, %29 : vector<8x64xf32>
    %31 = arith.truncf %30 : vector<8x64xf32> to vector<8x64xbf16>
    %c0_13 = arith.constant 0 : index
    %c0_14 = arith.constant 0 : index
    %c0_15 = arith.constant 0 : index
    %32 = vector.load %arg5[%c0_13, %c0_14, %c0_15] : memref<1x8x64xbf16, #tpu.memory_space<vmem>>, vector<1x8x64xbf16>
    %33 = vector.shape_cast %32 : vector<1x8x64xbf16> to vector<8x64xbf16>
    %34 = vector.shape_cast %31 : vector<8x64xbf16> to vector<1x8x64xbf16>
    tpu.vector_store %arg5[%c0_13, %c0_14, %c0_15], %34 {strides = array<i32>} : memref<1x8x64xbf16, #tpu.memory_space<vmem>>, vector<1x8x64xbf16>,
    return
  }
  func.func @transform_0(%arg0: i32, %arg1: i32) -> (i32, i32, i32) {
    %c0_i32 = arith.constant 0 : i32
    %c0_i32_0 = arith.constant 0 : i32
    return %arg0, %arg1, %c0_i32 : i32, i32, i32
  }
  func.func @transform_1(%arg0: i32, %arg1: i32) -> (i32, i32, i32) {
    %c0_i32 = arith.constant 0 : i32
    %c0_i32_0 = arith.constant 0 : i32
    %c0_i32_1 = arith.constant 0 : i32
    return %arg0, %c0_i32, %c0_i32_0 : i32, i32, i32
  }
  func.func @transform_2(%arg0: i32, %arg1: i32) -> (i32, i32, i32) {
    %c0_i32 = arith.constant 0 : i32
    %c0_i32_0 = arith.constant 0 : i32
    %c0_i32_1 = arith.constant 0 : i32
    return %arg0, %c0_i32, %c0_i32_0 : i32, i32, i32
  }
  func.func @transform_3(%arg0: i32, %arg1: i32) -> (i32, i32, i32) {
    %c0_i32 = arith.constant 0 : i32
    %c0_i32_0 = arith.constant 0 : i32
    return %arg0, %arg1, %c0_i32 : i32, i32, i32
  }
}

module attributes {stable_mosaic.version = 11 : i64} {
  func.func @_linear_kernel(%arg0: i32, %arg1: i32, %arg2: i32, %arg3: memref<16x48xf32, #tpu.memory_space<vmem>>, %arg4: memref<48x64xbf16, #tpu.memory_space<vmem>>, %arg5: memref<1x64xf32, #tpu.memory_space<vmem>>, %arg6: memref<16x64xbf16, #tpu.memory_space<vmem>>, %arg7: memref<16x64xf32, #tpu.memory_space<vmem>>) attributes {dimension_semantics = [#tpu.dimension_semantics<parallel>, #tpu.dimension_semantics<parallel>, #tpu.dimension_semantics<arbitrary>], iteration_bounds = array<i64: 1, 1, 1>, scalar_prefetch = 0 : i64, scratch_operands = 1 : i64, tpu.core_type = #tpu.core_type<tc>, window_params = [{transform_indices = @transform_0, window_bounds = array<i64: 16, 48>}, {transform_indices = @transform_1, window_bounds = array<i64: 48, 64>}, {transform_indices = @transform_2, window_bounds = array<i64: 1, 64>}, {transform_indices = @transform_3, window_bounds = array<i64: 16, 64>}]} {
    %c0_i32 = arith.constant 0 : i32
    %0 = arith.cmpi eq, %arg2, %c0_i32 : i32
    %1 = arith.extui %0 : i1 to i32
    %c0_i32_0 = arith.constant 0 : i32
    %2 = arith.cmpi ne, %1, %c0_i32_0 : i32
    scf.if %2 {
      %cst_10 = arith.constant 0.000000e+00 : f32
      %13 = vector.broadcast %cst_10 : f32 to vector<16x64xf32>
      %c0_11 = arith.constant 0 : index
      %c0_12 = arith.constant 0 : index
      %14 = vector.load %arg7[%c0_11, %c0_12] : memref<16x64xf32, #tpu.memory_space<vmem>>, vector<16x64xf32>
      tpu.vector_store %arg7[%c0_11, %c0_12], %13 {strides = array<i32>} : memref<16x64xf32, #tpu.memory_space<vmem>>, vector<16x64xf32>,
    } else {
    }
    %c0 = arith.constant 0 : index
    %c0_1 = arith.constant 0 : index
    %3 = vector.load %arg3[%c0, %c0_1] : memref<16x48xf32, #tpu.memory_space<vmem>>, vector<16x48xf32>
    %c0_2 = arith.constant 0 : index
    %c0_3 = arith.constant 0 : index
    %4 = vector.load %arg7[%c0_2, %c0_3] : memref<16x64xf32, #tpu.memory_space<vmem>>, vector<16x64xf32>
    %5 = arith.truncf %3 : vector<16x48xf32> to vector<16x48xbf16>
    %c0_4 = arith.constant 0 : index
    %c0_5 = arith.constant 0 : index
    %6 = vector.load %arg4[%c0_4, %c0_5] : memref<48x64xbf16, #tpu.memory_space<vmem>>, vector<48x64xbf16>
    %cst = arith.constant dense<0.000000e+00> : vector<16x64xf32>
    %7 = tpu.matmul %5, %6, %cst {dimension_numbers = #tpu.dot_dimension_numbers<[1], [0], [0], [1], [0, 0, 1, 1], [], []>} : vector<16x48xbf16>, vector<48x64xbf16>, vector<16x64xf32> -> vector<16x64xf32>
    %8 = arith.addf %4, %7 : vector<16x64xf32>
    %c0_6 = arith.constant 0 : index
    %c0_7 = arith.constant 0 : index
    %9 = vector.load %arg7[%c0_6, %c0_7] : memref<16x64xf32, #tpu.memory_space<vmem>>, vector<16x64xf32>
    tpu.vector_store %arg7[%c0_6, %c0_7], %8 {strides = array<i32>} : memref<16x64xf32, #tpu.memory_space<vmem>>, vector<16x64xf32>,
    %c0_i32_8 = arith.constant 0 : i32
    %10 = arith.cmpi eq, %arg2, %c0_i32_8 : i32
    %11 = arith.extui %10 : i1 to i32
    %c0_i32_9 = arith.constant 0 : i32
    %12 = arith.cmpi ne, %11, %c0_i32_9 : i32
    scf.if %12 {
      %c0_10 = arith.constant 0 : index
      %c0_11 = arith.constant 0 : index
      %13 = vector.load %arg7[%c0_10, %c0_11] : memref<16x64xf32, #tpu.memory_space<vmem>>, vector<16x64xf32>
      %c0_12 = arith.constant 0 : index
      %c0_13 = arith.constant 0 : index
      %14 = vector.load %arg5[%c0_12, %c0_13] : memref<1x64xf32, #tpu.memory_space<vmem>>, vector<1x64xf32>
      %15 = vector.broadcast %14 : vector<1x64xf32> to vector<16x64xf32>
      %16 = arith.addf %13, %15 : vector<16x64xf32>
      %17 = arith.truncf %16 : vector<16x64xf32> to vector<16x64xbf16>
      %c0_14 = arith.constant 0 : index
      %c0_15 = arith.constant 0 : index
      %18 = vector.load %arg6[%c0_14, %c0_15] : memref<16x64xbf16, #tpu.memory_space<vmem>>, vector<16x64xbf16>
      tpu.vector_store %arg6[%c0_14, %c0_15], %17 {strides = array<i32>} : memref<16x64xbf16, #tpu.memory_space<vmem>>, vector<16x64xbf16>,
    } else {
    }
    return
  }
  func.func @transform_0(%arg0: i32, %arg1: i32, %arg2: i32) -> (i32, i32) {
    %c0_i32 = arith.constant 0 : i32
    return %arg0, %arg2 : i32, i32
  }
  func.func @transform_1(%arg0: i32, %arg1: i32, %arg2: i32) -> (i32, i32) {
    %c0_i32 = arith.constant 0 : i32
    return %arg2, %arg1 : i32, i32
  }
  func.func @transform_2(%arg0: i32, %arg1: i32, %arg2: i32) -> (i32, i32) {
    %c0_i32 = arith.constant 0 : i32
    %c0_i32_0 = arith.constant 0 : i32
    return %c0_i32, %arg1 : i32, i32
  }
  func.func @transform_3(%arg0: i32, %arg1: i32, %arg2: i32) -> (i32, i32) {
    %c0_i32 = arith.constant 0 : i32
    return %arg0, %arg1 : i32, i32
  }
}

module attributes {stable_mosaic.version = 11 : i64} {
  func.func @_linear_kernel(%arg0: i32, %arg1: i32, %arg2: i32, %arg3: memref<16x64xbf16, #tpu.memory_space<vmem>>, %arg4: memref<64x192xbf16, #tpu.memory_space<vmem>>, %arg5: memref<1x192xf32, #tpu.memory_space<vmem>>, %arg6: memref<16x192xbf16, #tpu.memory_space<vmem>>, %arg7: memref<16x192xf32, #tpu.memory_space<vmem>>) attributes {dimension_semantics = [#tpu.dimension_semantics<parallel>, #tpu.dimension_semantics<parallel>, #tpu.dimension_semantics<arbitrary>], iteration_bounds = array<i64: 1, 1, 1>, scalar_prefetch = 0 : i64, scratch_operands = 1 : i64, tpu.core_type = #tpu.core_type<tc>, window_params = [{transform_indices = @transform_0, window_bounds = array<i64: 16, 64>}, {transform_indices = @transform_1, window_bounds = array<i64: 64, 192>}, {transform_indices = @transform_2, window_bounds = array<i64: 1, 192>}, {transform_indices = @transform_3, window_bounds = array<i64: 16, 192>}]} {
    %c0_i32 = arith.constant 0 : i32
    %0 = arith.cmpi eq, %arg2, %c0_i32 : i32
    %1 = arith.extui %0 : i1 to i32
    %c0_i32_0 = arith.constant 0 : i32
    %2 = arith.cmpi ne, %1, %c0_i32_0 : i32
    scf.if %2 {
      %cst_10 = arith.constant 0.000000e+00 : f32
      %12 = vector.broadcast %cst_10 : f32 to vector<16x192xf32>
      %c0_11 = arith.constant 0 : index
      %c0_12 = arith.constant 0 : index
      %13 = vector.load %arg7[%c0_11, %c0_12] : memref<16x192xf32, #tpu.memory_space<vmem>>, vector<16x192xf32>
      tpu.vector_store %arg7[%c0_11, %c0_12], %12 {strides = array<i32>} : memref<16x192xf32, #tpu.memory_space<vmem>>, vector<16x192xf32>,
    } else {
    }
    %c0 = arith.constant 0 : index
    %c0_1 = arith.constant 0 : index
    %3 = vector.load %arg3[%c0, %c0_1] : memref<16x64xbf16, #tpu.memory_space<vmem>>, vector<16x64xbf16>
    %c0_2 = arith.constant 0 : index
    %c0_3 = arith.constant 0 : index
    %4 = vector.load %arg7[%c0_2, %c0_3] : memref<16x192xf32, #tpu.memory_space<vmem>>, vector<16x192xf32>
    %c0_4 = arith.constant 0 : index
    %c0_5 = arith.constant 0 : index
    %5 = vector.load %arg4[%c0_4, %c0_5] : memref<64x192xbf16, #tpu.memory_space<vmem>>, vector<64x192xbf16>
    %cst = arith.constant dense<0.000000e+00> : vector<16x192xf32>
    %6 = tpu.matmul %3, %5, %cst {dimension_numbers = #tpu.dot_dimension_numbers<[1], [0], [0], [1], [0, 0, 1, 1], [], []>} : vector<16x64xbf16>, vector<64x192xbf16>, vector<16x192xf32> -> vector<16x192xf32>
    %7 = arith.addf %4, %6 : vector<16x192xf32>
    %c0_6 = arith.constant 0 : index
    %c0_7 = arith.constant 0 : index
    %8 = vector.load %arg7[%c0_6, %c0_7] : memref<16x192xf32, #tpu.memory_space<vmem>>, vector<16x192xf32>
    tpu.vector_store %arg7[%c0_6, %c0_7], %7 {strides = array<i32>} : memref<16x192xf32, #tpu.memory_space<vmem>>, vector<16x192xf32>,
    %c0_i32_8 = arith.constant 0 : i32
    %9 = arith.cmpi eq, %arg2, %c0_i32_8 : i32
    %10 = arith.extui %9 : i1 to i32
    %c0_i32_9 = arith.constant 0 : i32
    %11 = arith.cmpi ne, %10, %c0_i32_9 : i32
    scf.if %11 {
      %c0_10 = arith.constant 0 : index
      %c0_11 = arith.constant 0 : index
      %12 = vector.load %arg7[%c0_10, %c0_11] : memref<16x192xf32, #tpu.memory_space<vmem>>, vector<16x192xf32>
      %c0_12 = arith.constant 0 : index
      %c0_13 = arith.constant 0 : index
      %13 = vector.load %arg5[%c0_12, %c0_13] : memref<1x192xf32, #tpu.memory_space<vmem>>, vector<1x192xf32>
      %14 = vector.broadcast %13 : vector<1x192xf32> to vector<16x192xf32>
      %15 = arith.addf %12, %14 : vector<16x192xf32>
      %16 = arith.truncf %15 : vector<16x192xf32> to vector<16x192xbf16>
      %c0_14 = arith.constant 0 : index
      %c0_15 = arith.constant 0 : index
      %17 = vector.load %arg6[%c0_14, %c0_15] : memref<16x192xbf16, #tpu.memory_space<vmem>>, vector<16x192xbf16>
      tpu.vector_store %arg6[%c0_14, %c0_15], %16 {strides = array<i32>} : memref<16x192xbf16, #tpu.memory_space<vmem>>, vector<16x192xbf16>,
    } else {
    }
    return
  }
  func.func @transform_0(%arg0: i32, %arg1: i32, %arg2: i32) -> (i32, i32) {
    %c0_i32 = arith.constant 0 : i32
    return %arg0, %arg2 : i32, i32
  }
  func.func @transform_1(%arg0: i32, %arg1: i32, %arg2: i32) -> (i32, i32) {
    %c0_i32 = arith.constant 0 : i32
    return %arg2, %arg1 : i32, i32
  }
  func.func @transform_2(%arg0: i32, %arg1: i32, %arg2: i32) -> (i32, i32) {
    %c0_i32 = arith.constant 0 : i32
    %c0_i32_0 = arith.constant 0 : i32
    return %c0_i32, %arg1 : i32, i32
  }
  func.func @transform_3(%arg0: i32, %arg1: i32, %arg2: i32) -> (i32, i32) {
    %c0_i32 = arith.constant 0 : i32
    return %arg0, %arg1 : i32, i32
  }
}

module attributes {stable_mosaic.version = 11 : i64} {
  func.func @_flash_attn_kernel(%arg0: i32, %arg1: i32, %arg2: i32, %arg3: memref<1x24x64xbf16, #tpu.memory_space<vmem>>, %arg4: memref<1x24x64xbf16, #tpu.memory_space<vmem>>, %arg5: memref<1x24x64xbf16, #tpu.memory_space<vmem>>, %arg6: memref<1x24x64xbf16, #tpu.memory_space<vmem>>, %arg7: memref<2x24x1xf32, #tpu.memory_space<vmem>>, %arg8: memref<2x24x1xf32, #tpu.memory_space<vmem>>, %arg9: memref<2x24x32xf32, #tpu.memory_space<vmem>>) attributes {dimension_semantics = [#tpu.dimension_semantics<parallel>, #tpu.dimension_semantics<parallel>, #tpu.dimension_semantics<arbitrary>], iteration_bounds = array<i64: 2, 1, 1>, scalar_prefetch = 0 : i64, scratch_operands = 3 : i64, tpu.core_type = #tpu.core_type<tc>, window_params = [{transform_indices = @transform_0, window_bounds = array<i64: 1, 24, 64>}, {transform_indices = @transform_1, window_bounds = array<i64: 1, 24, 64>}, {transform_indices = @transform_2, window_bounds = array<i64: 1, 24, 64>}, {transform_indices = @transform_3, window_bounds = array<i64: 1, 24, 64>}]} {
    %c0_i32 = arith.constant 0 : i32
    %0 = arith.cmpi eq, %arg2, %c0_i32 : i32
    %1 = arith.extui %0 : i1 to i32
    %c0_i32_0 = arith.constant 0 : i32
    %2 = arith.cmpi ne, %1, %c0_i32_0 : i32
    scf.if %2 {
      %cst_63 = arith.constant -1.000000e+30 : f32
      %92 = vector.broadcast %cst_63 : f32 to vector<2x24x1xf32>
      %c0_64 = arith.constant 0 : index
      %c0_65 = arith.constant 0 : index
      %c0_66 = arith.constant 0 : index
      %93 = vector.load %arg7[%c0_64, %c0_65, %c0_66] : memref<2x24x1xf32, #tpu.memory_space<vmem>>, vector<2x24x1xf32>
      tpu.vector_store %arg7[%c0_64, %c0_65, %c0_66], %92 {strides = array<i32>} : memref<2x24x1xf32, #tpu.memory_space<vmem>>, vector<2x24x1xf32>,
      %cst_67 = arith.constant 0.000000e+00 : f32
      %94 = vector.broadcast %cst_67 : f32 to vector<2x24x1xf32>
      %c0_68 = arith.constant 0 : index
      %c0_69 = arith.constant 0 : index
      %c0_70 = arith.constant 0 : index
      %95 = vector.load %arg8[%c0_68, %c0_69, %c0_70] : memref<2x24x1xf32, #tpu.memory_space<vmem>>, vector<2x24x1xf32>
      tpu.vector_store %arg8[%c0_68, %c0_69, %c0_70], %94 {strides = array<i32>} : memref<2x24x1xf32, #tpu.memory_space<vmem>>, vector<2x24x1xf32>,
      %cst_71 = arith.constant 0.000000e+00 : f32
      %96 = vector.broadcast %cst_71 : f32 to vector<2x24x32xf32>
      %c0_72 = arith.constant 0 : index
      %c0_73 = arith.constant 0 : index
      %c0_74 = arith.constant 0 : index
      %97 = vector.load %arg9[%c0_72, %c0_73, %c0_74] : memref<2x24x32xf32, #tpu.memory_space<vmem>>, vector<2x24x32xf32>
      tpu.vector_store %arg9[%c0_72, %c0_73, %c0_74], %96 {strides = array<i32>} : memref<2x24x32xf32, #tpu.memory_space<vmem>>, vector<2x24x32xf32>,
    } else {
    }
    %c0 = arith.constant 0 : index
    %c0_1 = arith.constant 0 : index
    %c0_2 = arith.constant 0 : index
    %3 = vector.load %arg3[%c0, %c0_1, %c0_2] : memref<1x24x64xbf16, #tpu.memory_space<vmem>>, vector<1x24x32xbf16>
    %4 = vector.shape_cast %3 : vector<1x24x32xbf16> to vector<24x32xbf16>
    %5 = arith.extf %4 : vector<24x32xbf16> to vector<24x32xf32>
    %cst = arith.constant 0.176776692 : f32
    %6 = vector.broadcast %cst : f32 to vector<24x32xf32>
    %7 = arith.mulf %5, %6 : vector<24x32xf32>
    %c0_3 = arith.constant 0 : index
    %c0_4 = arith.constant 0 : index
    %c0_5 = arith.constant 0 : index
    %8 = vector.load %arg4[%c0_3, %c0_4, %c0_5] : memref<1x24x64xbf16, #tpu.memory_space<vmem>>, vector<1x24x32xbf16>
    %9 = vector.shape_cast %8 : vector<1x24x32xbf16> to vector<24x32xbf16>
    %c0_6 = arith.constant 0 : index
    %c0_7 = arith.constant 0 : index
    %c0_8 = arith.constant 0 : index
    %10 = vector.load %arg5[%c0_6, %c0_7, %c0_8] : memref<1x24x64xbf16, #tpu.memory_space<vmem>>, vector<1x24x32xbf16>
    %11 = vector.shape_cast %10 : vector<1x24x32xbf16> to vector<24x32xbf16>
    %12 = arith.truncf %7 : vector<24x32xf32> to vector<24x32xbf16>
    %cst_9 = arith.constant dense<0.000000e+00> : vector<24x24xf32>
    %13 = tpu.matmul %12, %9, %cst_9 {dimension_numbers = #tpu.dot_dimension_numbers<[1], [1], [0], [0], [0, 0, 1, 0], [], []>} : vector<24x32xbf16>, vector<24x32xbf16>, vector<24x24xf32> -> vector<24x24xf32>
    %c0_10 = arith.constant 0 : index
    %c0_11 = arith.constant 0 : index
    %c0_12 = arith.constant 0 : index
    %14 = vector.load %arg7[%c0_10, %c0_11, %c0_12] : memref<2x24x1xf32, #tpu.memory_space<vmem>>, vector<1x24x1xf32>
    %15 = vector.shape_cast %14 : vector<1x24x1xf32> to vector<24x1xf32>
    %cst_13 = arith.constant dense<0xFF800000> : vector<24xf32>
    %16 = vector.multi_reduction <maximumf>, %13, %cst_13 [1] : vector<24x24xf32> to vector<24xf32>
    %17 = vector.shape_cast %16 : vector<24xf32> to vector<24x1xf32>
    %18 = arith.maximumf %15, %17 : vector<24x1xf32>
    %19 = arith.subf %15, %18 : vector<24x1xf32>
    %20 = math.exp %19 : vector<24x1xf32>
    %21 = vector.broadcast %18 : vector<24x1xf32> to vector<24x24xf32>
    %22 = arith.subf %13, %21 : vector<24x24xf32>
    %23 = math.exp %22 : vector<24x24xf32>
    %c0_14 = arith.constant 0 : index
    %c0_15 = arith.constant 0 : index
    %c0_16 = arith.constant 0 : index
    %24 = vector.load %arg8[%c0_14, %c0_15, %c0_16] : memref<2x24x1xf32, #tpu.memory_space<vmem>>, vector<1x24x1xf32>
    %25 = vector.shape_cast %24 : vector<1x24x1xf32> to vector<24x1xf32>
    %26 = arith.mulf %20, %25 : vector<24x1xf32>
    %cst_17 = arith.constant dense<0.000000e+00> : vector<24xf32>
    %27 = vector.multi_reduction <add>, %23, %cst_17 [1] : vector<24x24xf32> to vector<24xf32>
    %28 = vector.shape_cast %27 : vector<24xf32> to vector<24x1xf32>
    %29 = arith.addf %26, %28 : vector<24x1xf32>
    %c0_18 = arith.constant 0 : index
    %c0_19 = arith.constant 0 : index
    %c0_20 = arith.constant 0 : index
    %30 = vector.load %arg8[%c0_18, %c0_19, %c0_20] : memref<2x24x1xf32, #tpu.memory_space<vmem>>, vector<1x24x1xf32>
    %31 = vector.shape_cast %30 : vector<1x24x1xf32> to vector<24x1xf32>
    %32 = vector.shape_cast %29 : vector<24x1xf32> to vector<1x24x1xf32>
    tpu.vector_store %arg8[%c0_18, %c0_19, %c0_20], %32 {strides = array<i32>} : memref<2x24x1xf32, #tpu.memory_space<vmem>>, vector<1x24x1xf32>,
    %c0_21 = arith.constant 0 : index
    %c0_22 = arith.constant 0 : index
    %c0_23 = arith.constant 0 : index
    %33 = vector.load %arg9[%c0_21, %c0_22, %c0_23] : memref<2x24x32xf32, #tpu.memory_space<vmem>>, vector<1x24x32xf32>
    %34 = vector.shape_cast %33 : vector<1x24x32xf32> to vector<24x32xf32>
    %35 = vector.broadcast %20 : vector<24x1xf32> to vector<24x32xf32>
    %36 = arith.mulf %35, %34 : vector<24x32xf32>
    %37 = arith.truncf %23 : vector<24x24xf32> to vector<24x24xbf16>
    %cst_24 = arith.constant dense<0.000000e+00> : vector<24x32xf32>
    %38 = tpu.matmul %37, %11, %cst_24 {dimension_numbers = #tpu.dot_dimension_numbers<[1], [0], [0], [1], [0, 0, 1, 1], [], []>} : vector<24x24xbf16>, vector<24x32xbf16>, vector<24x32xf32> -> vector<24x32xf32>
    %39 = arith.addf %36, %38 : vector<24x32xf32>
    %c0_25 = arith.constant 0 : index
    %c0_26 = arith.constant 0 : index
    %c0_27 = arith.constant 0 : index
    %40 = vector.load %arg9[%c0_25, %c0_26, %c0_27] : memref<2x24x32xf32, #tpu.memory_space<vmem>>, vector<1x24x32xf32>
    %41 = vector.shape_cast %40 : vector<1x24x32xf32> to vector<24x32xf32>
    %42 = vector.shape_cast %39 : vector<24x32xf32> to vector<1x24x32xf32>
    tpu.vector_store %arg9[%c0_25, %c0_26, %c0_27], %42 {strides = array<i32>} : memref<2x24x32xf32, #tpu.memory_space<vmem>>, vector<1x24x32xf32>,
    %c0_28 = arith.constant 0 : index
    %c0_29 = arith.constant 0 : index
    %c0_30 = arith.constant 0 : index
    %43 = vector.load %arg7[%c0_28, %c0_29, %c0_30] : memref<2x24x1xf32, #tpu.memory_space<vmem>>, vector<1x24x1xf32>
    %44 = vector.shape_cast %43 : vector<1x24x1xf32> to vector<24x1xf32>
    %45 = vector.shape_cast %18 : vector<24x1xf32> to vector<1x24x1xf32>
    tpu.vector_store %arg7[%c0_28, %c0_29, %c0_30], %45 {strides = array<i32>} : memref<2x24x1xf32, #tpu.memory_space<vmem>>, vector<1x24x1xf32>,
    %c0_31 = arith.constant 0 : index
    %c0_32 = arith.constant 0 : index
    %c32 = arith.constant 32 : index
    %46 = vector.load %arg3[%c0_31, %c0_32, %c32] : memref<1x24x64xbf16, #tpu.memory_space<vmem>>, vector<1x24x32xbf16>
    %47 = vector.shape_cast %46 : vector<1x24x32xbf16> to vector<24x32xbf16>
    %48 = arith.extf %47 : vector<24x32xbf16> to vector<24x32xf32>
    %cst_33 = arith.constant 0.176776692 : f32
    %49 = vector.broadcast %cst_33 : f32 to vector<24x32xf32>
    %50 = arith.mulf %48, %49 : vector<24x32xf32>
    %c0_34 = arith.constant 0 : index
    %c0_35 = arith.constant 0 : index
    %c32_36 = arith.constant 32 : index
    %51 = vector.load %arg4[%c0_34, %c0_35, %c32_36] : memref<1x24x64xbf16, #tpu.memory_space<vmem>>, vector<1x24x32xbf16>
    %52 = vector.shape_cast %51 : vector<1x24x32xbf16> to vector<24x32xbf16>
    %c0_37 = arith.constant 0 : index
    %c0_38 = arith.constant 0 : index
    %c32_39 = arith.constant 32 : index
    %53 = vector.load %arg5[%c0_37, %c0_38, %c32_39] : memref<1x24x64xbf16, #tpu.memory_space<vmem>>, vector<1x24x32xbf16>
    %54 = vector.shape_cast %53 : vector<1x24x32xbf16> to vector<24x32xbf16>
    %55 = arith.truncf %50 : vector<24x32xf32> to vector<24x32xbf16>
    %cst_40 = arith.constant dense<0.000000e+00> : vector<24x24xf32>
    %56 = tpu.matmul %55, %52, %cst_40 {dimension_numbers = #tpu.dot_dimension_numbers<[1], [1], [0], [0], [0, 0, 1, 0], [], []>} : vector<24x32xbf16>, vector<24x32xbf16>, vector<24x24xf32> -> vector<24x24xf32>
    %c1 = arith.constant 1 : index
    %c0_41 = arith.constant 0 : index
    %c0_42 = arith.constant 0 : index
    %57 = vector.load %arg7[%c1, %c0_41, %c0_42] : memref<2x24x1xf32, #tpu.memory_space<vmem>>, vector<1x24x1xf32>
    %58 = vector.shape_cast %57 : vector<1x24x1xf32> to vector<24x1xf32>
    %cst_43 = arith.constant dense<0xFF800000> : vector<24xf32>
    %59 = vector.multi_reduction <maximumf>, %56, %cst_43 [1] : vector<24x24xf32> to vector<24xf32>
    %60 = vector.shape_cast %59 : vector<24xf32> to vector<24x1xf32>
    %61 = arith.maximumf %58, %60 : vector<24x1xf32>
    %62 = arith.subf %58, %61 : vector<24x1xf32>
    %63 = math.exp %62 : vector<24x1xf32>
    %64 = vector.broadcast %61 : vector<24x1xf32> to vector<24x24xf32>
    %65 = arith.subf %56, %64 : vector<24x24xf32>
    %66 = math.exp %65 : vector<24x24xf32>
    %c1_44 = arith.constant 1 : index
    %c0_45 = arith.constant 0 : index
    %c0_46 = arith.constant 0 : index
    %67 = vector.load %arg8[%c1_44, %c0_45, %c0_46] : memref<2x24x1xf32, #tpu.memory_space<vmem>>, vector<1x24x1xf32>
    %68 = vector.shape_cast %67 : vector<1x24x1xf32> to vector<24x1xf32>
    %69 = arith.mulf %63, %68 : vector<24x1xf32>
    %cst_47 = arith.constant dense<0.000000e+00> : vector<24xf32>
    %70 = vector.multi_reduction <add>, %66, %cst_47 [1] : vector<24x24xf32> to vector<24xf32>
    %71 = vector.shape_cast %70 : vector<24xf32> to vector<24x1xf32>
    %72 = arith.addf %69, %71 : vector<24x1xf32>
    %c1_48 = arith.constant 1 : index
    %c0_49 = arith.constant 0 : index
    %c0_50 = arith.constant 0 : index
    %73 = vector.load %arg8[%c1_48, %c0_49, %c0_50] : memref<2x24x1xf32, #tpu.memory_space<vmem>>, vector<1x24x1xf32>
    %74 = vector.shape_cast %73 : vector<1x24x1xf32> to vector<24x1xf32>
    %75 = vector.shape_cast %72 : vector<24x1xf32> to vector<1x24x1xf32>
    tpu.vector_store %arg8[%c1_48, %c0_49, %c0_50], %75 {strides = array<i32>} : memref<2x24x1xf32, #tpu.memory_space<vmem>>, vector<1x24x1xf32>,
    %c1_51 = arith.constant 1 : index
    %c0_52 = arith.constant 0 : index
    %c0_53 = arith.constant 0 : index
    %76 = vector.load %arg9[%c1_51, %c0_52, %c0_53] : memref<2x24x32xf32, #tpu.memory_space<vmem>>, vector<1x24x32xf32>
    %77 = vector.shape_cast %76 : vector<1x24x32xf32> to vector<24x32xf32>
    %78 = vector.broadcast %63 : vector<24x1xf32> to vector<24x32xf32>
    %79 = arith.mulf %78, %77 : vector<24x32xf32>
    %80 = arith.truncf %66 : vector<24x24xf32> to vector<24x24xbf16>
    %cst_54 = arith.constant dense<0.000000e+00> : vector<24x32xf32>
    %81 = tpu.matmul %80, %54, %cst_54 {dimension_numbers = #tpu.dot_dimension_numbers<[1], [0], [0], [1], [0, 0, 1, 1], [], []>} : vector<24x24xbf16>, vector<24x32xbf16>, vector<24x32xf32> -> vector<24x32xf32>
    %82 = arith.addf %79, %81 : vector<24x32xf32>
    %c1_55 = arith.constant 1 : index
    %c0_56 = arith.constant 0 : index
    %c0_57 = arith.constant 0 : index
    %83 = vector.load %arg9[%c1_55, %c0_56, %c0_57] : memref<2x24x32xf32, #tpu.memory_space<vmem>>, vector<1x24x32xf32>
    %84 = vector.shape_cast %83 : vector<1x24x32xf32> to vector<24x32xf32>
    %85 = vector.shape_cast %82 : vector<24x32xf32> to vector<1x24x32xf32>
    tpu.vector_store %arg9[%c1_55, %c0_56, %c0_57], %85 {strides = array<i32>} : memref<2x24x32xf32, #tpu.memory_space<vmem>>, vector<1x24x32xf32>,
    %c1_58 = arith.constant 1 : index
    %c0_59 = arith.constant 0 : index
    %c0_60 = arith.constant 0 : index
    %86 = vector.load %arg7[%c1_58, %c0_59, %c0_60] : memref<2x24x1xf32, #tpu.memory_space<vmem>>, vector<1x24x1xf32>
    %87 = vector.shape_cast %86 : vector<1x24x1xf32> to vector<24x1xf32>
    %88 = vector.shape_cast %61 : vector<24x1xf32> to vector<1x24x1xf32>
    tpu.vector_store %arg7[%c1_58, %c0_59, %c0_60], %88 {strides = array<i32>} : memref<2x24x1xf32, #tpu.memory_space<vmem>>, vector<1x24x1xf32>,
    %c0_i32_61 = arith.constant 0 : i32
    %89 = arith.cmpi eq, %arg2, %c0_i32_61 : i32
    %90 = arith.extui %89 : i1 to i32
    %c0_i32_62 = arith.constant 0 : i32
    %91 = arith.cmpi ne, %90, %c0_i32_62 : i32
    scf.if %91 {
      %c0_63 = arith.constant 0 : index
      %c0_64 = arith.constant 0 : index
      %c0_65 = arith.constant 0 : index
      %92 = vector.load %arg8[%c0_63, %c0_64, %c0_65] : memref<2x24x1xf32, #tpu.memory_space<vmem>>, vector<1x24x1xf32>
      %93 = vector.shape_cast %92 : vector<1x24x1xf32> to vector<24x1xf32>
      %94 = tpu.reciprocal %93 {approx = true} : vector<24x1xf32> -> vector<24x1xf32>
      %c0_66 = arith.constant 0 : index
      %c0_67 = arith.constant 0 : index
      %c0_68 = arith.constant 0 : index
      %95 = vector.load %arg9[%c0_66, %c0_67, %c0_68] : memref<2x24x32xf32, #tpu.memory_space<vmem>>, vector<1x24x32xf32>
      %96 = vector.shape_cast %95 : vector<1x24x32xf32> to vector<24x32xf32>
      %97 = vector.broadcast %94 : vector<24x1xf32> to vector<24x32xf32>
      %98 = arith.mulf %96, %97 : vector<24x32xf32>
      %99 = arith.truncf %98 : vector<24x32xf32> to vector<24x32xbf16>
      %c0_69 = arith.constant 0 : index
      %c0_70 = arith.constant 0 : index
      %c0_71 = arith.constant 0 : index
      %100 = vector.load %arg6[%c0_69, %c0_70, %c0_71] : memref<1x24x64xbf16, #tpu.memory_space<vmem>>, vector<1x24x32xbf16>
      %101 = vector.shape_cast %100 : vector<1x24x32xbf16> to vector<24x32xbf16>
      %102 = vector.shape_cast %99 : vector<24x32xbf16> to vector<1x24x32xbf16>
      tpu.vector_store %arg6[%c0_69, %c0_70, %c0_71], %102 {strides = array<i32>} : memref<1x24x64xbf16, #tpu.memory_space<vmem>>, vector<1x24x32xbf16>,
      %c1_72 = arith.constant 1 : index
      %c0_73 = arith.constant 0 : index
      %c0_74 = arith.constant 0 : index
      %103 = vector.load %arg8[%c1_72, %c0_73, %c0_74] : memref<2x24x1xf32, #tpu.memory_space<vmem>>, vector<1x24x1xf32>
      %104 = vector.shape_cast %103 : vector<1x24x1xf32> to vector<24x1xf32>
      %105 = tpu.reciprocal %104 {approx = true} : vector<24x1xf32> -> vector<24x1xf32>
      %c1_75 = arith.constant 1 : index
      %c0_76 = arith.constant 0 : index
      %c0_77 = arith.constant 0 : index
      %106 = vector.load %arg9[%c1_75, %c0_76, %c0_77] : memref<2x24x32xf32, #tpu.memory_space<vmem>>, vector<1x24x32xf32>
      %107 = vector.shape_cast %106 : vector<1x24x32xf32> to vector<24x32xf32>
      %108 = vector.broadcast %105 : vector<24x1xf32> to vector<24x32xf32>
      %109 = arith.mulf %107, %108 : vector<24x32xf32>
      %110 = arith.truncf %109 : vector<24x32xf32> to vector<24x32xbf16>
      %c0_78 = arith.constant 0 : index
      %c0_79 = arith.constant 0 : index
      %c32_80 = arith.constant 32 : index
      %111 = vector.load %arg6[%c0_78, %c0_79, %c32_80] : memref<1x24x64xbf16, #tpu.memory_space<vmem>>, vector<1x24x32xbf16>
      %112 = vector.shape_cast %111 : vector<1x24x32xbf16> to vector<24x32xbf16>
      %113 = vector.shape_cast %110 : vector<24x32xbf16> to vector<1x24x32xbf16>
      tpu.vector_store %arg6[%c0_78, %c0_79, %c32_80], %113 {strides = array<i32>} : memref<1x24x64xbf16, #tpu.memory_space<vmem>>, vector<1x24x32xbf16>,
    } else {
    }
    return
  }
  func.func @transform_0(%arg0: i32, %arg1: i32, %arg2: i32) -> (i32, i32, i32) {
    %c0_i32 = arith.constant 0 : i32
    %c0_i32_0 = arith.constant 0 : i32
    return %arg0, %arg1, %c0_i32 : i32, i32, i32
  }
  func.func @transform_1(%arg0: i32, %arg1: i32, %arg2: i32) -> (i32, i32, i32) {
    %c0_i32 = arith.constant 0 : i32
    %c0_i32_0 = arith.constant 0 : i32
    return %arg0, %arg2, %c0_i32 : i32, i32, i32
  }
  func.func @transform_2(%arg0: i32, %arg1: i32, %arg2: i32) -> (i32, i32, i32) {
    %c0_i32 = arith.constant 0 : i32
    %c0_i32_0 = arith.constant 0 : i32
    return %arg0, %arg2, %c0_i32 : i32, i32, i32
  }
  func.func @transform_3(%arg0: i32, %arg1: i32, %arg2: i32) -> (i32, i32, i32) {
    %c0_i32 = arith.constant 0 : i32
    %c0_i32_0 = arith.constant 0 : i32
    return %arg0, %arg1, %c0_i32 : i32, i32, i32
  }
}

module attributes {stable_mosaic.version = 11 : i64} {
  func.func @_linear_kernel(%arg0: i32, %arg1: i32, %arg2: i32, %arg3: memref<32x64xbf16, #tpu.memory_space<vmem>>, %arg4: memref<64x64xbf16, #tpu.memory_space<vmem>>, %arg5: memref<1x64xf32, #tpu.memory_space<vmem>>, %arg6: memref<32x64xbf16, #tpu.memory_space<vmem>>, %arg7: memref<32x64xf32, #tpu.memory_space<vmem>>) attributes {dimension_semantics = [#tpu.dimension_semantics<parallel>, #tpu.dimension_semantics<parallel>, #tpu.dimension_semantics<arbitrary>], iteration_bounds = array<i64: 1, 1, 1>, scalar_prefetch = 0 : i64, scratch_operands = 1 : i64, tpu.core_type = #tpu.core_type<tc>, window_params = [{transform_indices = @transform_0, window_bounds = array<i64: 32, 64>}, {transform_indices = @transform_1, window_bounds = array<i64: 64, 64>}, {transform_indices = @transform_2, window_bounds = array<i64: 1, 64>}, {transform_indices = @transform_3, window_bounds = array<i64: 32, 64>}]} {
    %c0_i32 = arith.constant 0 : i32
    %0 = arith.cmpi eq, %arg2, %c0_i32 : i32
    %1 = arith.extui %0 : i1 to i32
    %c0_i32_0 = arith.constant 0 : i32
    %2 = arith.cmpi ne, %1, %c0_i32_0 : i32
    scf.if %2 {
      %cst_10 = arith.constant 0.000000e+00 : f32
      %12 = vector.broadcast %cst_10 : f32 to vector<32x64xf32>
      %c0_11 = arith.constant 0 : index
      %c0_12 = arith.constant 0 : index
      %13 = vector.load %arg7[%c0_11, %c0_12] : memref<32x64xf32, #tpu.memory_space<vmem>>, vector<32x64xf32>
      tpu.vector_store %arg7[%c0_11, %c0_12], %12 {strides = array<i32>} : memref<32x64xf32, #tpu.memory_space<vmem>>, vector<32x64xf32>,
    } else {
    }
    %c0 = arith.constant 0 : index
    %c0_1 = arith.constant 0 : index
    %3 = vector.load %arg3[%c0, %c0_1] : memref<32x64xbf16, #tpu.memory_space<vmem>>, vector<32x64xbf16>
    %c0_2 = arith.constant 0 : index
    %c0_3 = arith.constant 0 : index
    %4 = vector.load %arg7[%c0_2, %c0_3] : memref<32x64xf32, #tpu.memory_space<vmem>>, vector<32x64xf32>
    %c0_4 = arith.constant 0 : index
    %c0_5 = arith.constant 0 : index
    %5 = vector.load %arg4[%c0_4, %c0_5] : memref<64x64xbf16, #tpu.memory_space<vmem>>, vector<64x64xbf16>
    %cst = arith.constant dense<0.000000e+00> : vector<32x64xf32>
    %6 = tpu.matmul %3, %5, %cst {dimension_numbers = #tpu.dot_dimension_numbers<[1], [0], [0], [1], [0, 0, 1, 1], [], []>} : vector<32x64xbf16>, vector<64x64xbf16>, vector<32x64xf32> -> vector<32x64xf32>
    %7 = arith.addf %4, %6 : vector<32x64xf32>
    %c0_6 = arith.constant 0 : index
    %c0_7 = arith.constant 0 : index
    %8 = vector.load %arg7[%c0_6, %c0_7] : memref<32x64xf32, #tpu.memory_space<vmem>>, vector<32x64xf32>
    tpu.vector_store %arg7[%c0_6, %c0_7], %7 {strides = array<i32>} : memref<32x64xf32, #tpu.memory_space<vmem>>, vector<32x64xf32>,
    %c0_i32_8 = arith.constant 0 : i32
    %9 = arith.cmpi eq, %arg2, %c0_i32_8 : i32
    %10 = arith.extui %9 : i1 to i32
    %c0_i32_9 = arith.constant 0 : i32
    %11 = arith.cmpi ne, %10, %c0_i32_9 : i32
    scf.if %11 {
      %c0_10 = arith.constant 0 : index
      %c0_11 = arith.constant 0 : index
      %12 = vector.load %arg7[%c0_10, %c0_11] : memref<32x64xf32, #tpu.memory_space<vmem>>, vector<32x64xf32>
      %c0_12 = arith.constant 0 : index
      %c0_13 = arith.constant 0 : index
      %13 = vector.load %arg5[%c0_12, %c0_13] : memref<1x64xf32, #tpu.memory_space<vmem>>, vector<1x64xf32>
      %14 = vector.broadcast %13 : vector<1x64xf32> to vector<32x64xf32>
      %15 = arith.addf %12, %14 : vector<32x64xf32>
      %16 = arith.truncf %15 : vector<32x64xf32> to vector<32x64xbf16>
      %c0_14 = arith.constant 0 : index
      %c0_15 = arith.constant 0 : index
      %17 = vector.load %arg6[%c0_14, %c0_15] : memref<32x64xbf16, #tpu.memory_space<vmem>>, vector<32x64xbf16>
      tpu.vector_store %arg6[%c0_14, %c0_15], %16 {strides = array<i32>} : memref<32x64xbf16, #tpu.memory_space<vmem>>, vector<32x64xbf16>,
    } else {
    }
    return
  }
  func.func @transform_0(%arg0: i32, %arg1: i32, %arg2: i32) -> (i32, i32) {
    %c0_i32 = arith.constant 0 : i32
    return %arg0, %arg2 : i32, i32
  }
  func.func @transform_1(%arg0: i32, %arg1: i32, %arg2: i32) -> (i32, i32) {
    %c0_i32 = arith.constant 0 : i32
    return %arg2, %arg1 : i32, i32
  }
  func.func @transform_2(%arg0: i32, %arg1: i32, %arg2: i32) -> (i32, i32) {
    %c0_i32 = arith.constant 0 : i32
    %c0_i32_0 = arith.constant 0 : i32
    return %c0_i32, %arg1 : i32, i32
  }
  func.func @transform_3(%arg0: i32, %arg1: i32, %arg2: i32) -> (i32, i32) {
    %c0_i32 = arith.constant 0 : i32
    return %arg0, %arg1 : i32, i32
  }
}

module attributes {stable_mosaic.version = 11 : i64} {
  func.func @_linear_kernel(%arg0: i32, %arg1: i32, %arg2: i32, %arg3: memref<32x64xbf16, #tpu.memory_space<vmem>>, %arg4: memref<64x128xbf16, #tpu.memory_space<vmem>>, %arg5: memref<1x128xf32, #tpu.memory_space<vmem>>, %arg6: memref<32x128xbf16, #tpu.memory_space<vmem>>, %arg7: memref<32x128xf32, #tpu.memory_space<vmem>>) attributes {dimension_semantics = [#tpu.dimension_semantics<parallel>, #tpu.dimension_semantics<parallel>, #tpu.dimension_semantics<arbitrary>], iteration_bounds = array<i64: 1, 1, 1>, scalar_prefetch = 0 : i64, scratch_operands = 1 : i64, tpu.core_type = #tpu.core_type<tc>, window_params = [{transform_indices = @transform_0, window_bounds = array<i64: 32, 64>}, {transform_indices = @transform_1, window_bounds = array<i64: 64, 128>}, {transform_indices = @transform_2, window_bounds = array<i64: 1, 128>}, {transform_indices = @transform_3, window_bounds = array<i64: 32, 128>}]} {
    %c0_i32 = arith.constant 0 : i32
    %0 = arith.cmpi eq, %arg2, %c0_i32 : i32
    %1 = arith.extui %0 : i1 to i32
    %c0_i32_0 = arith.constant 0 : i32
    %2 = arith.cmpi ne, %1, %c0_i32_0 : i32
    scf.if %2 {
      %cst_10 = arith.constant 0.000000e+00 : f32
      %12 = vector.broadcast %cst_10 : f32 to vector<32x128xf32>
      %c0_11 = arith.constant 0 : index
      %c0_12 = arith.constant 0 : index
      %13 = vector.load %arg7[%c0_11, %c0_12] : memref<32x128xf32, #tpu.memory_space<vmem>>, vector<32x128xf32>
      tpu.vector_store %arg7[%c0_11, %c0_12], %12 {strides = array<i32>} : memref<32x128xf32, #tpu.memory_space<vmem>>, vector<32x128xf32>,
    } else {
    }
    %c0 = arith.constant 0 : index
    %c0_1 = arith.constant 0 : index
    %3 = vector.load %arg3[%c0, %c0_1] : memref<32x64xbf16, #tpu.memory_space<vmem>>, vector<32x64xbf16>
    %c0_2 = arith.constant 0 : index
    %c0_3 = arith.constant 0 : index
    %4 = vector.load %arg7[%c0_2, %c0_3] : memref<32x128xf32, #tpu.memory_space<vmem>>, vector<32x128xf32>
    %c0_4 = arith.constant 0 : index
    %c0_5 = arith.constant 0 : index
    %5 = vector.load %arg4[%c0_4, %c0_5] : memref<64x128xbf16, #tpu.memory_space<vmem>>, vector<64x128xbf16>
    %cst = arith.constant dense<0.000000e+00> : vector<32x128xf32>
    %6 = tpu.matmul %3, %5, %cst {dimension_numbers = #tpu.dot_dimension_numbers<[1], [0], [0], [1], [0, 0, 1, 1], [], []>} : vector<32x64xbf16>, vector<64x128xbf16>, vector<32x128xf32> -> vector<32x128xf32>
    %7 = arith.addf %4, %6 : vector<32x128xf32>
    %c0_6 = arith.constant 0 : index
    %c0_7 = arith.constant 0 : index
    %8 = vector.load %arg7[%c0_6, %c0_7] : memref<32x128xf32, #tpu.memory_space<vmem>>, vector<32x128xf32>
    tpu.vector_store %arg7[%c0_6, %c0_7], %7 {strides = array<i32>} : memref<32x128xf32, #tpu.memory_space<vmem>>, vector<32x128xf32>,
    %c0_i32_8 = arith.constant 0 : i32
    %9 = arith.cmpi eq, %arg2, %c0_i32_8 : i32
    %10 = arith.extui %9 : i1 to i32
    %c0_i32_9 = arith.constant 0 : i32
    %11 = arith.cmpi ne, %10, %c0_i32_9 : i32
    scf.if %11 {
      %c0_10 = arith.constant 0 : index
      %c0_11 = arith.constant 0 : index
      %12 = vector.load %arg7[%c0_10, %c0_11] : memref<32x128xf32, #tpu.memory_space<vmem>>, vector<32x128xf32>
      %c0_12 = arith.constant 0 : index
      %c0_13 = arith.constant 0 : index
      %13 = vector.load %arg5[%c0_12, %c0_13] : memref<1x128xf32, #tpu.memory_space<vmem>>, vector<1x128xf32>
      %14 = vector.broadcast %13 : vector<1x128xf32> to vector<32x128xf32>
      %15 = arith.addf %12, %14 : vector<32x128xf32>
      %16 = arith.mulf %15, %15 : vector<32x128xf32>
      %17 = arith.mulf %15, %16 : vector<32x128xf32>
      %cst_14 = arith.constant 4.471500e-02 : f32
      %18 = vector.broadcast %cst_14 : f32 to vector<32x128xf32>
      %19 = arith.mulf %18, %17 : vector<32x128xf32>
      %20 = arith.addf %15, %19 : vector<32x128xf32>
      %cst_15 = arith.constant 0.797884583 : f32
      %21 = vector.broadcast %cst_15 : f32 to vector<32x128xf32>
      %22 = arith.mulf %21, %20 : vector<32x128xf32>
      %23 = math.tanh %22 : vector<32x128xf32>
      %cst_16 = arith.constant 1.000000e+00 : f32
      %24 = vector.broadcast %cst_16 : f32 to vector<32x128xf32>
      %25 = arith.addf %24, %23 : vector<32x128xf32>
      %cst_17 = arith.constant 5.000000e-01 : f32
      %26 = vector.broadcast %cst_17 : f32 to vector<32x128xf32>
      %27 = arith.mulf %26, %25 : vector<32x128xf32>
      %28 = arith.mulf %15, %27 : vector<32x128xf32>
      %29 = arith.truncf %28 : vector<32x128xf32> to vector<32x128xbf16>
      %c0_18 = arith.constant 0 : index
      %c0_19 = arith.constant 0 : index
      %30 = vector.load %arg6[%c0_18, %c0_19] : memref<32x128xbf16, #tpu.memory_space<vmem>>, vector<32x128xbf16>
      tpu.vector_store %arg6[%c0_18, %c0_19], %29 {strides = array<i32>} : memref<32x128xbf16, #tpu.memory_space<vmem>>, vector<32x128xbf16>,
    } else {
    }
    return
  }
  func.func @transform_0(%arg0: i32, %arg1: i32, %arg2: i32) -> (i32, i32) {
    %c0_i32 = arith.constant 0 : i32
    return %arg0, %arg2 : i32, i32
  }
  func.func @transform_1(%arg0: i32, %arg1: i32, %arg2: i32) -> (i32, i32) {
    %c0_i32 = arith.constant 0 : i32
    return %arg2, %arg1 : i32, i32
  }
  func.func @transform_2(%arg0: i32, %arg1: i32, %arg2: i32) -> (i32, i32) {
    %c0_i32 = arith.constant 0 : i32
    %c0_i32_0 = arith.constant 0 : i32
    return %c0_i32, %arg1 : i32, i32
  }
  func.func @transform_3(%arg0: i32, %arg1: i32, %arg2: i32) -> (i32, i32) {
    %c0_i32 = arith.constant 0 : i32
    return %arg0, %arg1 : i32, i32
  }
}

module attributes {stable_mosaic.version = 11 : i64} {
  func.func @_linear_kernel(%arg0: i32, %arg1: i32, %arg2: i32, %arg3: memref<32x128xbf16, #tpu.memory_space<vmem>>, %arg4: memref<128x64xbf16, #tpu.memory_space<vmem>>, %arg5: memref<1x64xf32, #tpu.memory_space<vmem>>, %arg6: memref<32x64xbf16, #tpu.memory_space<vmem>>, %arg7: memref<32x64xf32, #tpu.memory_space<vmem>>) attributes {dimension_semantics = [#tpu.dimension_semantics<parallel>, #tpu.dimension_semantics<parallel>, #tpu.dimension_semantics<arbitrary>], iteration_bounds = array<i64: 1, 1, 1>, scalar_prefetch = 0 : i64, scratch_operands = 1 : i64, tpu.core_type = #tpu.core_type<tc>, window_params = [{transform_indices = @transform_0, window_bounds = array<i64: 32, 128>}, {transform_indices = @transform_1, window_bounds = array<i64: 128, 64>}, {transform_indices = @transform_2, window_bounds = array<i64: 1, 64>}, {transform_indices = @transform_3, window_bounds = array<i64: 32, 64>}]} {
    %c0_i32 = arith.constant 0 : i32
    %0 = arith.cmpi eq, %arg2, %c0_i32 : i32
    %1 = arith.extui %0 : i1 to i32
    %c0_i32_0 = arith.constant 0 : i32
    %2 = arith.cmpi ne, %1, %c0_i32_0 : i32
    scf.if %2 {
      %cst_10 = arith.constant 0.000000e+00 : f32
      %12 = vector.broadcast %cst_10 : f32 to vector<32x64xf32>
      %c0_11 = arith.constant 0 : index
      %c0_12 = arith.constant 0 : index
      %13 = vector.load %arg7[%c0_11, %c0_12] : memref<32x64xf32, #tpu.memory_space<vmem>>, vector<32x64xf32>
      tpu.vector_store %arg7[%c0_11, %c0_12], %12 {strides = array<i32>} : memref<32x64xf32, #tpu.memory_space<vmem>>, vector<32x64xf32>,
    } else {
    }
    %c0 = arith.constant 0 : index
    %c0_1 = arith.constant 0 : index
    %3 = vector.load %arg3[%c0, %c0_1] : memref<32x128xbf16, #tpu.memory_space<vmem>>, vector<32x128xbf16>
    %c0_2 = arith.constant 0 : index
    %c0_3 = arith.constant 0 : index
    %4 = vector.load %arg7[%c0_2, %c0_3] : memref<32x64xf32, #tpu.memory_space<vmem>>, vector<32x64xf32>
    %c0_4 = arith.constant 0 : index
    %c0_5 = arith.constant 0 : index
    %5 = vector.load %arg4[%c0_4, %c0_5] : memref<128x64xbf16, #tpu.memory_space<vmem>>, vector<128x64xbf16>
    %cst = arith.constant dense<0.000000e+00> : vector<32x64xf32>
    %6 = tpu.matmul %3, %5, %cst {dimension_numbers = #tpu.dot_dimension_numbers<[1], [0], [0], [1], [0, 0, 1, 1], [], []>} : vector<32x128xbf16>, vector<128x64xbf16>, vector<32x64xf32> -> vector<32x64xf32>
    %7 = arith.addf %4, %6 : vector<32x64xf32>
    %c0_6 = arith.constant 0 : index
    %c0_7 = arith.constant 0 : index
    %8 = vector.load %arg7[%c0_6, %c0_7] : memref<32x64xf32, #tpu.memory_space<vmem>>, vector<32x64xf32>
    tpu.vector_store %arg7[%c0_6, %c0_7], %7 {strides = array<i32>} : memref<32x64xf32, #tpu.memory_space<vmem>>, vector<32x64xf32>,
    %c0_i32_8 = arith.constant 0 : i32
    %9 = arith.cmpi eq, %arg2, %c0_i32_8 : i32
    %10 = arith.extui %9 : i1 to i32
    %c0_i32_9 = arith.constant 0 : i32
    %11 = arith.cmpi ne, %10, %c0_i32_9 : i32
    scf.if %11 {
      %c0_10 = arith.constant 0 : index
      %c0_11 = arith.constant 0 : index
      %12 = vector.load %arg7[%c0_10, %c0_11] : memref<32x64xf32, #tpu.memory_space<vmem>>, vector<32x64xf32>
      %c0_12 = arith.constant 0 : index
      %c0_13 = arith.constant 0 : index
      %13 = vector.load %arg5[%c0_12, %c0_13] : memref<1x64xf32, #tpu.memory_space<vmem>>, vector<1x64xf32>
      %14 = vector.broadcast %13 : vector<1x64xf32> to vector<32x64xf32>
      %15 = arith.addf %12, %14 : vector<32x64xf32>
      %16 = arith.truncf %15 : vector<32x64xf32> to vector<32x64xbf16>
      %c0_14 = arith.constant 0 : index
      %c0_15 = arith.constant 0 : index
      %17 = vector.load %arg6[%c0_14, %c0_15] : memref<32x64xbf16, #tpu.memory_space<vmem>>, vector<32x64xbf16>
      tpu.vector_store %arg6[%c0_14, %c0_15], %16 {strides = array<i32>} : memref<32x64xbf16, #tpu.memory_space<vmem>>, vector<32x64xbf16>,
    } else {
    }
    return
  }
  func.func @transform_0(%arg0: i32, %arg1: i32, %arg2: i32) -> (i32, i32) {
    %c0_i32 = arith.constant 0 : i32
    return %arg0, %arg2 : i32, i32
  }
  func.func @transform_1(%arg0: i32, %arg1: i32, %arg2: i32) -> (i32, i32) {
    %c0_i32 = arith.constant 0 : i32
    return %arg2, %arg1 : i32, i32
  }
  func.func @transform_2(%arg0: i32, %arg1: i32, %arg2: i32) -> (i32, i32) {
    %c0_i32 = arith.constant 0 : i32
    %c0_i32_0 = arith.constant 0 : i32
    return %c0_i32, %arg1 : i32, i32
  }
  func.func @transform_3(%arg0: i32, %arg1: i32, %arg2: i32) -> (i32, i32) {
    %c0_i32 = arith.constant 0 : i32
    return %arg0, %arg1 : i32, i32
  }
}

module attributes {stable_mosaic.version = 11 : i64} {
  func.func @_linear_kernel(%arg0: i32, %arg1: i32, %arg2: i32, %arg3: memref<16x64xbf16, #tpu.memory_space<vmem>>, %arg4: memref<64x64xbf16, #tpu.memory_space<vmem>>, %arg5: memref<1x64xf32, #tpu.memory_space<vmem>>, %arg6: memref<16x64xbf16, #tpu.memory_space<vmem>>, %arg7: memref<16x64xf32, #tpu.memory_space<vmem>>) attributes {dimension_semantics = [#tpu.dimension_semantics<parallel>, #tpu.dimension_semantics<parallel>, #tpu.dimension_semantics<arbitrary>], iteration_bounds = array<i64: 1, 1, 1>, scalar_prefetch = 0 : i64, scratch_operands = 1 : i64, tpu.core_type = #tpu.core_type<tc>, window_params = [{transform_indices = @transform_0, window_bounds = array<i64: 16, 64>}, {transform_indices = @transform_1, window_bounds = array<i64: 64, 64>}, {transform_indices = @transform_2, window_bounds = array<i64: 1, 64>}, {transform_indices = @transform_3, window_bounds = array<i64: 16, 64>}]} {
    %c0_i32 = arith.constant 0 : i32
    %0 = arith.cmpi eq, %arg2, %c0_i32 : i32
    %1 = arith.extui %0 : i1 to i32
    %c0_i32_0 = arith.constant 0 : i32
    %2 = arith.cmpi ne, %1, %c0_i32_0 : i32
    scf.if %2 {
      %cst_10 = arith.constant 0.000000e+00 : f32
      %12 = vector.broadcast %cst_10 : f32 to vector<16x64xf32>
      %c0_11 = arith.constant 0 : index
      %c0_12 = arith.constant 0 : index
      %13 = vector.load %arg7[%c0_11, %c0_12] : memref<16x64xf32, #tpu.memory_space<vmem>>, vector<16x64xf32>
      tpu.vector_store %arg7[%c0_11, %c0_12], %12 {strides = array<i32>} : memref<16x64xf32, #tpu.memory_space<vmem>>, vector<16x64xf32>,
    } else {
    }
    %c0 = arith.constant 0 : index
    %c0_1 = arith.constant 0 : index
    %3 = vector.load %arg3[%c0, %c0_1] : memref<16x64xbf16, #tpu.memory_space<vmem>>, vector<16x64xbf16>
    %c0_2 = arith.constant 0 : index
    %c0_3 = arith.constant 0 : index
    %4 = vector.load %arg7[%c0_2, %c0_3] : memref<16x64xf32, #tpu.memory_space<vmem>>, vector<16x64xf32>
    %c0_4 = arith.constant 0 : index
    %c0_5 = arith.constant 0 : index
    %5 = vector.load %arg4[%c0_4, %c0_5] : memref<64x64xbf16, #tpu.memory_space<vmem>>, vector<64x64xbf16>
    %cst = arith.constant dense<0.000000e+00> : vector<16x64xf32>
    %6 = tpu.matmul %3, %5, %cst {dimension_numbers = #tpu.dot_dimension_numbers<[1], [0], [0], [1], [0, 0, 1, 1], [], []>} : vector<16x64xbf16>, vector<64x64xbf16>, vector<16x64xf32> -> vector<16x64xf32>
    %7 = arith.addf %4, %6 : vector<16x64xf32>
    %c0_6 = arith.constant 0 : index
    %c0_7 = arith.constant 0 : index
    %8 = vector.load %arg7[%c0_6, %c0_7] : memref<16x64xf32, #tpu.memory_space<vmem>>, vector<16x64xf32>
    tpu.vector_store %arg7[%c0_6, %c0_7], %7 {strides = array<i32>} : memref<16x64xf32, #tpu.memory_space<vmem>>, vector<16x64xf32>,
    %c0_i32_8 = arith.constant 0 : i32
    %9 = arith.cmpi eq, %arg2, %c0_i32_8 : i32
    %10 = arith.extui %9 : i1 to i32
    %c0_i32_9 = arith.constant 0 : i32
    %11 = arith.cmpi ne, %10, %c0_i32_9 : i32
    scf.if %11 {
      %c0_10 = arith.constant 0 : index
      %c0_11 = arith.constant 0 : index
      %12 = vector.load %arg7[%c0_10, %c0_11] : memref<16x64xf32, #tpu.memory_space<vmem>>, vector<16x64xf32>
      %c0_12 = arith.constant 0 : index
      %c0_13 = arith.constant 0 : index
      %13 = vector.load %arg5[%c0_12, %c0_13] : memref<1x64xf32, #tpu.memory_space<vmem>>, vector<1x64xf32>
      %14 = vector.broadcast %13 : vector<1x64xf32> to vector<16x64xf32>
      %15 = arith.addf %12, %14 : vector<16x64xf32>
      %16 = arith.truncf %15 : vector<16x64xf32> to vector<16x64xbf16>
      %c0_14 = arith.constant 0 : index
      %c0_15 = arith.constant 0 : index
      %17 = vector.load %arg6[%c0_14, %c0_15] : memref<16x64xbf16, #tpu.memory_space<vmem>>, vector<16x64xbf16>
      tpu.vector_store %arg6[%c0_14, %c0_15], %16 {strides = array<i32>} : memref<16x64xbf16, #tpu.memory_space<vmem>>, vector<16x64xbf16>,
    } else {
    }
    return
  }
  func.func @transform_0(%arg0: i32, %arg1: i32, %arg2: i32) -> (i32, i32) {
    %c0_i32 = arith.constant 0 : i32
    return %arg0, %arg2 : i32, i32
  }
  func.func @transform_1(%arg0: i32, %arg1: i32, %arg2: i32) -> (i32, i32) {
    %c0_i32 = arith.constant 0 : i32
    return %arg2, %arg1 : i32, i32
  }
  func.func @transform_2(%arg0: i32, %arg1: i32, %arg2: i32) -> (i32, i32) {
    %c0_i32 = arith.constant 0 : i32
    %c0_i32_0 = arith.constant 0 : i32
    return %c0_i32, %arg1 : i32, i32
  }
  func.func @transform_3(%arg0: i32, %arg1: i32, %arg2: i32) -> (i32, i32) {
    %c0_i32 = arith.constant 0 : i32
    return %arg0, %arg1 : i32, i32
  }
}

module attributes {stable_mosaic.version = 11 : i64} {
  func.func @_linear_kernel(%arg0: i32, %arg1: i32, %arg2: i32, %arg3: memref<16x128xbf16, #tpu.memory_space<vmem>>, %arg4: memref<128x64xbf16, #tpu.memory_space<vmem>>, %arg5: memref<1x64xf32, #tpu.memory_space<vmem>>, %arg6: memref<16x64xbf16, #tpu.memory_space<vmem>>, %arg7: memref<16x64xf32, #tpu.memory_space<vmem>>) attributes {dimension_semantics = [#tpu.dimension_semantics<parallel>, #tpu.dimension_semantics<parallel>, #tpu.dimension_semantics<arbitrary>], iteration_bounds = array<i64: 1, 1, 1>, scalar_prefetch = 0 : i64, scratch_operands = 1 : i64, tpu.core_type = #tpu.core_type<tc>, window_params = [{transform_indices = @transform_0, window_bounds = array<i64: 16, 128>}, {transform_indices = @transform_1, window_bounds = array<i64: 128, 64>}, {transform_indices = @transform_2, window_bounds = array<i64: 1, 64>}, {transform_indices = @transform_3, window_bounds = array<i64: 16, 64>}]} {
    %c0_i32 = arith.constant 0 : i32
    %0 = arith.cmpi eq, %arg2, %c0_i32 : i32
    %1 = arith.extui %0 : i1 to i32
    %c0_i32_0 = arith.constant 0 : i32
    %2 = arith.cmpi ne, %1, %c0_i32_0 : i32
    scf.if %2 {
      %cst_10 = arith.constant 0.000000e+00 : f32
      %12 = vector.broadcast %cst_10 : f32 to vector<16x64xf32>
      %c0_11 = arith.constant 0 : index
      %c0_12 = arith.constant 0 : index
      %13 = vector.load %arg7[%c0_11, %c0_12] : memref<16x64xf32, #tpu.memory_space<vmem>>, vector<16x64xf32>
      tpu.vector_store %arg7[%c0_11, %c0_12], %12 {strides = array<i32>} : memref<16x64xf32, #tpu.memory_space<vmem>>, vector<16x64xf32>,
    } else {
    }
    %c0 = arith.constant 0 : index
    %c0_1 = arith.constant 0 : index
    %3 = vector.load %arg3[%c0, %c0_1] : memref<16x128xbf16, #tpu.memory_space<vmem>>, vector<16x128xbf16>
    %c0_2 = arith.constant 0 : index
    %c0_3 = arith.constant 0 : index
    %4 = vector.load %arg7[%c0_2, %c0_3] : memref<16x64xf32, #tpu.memory_space<vmem>>, vector<16x64xf32>
    %c0_4 = arith.constant 0 : index
    %c0_5 = arith.constant 0 : index
    %5 = vector.load %arg4[%c0_4, %c0_5] : memref<128x64xbf16, #tpu.memory_space<vmem>>, vector<128x64xbf16>
    %cst = arith.constant dense<0.000000e+00> : vector<16x64xf32>
    %6 = tpu.matmul %3, %5, %cst {dimension_numbers = #tpu.dot_dimension_numbers<[1], [0], [0], [1], [0, 0, 1, 1], [], []>} : vector<16x128xbf16>, vector<128x64xbf16>, vector<16x64xf32> -> vector<16x64xf32>
    %7 = arith.addf %4, %6 : vector<16x64xf32>
    %c0_6 = arith.constant 0 : index
    %c0_7 = arith.constant 0 : index
    %8 = vector.load %arg7[%c0_6, %c0_7] : memref<16x64xf32, #tpu.memory_space<vmem>>, vector<16x64xf32>
    tpu.vector_store %arg7[%c0_6, %c0_7], %7 {strides = array<i32>} : memref<16x64xf32, #tpu.memory_space<vmem>>, vector<16x64xf32>,
    %c0_i32_8 = arith.constant 0 : i32
    %9 = arith.cmpi eq, %arg2, %c0_i32_8 : i32
    %10 = arith.extui %9 : i1 to i32
    %c0_i32_9 = arith.constant 0 : i32
    %11 = arith.cmpi ne, %10, %c0_i32_9 : i32
    scf.if %11 {
      %c0_10 = arith.constant 0 : index
      %c0_11 = arith.constant 0 : index
      %12 = vector.load %arg7[%c0_10, %c0_11] : memref<16x64xf32, #tpu.memory_space<vmem>>, vector<16x64xf32>
      %c0_12 = arith.constant 0 : index
      %c0_13 = arith.constant 0 : index
      %13 = vector.load %arg5[%c0_12, %c0_13] : memref<1x64xf32, #tpu.memory_space<vmem>>, vector<1x64xf32>
      %14 = vector.broadcast %13 : vector<1x64xf32> to vector<16x64xf32>
      %15 = arith.addf %12, %14 : vector<16x64xf32>
      %16 = arith.truncf %15 : vector<16x64xf32> to vector<16x64xbf16>
      %c0_14 = arith.constant 0 : index
      %c0_15 = arith.constant 0 : index
      %17 = vector.load %arg6[%c0_14, %c0_15] : memref<16x64xbf16, #tpu.memory_space<vmem>>, vector<16x64xbf16>
      tpu.vector_store %arg6[%c0_14, %c0_15], %16 {strides = array<i32>} : memref<16x64xbf16, #tpu.memory_space<vmem>>, vector<16x64xbf16>,
    } else {
    }
    return
  }
  func.func @transform_0(%arg0: i32, %arg1: i32, %arg2: i32) -> (i32, i32) {
    %c0_i32 = arith.constant 0 : i32
    return %arg0, %arg2 : i32, i32
  }
  func.func @transform_1(%arg0: i32, %arg1: i32, %arg2: i32) -> (i32, i32) {
    %c0_i32 = arith.constant 0 : i32
    return %arg2, %arg1 : i32, i32
  }
  func.func @transform_2(%arg0: i32, %arg1: i32, %arg2: i32) -> (i32, i32) {
    %c0_i32 = arith.constant 0 : i32
    %c0_i32_0 = arith.constant 0 : i32
    return %c0_i32, %arg1 : i32, i32
  }
  func.func @transform_3(%arg0: i32, %arg1: i32, %arg2: i32) -> (i32, i32) {
    %c0_i32 = arith.constant 0 : i32
    return %arg0, %arg1 : i32, i32
  }
}

module attributes {stable_mosaic.version = 11 : i64} {
  func.func @_linear_kernel(%arg0: i32, %arg1: i32, %arg2: i32, %arg3: memref<16x64xbf16, #tpu.memory_space<vmem>>, %arg4: memref<64x128xbf16, #tpu.memory_space<vmem>>, %arg5: memref<1x128xf32, #tpu.memory_space<vmem>>, %arg6: memref<16x128xbf16, #tpu.memory_space<vmem>>, %arg7: memref<16x128xf32, #tpu.memory_space<vmem>>) attributes {dimension_semantics = [#tpu.dimension_semantics<parallel>, #tpu.dimension_semantics<parallel>, #tpu.dimension_semantics<arbitrary>], iteration_bounds = array<i64: 1, 1, 1>, scalar_prefetch = 0 : i64, scratch_operands = 1 : i64, tpu.core_type = #tpu.core_type<tc>, window_params = [{transform_indices = @transform_0, window_bounds = array<i64: 16, 64>}, {transform_indices = @transform_1, window_bounds = array<i64: 64, 128>}, {transform_indices = @transform_2, window_bounds = array<i64: 1, 128>}, {transform_indices = @transform_3, window_bounds = array<i64: 16, 128>}]} {
    %c0_i32 = arith.constant 0 : i32
    %0 = arith.cmpi eq, %arg2, %c0_i32 : i32
    %1 = arith.extui %0 : i1 to i32
    %c0_i32_0 = arith.constant 0 : i32
    %2 = arith.cmpi ne, %1, %c0_i32_0 : i32
    scf.if %2 {
      %cst_10 = arith.constant 0.000000e+00 : f32
      %12 = vector.broadcast %cst_10 : f32 to vector<16x128xf32>
      %c0_11 = arith.constant 0 : index
      %c0_12 = arith.constant 0 : index
      %13 = vector.load %arg7[%c0_11, %c0_12] : memref<16x128xf32, #tpu.memory_space<vmem>>, vector<16x128xf32>
      tpu.vector_store %arg7[%c0_11, %c0_12], %12 {strides = array<i32>} : memref<16x128xf32, #tpu.memory_space<vmem>>, vector<16x128xf32>,
    } else {
    }
    %c0 = arith.constant 0 : index
    %c0_1 = arith.constant 0 : index
    %3 = vector.load %arg3[%c0, %c0_1] : memref<16x64xbf16, #tpu.memory_space<vmem>>, vector<16x64xbf16>
    %c0_2 = arith.constant 0 : index
    %c0_3 = arith.constant 0 : index
    %4 = vector.load %arg7[%c0_2, %c0_3] : memref<16x128xf32, #tpu.memory_space<vmem>>, vector<16x128xf32>
    %c0_4 = arith.constant 0 : index
    %c0_5 = arith.constant 0 : index
    %5 = vector.load %arg4[%c0_4, %c0_5] : memref<64x128xbf16, #tpu.memory_space<vmem>>, vector<64x128xbf16>
    %cst = arith.constant dense<0.000000e+00> : vector<16x128xf32>
    %6 = tpu.matmul %3, %5, %cst {dimension_numbers = #tpu.dot_dimension_numbers<[1], [0], [0], [1], [0, 0, 1, 1], [], []>} : vector<16x64xbf16>, vector<64x128xbf16>, vector<16x128xf32> -> vector<16x128xf32>
    %7 = arith.addf %4, %6 : vector<16x128xf32>
    %c0_6 = arith.constant 0 : index
    %c0_7 = arith.constant 0 : index
    %8 = vector.load %arg7[%c0_6, %c0_7] : memref<16x128xf32, #tpu.memory_space<vmem>>, vector<16x128xf32>
    tpu.vector_store %arg7[%c0_6, %c0_7], %7 {strides = array<i32>} : memref<16x128xf32, #tpu.memory_space<vmem>>, vector<16x128xf32>,
    %c0_i32_8 = arith.constant 0 : i32
    %9 = arith.cmpi eq, %arg2, %c0_i32_8 : i32
    %10 = arith.extui %9 : i1 to i32
    %c0_i32_9 = arith.constant 0 : i32
    %11 = arith.cmpi ne, %10, %c0_i32_9 : i32
    scf.if %11 {
      %c0_10 = arith.constant 0 : index
      %c0_11 = arith.constant 0 : index
      %12 = vector.load %arg7[%c0_10, %c0_11] : memref<16x128xf32, #tpu.memory_space<vmem>>, vector<16x128xf32>
      %c0_12 = arith.constant 0 : index
      %c0_13 = arith.constant 0 : index
      %13 = vector.load %arg5[%c0_12, %c0_13] : memref<1x128xf32, #tpu.memory_space<vmem>>, vector<1x128xf32>
      %14 = vector.broadcast %13 : vector<1x128xf32> to vector<16x128xf32>
      %15 = arith.addf %12, %14 : vector<16x128xf32>
      %16 = arith.mulf %15, %15 : vector<16x128xf32>
      %17 = arith.mulf %15, %16 : vector<16x128xf32>
      %cst_14 = arith.constant 4.471500e-02 : f32
      %18 = vector.broadcast %cst_14 : f32 to vector<16x128xf32>
      %19 = arith.mulf %18, %17 : vector<16x128xf32>
      %20 = arith.addf %15, %19 : vector<16x128xf32>
      %cst_15 = arith.constant 0.797884583 : f32
      %21 = vector.broadcast %cst_15 : f32 to vector<16x128xf32>
      %22 = arith.mulf %21, %20 : vector<16x128xf32>
      %23 = math.tanh %22 : vector<16x128xf32>
      %cst_16 = arith.constant 1.000000e+00 : f32
      %24 = vector.broadcast %cst_16 : f32 to vector<16x128xf32>
      %25 = arith.addf %24, %23 : vector<16x128xf32>
      %cst_17 = arith.constant 5.000000e-01 : f32
      %26 = vector.broadcast %cst_17 : f32 to vector<16x128xf32>
      %27 = arith.mulf %26, %25 : vector<16x128xf32>
      %28 = arith.mulf %15, %27 : vector<16x128xf32>
      %29 = arith.truncf %28 : vector<16x128xf32> to vector<16x128xbf16>
      %c0_18 = arith.constant 0 : index
      %c0_19 = arith.constant 0 : index
      %30 = vector.load %arg6[%c0_18, %c0_19] : memref<16x128xbf16, #tpu.memory_space<vmem>>, vector<16x128xbf16>
      tpu.vector_store %arg6[%c0_18, %c0_19], %29 {strides = array<i32>} : memref<16x128xbf16, #tpu.memory_space<vmem>>, vector<16x128xbf16>,
    } else {
    }
    return
  }
  func.func @transform_0(%arg0: i32, %arg1: i32, %arg2: i32) -> (i32, i32) {
    %c0_i32 = arith.constant 0 : i32
    return %arg0, %arg2 : i32, i32
  }
  func.func @transform_1(%arg0: i32, %arg1: i32, %arg2: i32) -> (i32, i32) {
    %c0_i32 = arith.constant 0 : i32
    return %arg2, %arg1 : i32, i32
  }
  func.func @transform_2(%arg0: i32, %arg1: i32, %arg2: i32) -> (i32, i32) {
    %c0_i32 = arith.constant 0 : i32
    %c0_i32_0 = arith.constant 0 : i32
    return %c0_i32, %arg1 : i32, i32
  }
  func.func @transform_3(%arg0: i32, %arg1: i32, %arg2: i32) -> (i32, i32) {
    %c0_i32 = arith.constant 0 : i32
    return %arg0, %arg1 : i32, i32
  }
}

module attributes {stable_mosaic.version = 11 : i64} {
  func.func @_linear_kernel(%arg0: i32, %arg1: i32, %arg2: i32, %arg3: memref<16x128xbf16, #tpu.memory_space<vmem>>, %arg4: memref<128x64xbf16, #tpu.memory_space<vmem>>, %arg5: memref<1x64xf32, #tpu.memory_space<vmem>>, %arg6: memref<16x64xbf16, #tpu.memory_space<vmem>>, %arg7: memref<16x64xf32, #tpu.memory_space<vmem>>) attributes {dimension_semantics = [#tpu.dimension_semantics<parallel>, #tpu.dimension_semantics<parallel>, #tpu.dimension_semantics<arbitrary>], iteration_bounds = array<i64: 1, 1, 1>, scalar_prefetch = 0 : i64, scratch_operands = 1 : i64, tpu.core_type = #tpu.core_type<tc>, window_params = [{transform_indices = @transform_0, window_bounds = array<i64: 16, 128>}, {transform_indices = @transform_1, window_bounds = array<i64: 128, 64>}, {transform_indices = @transform_2, window_bounds = array<i64: 1, 64>}, {transform_indices = @transform_3, window_bounds = array<i64: 16, 64>}]} {
    %c0_i32 = arith.constant 0 : i32
    %0 = arith.cmpi eq, %arg2, %c0_i32 : i32
    %1 = arith.extui %0 : i1 to i32
    %c0_i32_0 = arith.constant 0 : i32
    %2 = arith.cmpi ne, %1, %c0_i32_0 : i32
    scf.if %2 {
      %cst_10 = arith.constant 0.000000e+00 : f32
      %12 = vector.broadcast %cst_10 : f32 to vector<16x64xf32>
      %c0_11 = arith.constant 0 : index
      %c0_12 = arith.constant 0 : index
      %13 = vector.load %arg7[%c0_11, %c0_12] : memref<16x64xf32, #tpu.memory_space<vmem>>, vector<16x64xf32>
      tpu.vector_store %arg7[%c0_11, %c0_12], %12 {strides = array<i32>} : memref<16x64xf32, #tpu.memory_space<vmem>>, vector<16x64xf32>,
    } else {
    }
    %c0 = arith.constant 0 : index
    %c0_1 = arith.constant 0 : index
    %3 = vector.load %arg3[%c0, %c0_1] : memref<16x128xbf16, #tpu.memory_space<vmem>>, vector<16x128xbf16>
    %c0_2 = arith.constant 0 : index
    %c0_3 = arith.constant 0 : index
    %4 = vector.load %arg7[%c0_2, %c0_3] : memref<16x64xf32, #tpu.memory_space<vmem>>, vector<16x64xf32>
    %c0_4 = arith.constant 0 : index
    %c0_5 = arith.constant 0 : index
    %5 = vector.load %arg4[%c0_4, %c0_5] : memref<128x64xbf16, #tpu.memory_space<vmem>>, vector<128x64xbf16>
    %cst = arith.constant dense<0.000000e+00> : vector<16x64xf32>
    %6 = tpu.matmul %3, %5, %cst {dimension_numbers = #tpu.dot_dimension_numbers<[1], [0], [0], [1], [0, 0, 1, 1], [], []>} : vector<16x128xbf16>, vector<128x64xbf16>, vector<16x64xf32> -> vector<16x64xf32>
    %7 = arith.addf %4, %6 : vector<16x64xf32>
    %c0_6 = arith.constant 0 : index
    %c0_7 = arith.constant 0 : index
    %8 = vector.load %arg7[%c0_6, %c0_7] : memref<16x64xf32, #tpu.memory_space<vmem>>, vector<16x64xf32>
    tpu.vector_store %arg7[%c0_6, %c0_7], %7 {strides = array<i32>} : memref<16x64xf32, #tpu.memory_space<vmem>>, vector<16x64xf32>,
    %c0_i32_8 = arith.constant 0 : i32
    %9 = arith.cmpi eq, %arg2, %c0_i32_8 : i32
    %10 = arith.extui %9 : i1 to i32
    %c0_i32_9 = arith.constant 0 : i32
    %11 = arith.cmpi ne, %10, %c0_i32_9 : i32
    scf.if %11 {
      %c0_10 = arith.constant 0 : index
      %c0_11 = arith.constant 0 : index
      %12 = vector.load %arg7[%c0_10, %c0_11] : memref<16x64xf32, #tpu.memory_space<vmem>>, vector<16x64xf32>
      %c0_12 = arith.constant 0 : index
      %c0_13 = arith.constant 0 : index
      %13 = vector.load %arg5[%c0_12, %c0_13] : memref<1x64xf32, #tpu.memory_space<vmem>>, vector<1x64xf32>
      %14 = vector.broadcast %13 : vector<1x64xf32> to vector<16x64xf32>
      %15 = arith.addf %12, %14 : vector<16x64xf32>
      %16 = arith.truncf %15 : vector<16x64xf32> to vector<16x64xbf16>
      %c0_14 = arith.constant 0 : index
      %c0_15 = arith.constant 0 : index
      %17 = vector.load %arg6[%c0_14, %c0_15] : memref<16x64xbf16, #tpu.memory_space<vmem>>, vector<16x64xbf16>
      tpu.vector_store %arg6[%c0_14, %c0_15], %16 {strides = array<i32>} : memref<16x64xbf16, #tpu.memory_space<vmem>>, vector<16x64xbf16>,
    } else {
    }
    return
  }
  func.func @transform_0(%arg0: i32, %arg1: i32, %arg2: i32) -> (i32, i32) {
    %c0_i32 = arith.constant 0 : i32
    return %arg0, %arg2 : i32, i32
  }
  func.func @transform_1(%arg0: i32, %arg1: i32, %arg2: i32) -> (i32, i32) {
    %c0_i32 = arith.constant 0 : i32
    return %arg2, %arg1 : i32, i32
  }
  func.func @transform_2(%arg0: i32, %arg1: i32, %arg2: i32) -> (i32, i32) {
    %c0_i32 = arith.constant 0 : i32
    %c0_i32_0 = arith.constant 0 : i32
    return %c0_i32, %arg1 : i32, i32
  }
  func.func @transform_3(%arg0: i32, %arg1: i32, %arg2: i32) -> (i32, i32) {
    %c0_i32 = arith.constant 0 : i32
    return %arg0, %arg1 : i32, i32
  }
}

module attributes {stable_mosaic.version = 11 : i64} {
  func.func @_linear_kernel(%arg0: i32, %arg1: i32, %arg2: i32, %arg3: memref<2x64xf32, #tpu.memory_space<vmem>>, %arg4: memref<64x192xbf16, #tpu.memory_space<vmem>>, %arg5: memref<1x192xf32, #tpu.memory_space<vmem>>, %arg6: memref<2x192xf32, #tpu.memory_space<vmem>>, %arg7: memref<2x192xf32, #tpu.memory_space<vmem>>) attributes {dimension_semantics = [#tpu.dimension_semantics<parallel>, #tpu.dimension_semantics<parallel>, #tpu.dimension_semantics<arbitrary>], iteration_bounds = array<i64: 1, 1, 1>, scalar_prefetch = 0 : i64, scratch_operands = 1 : i64, tpu.core_type = #tpu.core_type<tc>, window_params = [{transform_indices = @transform_0, window_bounds = array<i64: 2, 64>}, {transform_indices = @transform_1, window_bounds = array<i64: 64, 192>}, {transform_indices = @transform_2, window_bounds = array<i64: 1, 192>}, {transform_indices = @transform_3, window_bounds = array<i64: 2, 192>}]} {
    %c0_i32 = arith.constant 0 : i32
    %0 = arith.cmpi eq, %arg2, %c0_i32 : i32
    %1 = arith.extui %0 : i1 to i32
    %c0_i32_0 = arith.constant 0 : i32
    %2 = arith.cmpi ne, %1, %c0_i32_0 : i32
    scf.if %2 {
      %cst_11 = arith.constant 0.000000e+00 : f32
      %19 = vector.broadcast %cst_11 : f32 to vector<2x192xf32>
      %c0_12 = arith.constant 0 : index
      %c0_13 = arith.constant 0 : index
      %20 = vector.load %arg7[%c0_12, %c0_13] : memref<2x192xf32, #tpu.memory_space<vmem>>, vector<2x192xf32>
      tpu.vector_store %arg7[%c0_12, %c0_13], %19 {strides = array<i32>} : memref<2x192xf32, #tpu.memory_space<vmem>>, vector<2x192xf32>,
    } else {
    }
    %c0 = arith.constant 0 : index
    %c0_1 = arith.constant 0 : index
    %3 = vector.load %arg3[%c0, %c0_1] : memref<2x64xf32, #tpu.memory_space<vmem>>, vector<2x64xf32>
    %4 = arith.negf %3 : vector<2x64xf32>
    %5 = math.exp %4 : vector<2x64xf32>
    %cst = arith.constant 1.000000e+00 : f32
    %6 = vector.broadcast %cst : f32 to vector<2x64xf32>
    %7 = arith.addf %6, %5 : vector<2x64xf32>
    %8 = arith.divf %6, %7 : vector<2x64xf32>
    %9 = arith.mulf %3, %8 : vector<2x64xf32>
    %c0_2 = arith.constant 0 : index
    %c0_3 = arith.constant 0 : index
    %10 = vector.load %arg7[%c0_2, %c0_3] : memref<2x192xf32, #tpu.memory_space<vmem>>, vector<2x192xf32>
    %11 = arith.truncf %9 : vector<2x64xf32> to vector<2x64xbf16>
    %c0_4 = arith.constant 0 : index
    %c0_5 = arith.constant 0 : index
    %12 = vector.load %arg4[%c0_4, %c0_5] : memref<64x192xbf16, #tpu.memory_space<vmem>>, vector<64x192xbf16>
    %cst_6 = arith.constant dense<0.000000e+00> : vector<2x192xf32>
    %13 = tpu.matmul %11, %12, %cst_6 {dimension_numbers = #tpu.dot_dimension_numbers<[1], [0], [0], [1], [0, 0, 1, 1], [], []>} : vector<2x64xbf16>, vector<64x192xbf16>, vector<2x192xf32> -> vector<2x192xf32>
    %14 = arith.addf %10, %13 : vector<2x192xf32>
    %c0_7 = arith.constant 0 : index
    %c0_8 = arith.constant 0 : index
    %15 = vector.load %arg7[%c0_7, %c0_8] : memref<2x192xf32, #tpu.memory_space<vmem>>, vector<2x192xf32>
    tpu.vector_store %arg7[%c0_7, %c0_8], %14 {strides = array<i32>} : memref<2x192xf32, #tpu.memory_space<vmem>>, vector<2x192xf32>,
    %c0_i32_9 = arith.constant 0 : i32
    %16 = arith.cmpi eq, %arg2, %c0_i32_9 : i32
    %17 = arith.extui %16 : i1 to i32
    %c0_i32_10 = arith.constant 0 : i32
    %18 = arith.cmpi ne, %17, %c0_i32_10 : i32
    scf.if %18 {
      %c0_11 = arith.constant 0 : index
      %c0_12 = arith.constant 0 : index
      %19 = vector.load %arg7[%c0_11, %c0_12] : memref<2x192xf32, #tpu.memory_space<vmem>>, vector<2x192xf32>
      %c0_13 = arith.constant 0 : index
      %c0_14 = arith.constant 0 : index
      %20 = vector.load %arg5[%c0_13, %c0_14] : memref<1x192xf32, #tpu.memory_space<vmem>>, vector<1x192xf32>
      %21 = vector.broadcast %20 : vector<1x192xf32> to vector<2x192xf32>
      %22 = arith.addf %19, %21 : vector<2x192xf32>
      %c0_15 = arith.constant 0 : index
      %c0_16 = arith.constant 0 : index
      %23 = vector.load %arg6[%c0_15, %c0_16] : memref<2x192xf32, #tpu.memory_space<vmem>>, vector<2x192xf32>
      tpu.vector_store %arg6[%c0_15, %c0_16], %22 {strides = array<i32>} : memref<2x192xf32, #tpu.memory_space<vmem>>, vector<2x192xf32>,
    } else {
    }
    return
  }
  func.func @transform_0(%arg0: i32, %arg1: i32, %arg2: i32) -> (i32, i32) {
    %c0_i32 = arith.constant 0 : i32
    return %arg0, %arg2 : i32, i32
  }
  func.func @transform_1(%arg0: i32, %arg1: i32, %arg2: i32) -> (i32, i32) {
    %c0_i32 = arith.constant 0 : i32
    return %arg2, %arg1 : i32, i32
  }
  func.func @transform_2(%arg0: i32, %arg1: i32, %arg2: i32) -> (i32, i32) {
    %c0_i32 = arith.constant 0 : i32
    %c0_i32_0 = arith.constant 0 : i32
    return %c0_i32, %arg1 : i32, i32
  }
  func.func @transform_3(%arg0: i32, %arg1: i32, %arg2: i32) -> (i32, i32) {
    %c0_i32 = arith.constant 0 : i32
    return %arg0, %arg1 : i32, i32
  }
}

module attributes {stable_mosaic.version = 11 : i64} {
  func.func @_ln_mod_kernel(%arg0: i32, %arg1: i32, %arg2: memref<1x24x64xbf16, #tpu.memory_space<vmem>>, %arg3: memref<1x1x64xf32, #tpu.memory_space<vmem>>, %arg4: memref<1x1x64xf32, #tpu.memory_space<vmem>>, %arg5: memref<1x24x64xbf16, #tpu.memory_space<vmem>>) attributes {dimension_semantics = [#tpu.dimension_semantics<parallel>, #tpu.dimension_semantics<parallel>], iteration_bounds = array<i64: 2, 1>, scalar_prefetch = 0 : i64, scratch_operands = 0 : i64, tpu.core_type = #tpu.core_type<tc>, window_params = [{transform_indices = @transform_0, window_bounds = array<i64: 1, 24, 64>}, {transform_indices = @transform_1, window_bounds = array<i64: 1, 1, 64>}, {transform_indices = @transform_2, window_bounds = array<i64: 1, 1, 64>}, {transform_indices = @transform_3, window_bounds = array<i64: 1, 24, 64>}]} {
    %c0 = arith.constant 0 : index
    %c0_0 = arith.constant 0 : index
    %c0_1 = arith.constant 0 : index
    %0 = vector.load %arg2[%c0, %c0_0, %c0_1] : memref<1x24x64xbf16, #tpu.memory_space<vmem>>, vector<1x24x64xbf16>
    %1 = vector.shape_cast %0 : vector<1x24x64xbf16> to vector<24x64xbf16>
    %2 = arith.extf %1 : vector<24x64xbf16> to vector<24x64xf32>
    %cst = arith.constant dense<0.000000e+00> : vector<24xf32>
    %3 = vector.multi_reduction <add>, %2, %cst [1] : vector<24x64xf32> to vector<24xf32>
    %4 = vector.shape_cast %3 : vector<24xf32> to vector<24x1xf32>
    %cst_2 = arith.constant 6.400000e+01 : f32
    %5 = vector.broadcast %cst_2 : f32 to vector<24x1xf32>
    %6 = arith.divf %4, %5 : vector<24x1xf32>
    %7 = vector.broadcast %6 : vector<24x1xf32> to vector<24x64xf32>
    %8 = arith.subf %2, %7 : vector<24x64xf32>
    %9 = arith.mulf %8, %8 : vector<24x64xf32>
    %cst_3 = arith.constant dense<0.000000e+00> : vector<24xf32>
    %10 = vector.multi_reduction <add>, %9, %cst_3 [1] : vector<24x64xf32> to vector<24xf32>
    %11 = vector.shape_cast %10 : vector<24xf32> to vector<24x1xf32>
    %cst_4 = arith.constant 6.400000e+01 : f32
    %12 = vector.broadcast %cst_4 : f32 to vector<24x1xf32>
    %13 = arith.divf %11, %12 : vector<24x1xf32>
    %14 = vector.broadcast %6 : vector<24x1xf32> to vector<24x64xf32>
    %15 = arith.subf %2, %14 : vector<24x64xf32>
    %cst_5 = arith.constant 9.99999997E-7 : f32
    %16 = vector.broadcast %cst_5 : f32 to vector<24x1xf32>
    %17 = arith.addf %13, %16 : vector<24x1xf32>
    %18 = math.rsqrt %17 : vector<24x1xf32>
    %19 = vector.broadcast %18 : vector<24x1xf32> to vector<24x64xf32>
    %20 = arith.mulf %15, %19 : vector<24x64xf32>
    %c0_6 = arith.constant 0 : index
    %c0_7 = arith.constant 0 : index
    %c0_8 = arith.constant 0 : index
    %21 = vector.load %arg3[%c0_6, %c0_7, %c0_8] : memref<1x1x64xf32, #tpu.memory_space<vmem>>, vector<1x1x64xf32>
    %22 = vector.shape_cast %21 : vector<1x1x64xf32> to vector<1x64xf32>
    %cst_9 = arith.constant 1.000000e+00 : f32
    %23 = vector.broadcast %cst_9 : f32 to vector<1x64xf32>
    %24 = arith.addf %23, %22 : vector<1x64xf32>
    %25 = vector.broadcast %24 : vector<1x64xf32> to vector<24x64xf32>
    %26 = arith.mulf %25, %20 : vector<24x64xf32>
    %c0_10 = arith.constant 0 : index
    %c0_11 = arith.constant 0 : index
    %c0_12 = arith.constant 0 : index
    %27 = vector.load %arg4[%c0_10, %c0_11, %c0_12] : memref<1x1x64xf32, #tpu.memory_space<vmem>>, vector<1x1x64xf32>
    %28 = vector.shape_cast %27 : vector<1x1x64xf32> to vector<1x64xf32>
    %29 = vector.broadcast %28 : vector<1x64xf32> to vector<24x64xf32>
    %30 = arith.addf %26, %29 : vector<24x64xf32>
    %31 = arith.truncf %30 : vector<24x64xf32> to vector<24x64xbf16>
    %c0_13 = arith.constant 0 : index
    %c0_14 = arith.constant 0 : index
    %c0_15 = arith.constant 0 : index
    %32 = vector.load %arg5[%c0_13, %c0_14, %c0_15] : memref<1x24x64xbf16, #tpu.memory_space<vmem>>, vector<1x24x64xbf16>
    %33 = vector.shape_cast %32 : vector<1x24x64xbf16> to vector<24x64xbf16>
    %34 = vector.shape_cast %31 : vector<24x64xbf16> to vector<1x24x64xbf16>
    tpu.vector_store %arg5[%c0_13, %c0_14, %c0_15], %34 {strides = array<i32>} : memref<1x24x64xbf16, #tpu.memory_space<vmem>>, vector<1x24x64xbf16>,
    return
  }
  func.func @transform_0(%arg0: i32, %arg1: i32) -> (i32, i32, i32) {
    %c0_i32 = arith.constant 0 : i32
    %c0_i32_0 = arith.constant 0 : i32
    return %arg0, %arg1, %c0_i32 : i32, i32, i32
  }
  func.func @transform_1(%arg0: i32, %arg1: i32) -> (i32, i32, i32) {
    %c0_i32 = arith.constant 0 : i32
    %c0_i32_0 = arith.constant 0 : i32
    %c0_i32_1 = arith.constant 0 : i32
    return %arg0, %c0_i32, %c0_i32_0 : i32, i32, i32
  }
  func.func @transform_2(%arg0: i32, %arg1: i32) -> (i32, i32, i32) {
    %c0_i32 = arith.constant 0 : i32
    %c0_i32_0 = arith.constant 0 : i32
    %c0_i32_1 = arith.constant 0 : i32
    return %arg0, %c0_i32, %c0_i32_0 : i32, i32, i32
  }
  func.func @transform_3(%arg0: i32, %arg1: i32) -> (i32, i32, i32) {
    %c0_i32 = arith.constant 0 : i32
    %c0_i32_0 = arith.constant 0 : i32
    return %arg0, %arg1, %c0_i32 : i32, i32, i32
  }
}

module attributes {stable_mosaic.version = 11 : i64} {
  func.func @_linear_kernel(%arg0: i32, %arg1: i32, %arg2: i32, %arg3: memref<48x64xbf16, #tpu.memory_space<vmem>>, %arg4: memref<64x192xbf16, #tpu.memory_space<vmem>>, %arg5: memref<1x192xf32, #tpu.memory_space<vmem>>, %arg6: memref<48x192xbf16, #tpu.memory_space<vmem>>, %arg7: memref<48x192xf32, #tpu.memory_space<vmem>>) attributes {dimension_semantics = [#tpu.dimension_semantics<parallel>, #tpu.dimension_semantics<parallel>, #tpu.dimension_semantics<arbitrary>], iteration_bounds = array<i64: 1, 1, 1>, scalar_prefetch = 0 : i64, scratch_operands = 1 : i64, tpu.core_type = #tpu.core_type<tc>, window_params = [{transform_indices = @transform_0, window_bounds = array<i64: 48, 64>}, {transform_indices = @transform_1, window_bounds = array<i64: 64, 192>}, {transform_indices = @transform_2, window_bounds = array<i64: 1, 192>}, {transform_indices = @transform_3, window_bounds = array<i64: 48, 192>}]} {
    %c0_i32 = arith.constant 0 : i32
    %0 = arith.cmpi eq, %arg2, %c0_i32 : i32
    %1 = arith.extui %0 : i1 to i32
    %c0_i32_0 = arith.constant 0 : i32
    %2 = arith.cmpi ne, %1, %c0_i32_0 : i32
    scf.if %2 {
      %cst_10 = arith.constant 0.000000e+00 : f32
      %12 = vector.broadcast %cst_10 : f32 to vector<48x192xf32>
      %c0_11 = arith.constant 0 : index
      %c0_12 = arith.constant 0 : index
      %13 = vector.load %arg7[%c0_11, %c0_12] : memref<48x192xf32, #tpu.memory_space<vmem>>, vector<48x192xf32>
      tpu.vector_store %arg7[%c0_11, %c0_12], %12 {strides = array<i32>} : memref<48x192xf32, #tpu.memory_space<vmem>>, vector<48x192xf32>,
    } else {
    }
    %c0 = arith.constant 0 : index
    %c0_1 = arith.constant 0 : index
    %3 = vector.load %arg3[%c0, %c0_1] : memref<48x64xbf16, #tpu.memory_space<vmem>>, vector<48x64xbf16>
    %c0_2 = arith.constant 0 : index
    %c0_3 = arith.constant 0 : index
    %4 = vector.load %arg7[%c0_2, %c0_3] : memref<48x192xf32, #tpu.memory_space<vmem>>, vector<48x192xf32>
    %c0_4 = arith.constant 0 : index
    %c0_5 = arith.constant 0 : index
    %5 = vector.load %arg4[%c0_4, %c0_5] : memref<64x192xbf16, #tpu.memory_space<vmem>>, vector<64x192xbf16>
    %cst = arith.constant dense<0.000000e+00> : vector<48x192xf32>
    %6 = tpu.matmul %3, %5, %cst {dimension_numbers = #tpu.dot_dimension_numbers<[1], [0], [0], [1], [0, 0, 1, 1], [], []>} : vector<48x64xbf16>, vector<64x192xbf16>, vector<48x192xf32> -> vector<48x192xf32>
    %7 = arith.addf %4, %6 : vector<48x192xf32>
    %c0_6 = arith.constant 0 : index
    %c0_7 = arith.constant 0 : index
    %8 = vector.load %arg7[%c0_6, %c0_7] : memref<48x192xf32, #tpu.memory_space<vmem>>, vector<48x192xf32>
    tpu.vector_store %arg7[%c0_6, %c0_7], %7 {strides = array<i32>} : memref<48x192xf32, #tpu.memory_space<vmem>>, vector<48x192xf32>,
    %c0_i32_8 = arith.constant 0 : i32
    %9 = arith.cmpi eq, %arg2, %c0_i32_8 : i32
    %10 = arith.extui %9 : i1 to i32
    %c0_i32_9 = arith.constant 0 : i32
    %11 = arith.cmpi ne, %10, %c0_i32_9 : i32
    scf.if %11 {
      %c0_10 = arith.constant 0 : index
      %c0_11 = arith.constant 0 : index
      %12 = vector.load %arg7[%c0_10, %c0_11] : memref<48x192xf32, #tpu.memory_space<vmem>>, vector<48x192xf32>
      %c0_12 = arith.constant 0 : index
      %c0_13 = arith.constant 0 : index
      %13 = vector.load %arg5[%c0_12, %c0_13] : memref<1x192xf32, #tpu.memory_space<vmem>>, vector<1x192xf32>
      %14 = vector.broadcast %13 : vector<1x192xf32> to vector<48x192xf32>
      %15 = arith.addf %12, %14 : vector<48x192xf32>
      %16 = arith.truncf %15 : vector<48x192xf32> to vector<48x192xbf16>
      %c0_14 = arith.constant 0 : index
      %c0_15 = arith.constant 0 : index
      %17 = vector.load %arg6[%c0_14, %c0_15] : memref<48x192xbf16, #tpu.memory_space<vmem>>, vector<48x192xbf16>
      tpu.vector_store %arg6[%c0_14, %c0_15], %16 {strides = array<i32>} : memref<48x192xbf16, #tpu.memory_space<vmem>>, vector<48x192xbf16>,
    } else {
    }
    return
  }
  func.func @transform_0(%arg0: i32, %arg1: i32, %arg2: i32) -> (i32, i32) {
    %c0_i32 = arith.constant 0 : i32
    return %arg0, %arg2 : i32, i32
  }
  func.func @transform_1(%arg0: i32, %arg1: i32, %arg2: i32) -> (i32, i32) {
    %c0_i32 = arith.constant 0 : i32
    return %arg2, %arg1 : i32, i32
  }
  func.func @transform_2(%arg0: i32, %arg1: i32, %arg2: i32) -> (i32, i32) {
    %c0_i32 = arith.constant 0 : i32
    %c0_i32_0 = arith.constant 0 : i32
    return %c0_i32, %arg1 : i32, i32
  }
  func.func @transform_3(%arg0: i32, %arg1: i32, %arg2: i32) -> (i32, i32) {
    %c0_i32 = arith.constant 0 : i32
    return %arg0, %arg1 : i32, i32
  }
}

module attributes {stable_mosaic.version = 11 : i64} {
  func.func @_linear_kernel(%arg0: i32, %arg1: i32, %arg2: i32, %arg3: memref<48x64xbf16, #tpu.memory_space<vmem>>, %arg4: memref<64x128xbf16, #tpu.memory_space<vmem>>, %arg5: memref<1x128xf32, #tpu.memory_space<vmem>>, %arg6: memref<48x128xbf16, #tpu.memory_space<vmem>>, %arg7: memref<48x128xf32, #tpu.memory_space<vmem>>) attributes {dimension_semantics = [#tpu.dimension_semantics<parallel>, #tpu.dimension_semantics<parallel>, #tpu.dimension_semantics<arbitrary>], iteration_bounds = array<i64: 1, 1, 1>, scalar_prefetch = 0 : i64, scratch_operands = 1 : i64, tpu.core_type = #tpu.core_type<tc>, window_params = [{transform_indices = @transform_0, window_bounds = array<i64: 48, 64>}, {transform_indices = @transform_1, window_bounds = array<i64: 64, 128>}, {transform_indices = @transform_2, window_bounds = array<i64: 1, 128>}, {transform_indices = @transform_3, window_bounds = array<i64: 48, 128>}]} {
    %c0_i32 = arith.constant 0 : i32
    %0 = arith.cmpi eq, %arg2, %c0_i32 : i32
    %1 = arith.extui %0 : i1 to i32
    %c0_i32_0 = arith.constant 0 : i32
    %2 = arith.cmpi ne, %1, %c0_i32_0 : i32
    scf.if %2 {
      %cst_10 = arith.constant 0.000000e+00 : f32
      %12 = vector.broadcast %cst_10 : f32 to vector<48x128xf32>
      %c0_11 = arith.constant 0 : index
      %c0_12 = arith.constant 0 : index
      %13 = vector.load %arg7[%c0_11, %c0_12] : memref<48x128xf32, #tpu.memory_space<vmem>>, vector<48x128xf32>
      tpu.vector_store %arg7[%c0_11, %c0_12], %12 {strides = array<i32>} : memref<48x128xf32, #tpu.memory_space<vmem>>, vector<48x128xf32>,
    } else {
    }
    %c0 = arith.constant 0 : index
    %c0_1 = arith.constant 0 : index
    %3 = vector.load %arg3[%c0, %c0_1] : memref<48x64xbf16, #tpu.memory_space<vmem>>, vector<48x64xbf16>
    %c0_2 = arith.constant 0 : index
    %c0_3 = arith.constant 0 : index
    %4 = vector.load %arg7[%c0_2, %c0_3] : memref<48x128xf32, #tpu.memory_space<vmem>>, vector<48x128xf32>
    %c0_4 = arith.constant 0 : index
    %c0_5 = arith.constant 0 : index
    %5 = vector.load %arg4[%c0_4, %c0_5] : memref<64x128xbf16, #tpu.memory_space<vmem>>, vector<64x128xbf16>
    %cst = arith.constant dense<0.000000e+00> : vector<48x128xf32>
    %6 = tpu.matmul %3, %5, %cst {dimension_numbers = #tpu.dot_dimension_numbers<[1], [0], [0], [1], [0, 0, 1, 1], [], []>} : vector<48x64xbf16>, vector<64x128xbf16>, vector<48x128xf32> -> vector<48x128xf32>
    %7 = arith.addf %4, %6 : vector<48x128xf32>
    %c0_6 = arith.constant 0 : index
    %c0_7 = arith.constant 0 : index
    %8 = vector.load %arg7[%c0_6, %c0_7] : memref<48x128xf32, #tpu.memory_space<vmem>>, vector<48x128xf32>
    tpu.vector_store %arg7[%c0_6, %c0_7], %7 {strides = array<i32>} : memref<48x128xf32, #tpu.memory_space<vmem>>, vector<48x128xf32>,
    %c0_i32_8 = arith.constant 0 : i32
    %9 = arith.cmpi eq, %arg2, %c0_i32_8 : i32
    %10 = arith.extui %9 : i1 to i32
    %c0_i32_9 = arith.constant 0 : i32
    %11 = arith.cmpi ne, %10, %c0_i32_9 : i32
    scf.if %11 {
      %c0_10 = arith.constant 0 : index
      %c0_11 = arith.constant 0 : index
      %12 = vector.load %arg7[%c0_10, %c0_11] : memref<48x128xf32, #tpu.memory_space<vmem>>, vector<48x128xf32>
      %c0_12 = arith.constant 0 : index
      %c0_13 = arith.constant 0 : index
      %13 = vector.load %arg5[%c0_12, %c0_13] : memref<1x128xf32, #tpu.memory_space<vmem>>, vector<1x128xf32>
      %14 = vector.broadcast %13 : vector<1x128xf32> to vector<48x128xf32>
      %15 = arith.addf %12, %14 : vector<48x128xf32>
      %16 = arith.mulf %15, %15 : vector<48x128xf32>
      %17 = arith.mulf %15, %16 : vector<48x128xf32>
      %cst_14 = arith.constant 4.471500e-02 : f32
      %18 = vector.broadcast %cst_14 : f32 to vector<48x128xf32>
      %19 = arith.mulf %18, %17 : vector<48x128xf32>
      %20 = arith.addf %15, %19 : vector<48x128xf32>
      %cst_15 = arith.constant 0.797884583 : f32
      %21 = vector.broadcast %cst_15 : f32 to vector<48x128xf32>
      %22 = arith.mulf %21, %20 : vector<48x128xf32>
      %23 = math.tanh %22 : vector<48x128xf32>
      %cst_16 = arith.constant 1.000000e+00 : f32
      %24 = vector.broadcast %cst_16 : f32 to vector<48x128xf32>
      %25 = arith.addf %24, %23 : vector<48x128xf32>
      %cst_17 = arith.constant 5.000000e-01 : f32
      %26 = vector.broadcast %cst_17 : f32 to vector<48x128xf32>
      %27 = arith.mulf %26, %25 : vector<48x128xf32>
      %28 = arith.mulf %15, %27 : vector<48x128xf32>
      %29 = arith.truncf %28 : vector<48x128xf32> to vector<48x128xbf16>
      %c0_18 = arith.constant 0 : index
      %c0_19 = arith.constant 0 : index
      %30 = vector.load %arg6[%c0_18, %c0_19] : memref<48x128xbf16, #tpu.memory_space<vmem>>, vector<48x128xbf16>
      tpu.vector_store %arg6[%c0_18, %c0_19], %29 {strides = array<i32>} : memref<48x128xbf16, #tpu.memory_space<vmem>>, vector<48x128xbf16>,
    } else {
    }
    return
  }
  func.func @transform_0(%arg0: i32, %arg1: i32, %arg2: i32) -> (i32, i32) {
    %c0_i32 = arith.constant 0 : i32
    return %arg0, %arg2 : i32, i32
  }
  func.func @transform_1(%arg0: i32, %arg1: i32, %arg2: i32) -> (i32, i32) {
    %c0_i32 = arith.constant 0 : i32
    return %arg2, %arg1 : i32, i32
  }
  func.func @transform_2(%arg0: i32, %arg1: i32, %arg2: i32) -> (i32, i32) {
    %c0_i32 = arith.constant 0 : i32
    %c0_i32_0 = arith.constant 0 : i32
    return %c0_i32, %arg1 : i32, i32
  }
  func.func @transform_3(%arg0: i32, %arg1: i32, %arg2: i32) -> (i32, i32) {
    %c0_i32 = arith.constant 0 : i32
    return %arg0, %arg1 : i32, i32
  }
}

module attributes {stable_mosaic.version = 11 : i64} {
  func.func @_linear_kernel(%arg0: i32, %arg1: i32, %arg2: i32, %arg3: memref<48x192xbf16, #tpu.memory_space<vmem>>, %arg4: memref<192x64xbf16, #tpu.memory_space<vmem>>, %arg5: memref<1x64xf32, #tpu.memory_space<vmem>>, %arg6: memref<48x64xbf16, #tpu.memory_space<vmem>>, %arg7: memref<48x64xf32, #tpu.memory_space<vmem>>) attributes {dimension_semantics = [#tpu.dimension_semantics<parallel>, #tpu.dimension_semantics<parallel>, #tpu.dimension_semantics<arbitrary>], iteration_bounds = array<i64: 1, 1, 1>, scalar_prefetch = 0 : i64, scratch_operands = 1 : i64, tpu.core_type = #tpu.core_type<tc>, window_params = [{transform_indices = @transform_0, window_bounds = array<i64: 48, 192>}, {transform_indices = @transform_1, window_bounds = array<i64: 192, 64>}, {transform_indices = @transform_2, window_bounds = array<i64: 1, 64>}, {transform_indices = @transform_3, window_bounds = array<i64: 48, 64>}]} {
    %c0_i32 = arith.constant 0 : i32
    %0 = arith.cmpi eq, %arg2, %c0_i32 : i32
    %1 = arith.extui %0 : i1 to i32
    %c0_i32_0 = arith.constant 0 : i32
    %2 = arith.cmpi ne, %1, %c0_i32_0 : i32
    scf.if %2 {
      %cst_10 = arith.constant 0.000000e+00 : f32
      %12 = vector.broadcast %cst_10 : f32 to vector<48x64xf32>
      %c0_11 = arith.constant 0 : index
      %c0_12 = arith.constant 0 : index
      %13 = vector.load %arg7[%c0_11, %c0_12] : memref<48x64xf32, #tpu.memory_space<vmem>>, vector<48x64xf32>
      tpu.vector_store %arg7[%c0_11, %c0_12], %12 {strides = array<i32>} : memref<48x64xf32, #tpu.memory_space<vmem>>, vector<48x64xf32>,
    } else {
    }
    %c0 = arith.constant 0 : index
    %c0_1 = arith.constant 0 : index
    %3 = vector.load %arg3[%c0, %c0_1] : memref<48x192xbf16, #tpu.memory_space<vmem>>, vector<48x192xbf16>
    %c0_2 = arith.constant 0 : index
    %c0_3 = arith.constant 0 : index
    %4 = vector.load %arg7[%c0_2, %c0_3] : memref<48x64xf32, #tpu.memory_space<vmem>>, vector<48x64xf32>
    %c0_4 = arith.constant 0 : index
    %c0_5 = arith.constant 0 : index
    %5 = vector.load %arg4[%c0_4, %c0_5] : memref<192x64xbf16, #tpu.memory_space<vmem>>, vector<192x64xbf16>
    %cst = arith.constant dense<0.000000e+00> : vector<48x64xf32>
    %6 = tpu.matmul %3, %5, %cst {dimension_numbers = #tpu.dot_dimension_numbers<[1], [0], [0], [1], [0, 0, 1, 1], [], []>} : vector<48x192xbf16>, vector<192x64xbf16>, vector<48x64xf32> -> vector<48x64xf32>
    %7 = arith.addf %4, %6 : vector<48x64xf32>
    %c0_6 = arith.constant 0 : index
    %c0_7 = arith.constant 0 : index
    %8 = vector.load %arg7[%c0_6, %c0_7] : memref<48x64xf32, #tpu.memory_space<vmem>>, vector<48x64xf32>
    tpu.vector_store %arg7[%c0_6, %c0_7], %7 {strides = array<i32>} : memref<48x64xf32, #tpu.memory_space<vmem>>, vector<48x64xf32>,
    %c0_i32_8 = arith.constant 0 : i32
    %9 = arith.cmpi eq, %arg2, %c0_i32_8 : i32
    %10 = arith.extui %9 : i1 to i32
    %c0_i32_9 = arith.constant 0 : i32
    %11 = arith.cmpi ne, %10, %c0_i32_9 : i32
    scf.if %11 {
      %c0_10 = arith.constant 0 : index
      %c0_11 = arith.constant 0 : index
      %12 = vector.load %arg7[%c0_10, %c0_11] : memref<48x64xf32, #tpu.memory_space<vmem>>, vector<48x64xf32>
      %c0_12 = arith.constant 0 : index
      %c0_13 = arith.constant 0 : index
      %13 = vector.load %arg5[%c0_12, %c0_13] : memref<1x64xf32, #tpu.memory_space<vmem>>, vector<1x64xf32>
      %14 = vector.broadcast %13 : vector<1x64xf32> to vector<48x64xf32>
      %15 = arith.addf %12, %14 : vector<48x64xf32>
      %16 = arith.truncf %15 : vector<48x64xf32> to vector<48x64xbf16>
      %c0_14 = arith.constant 0 : index
      %c0_15 = arith.constant 0 : index
      %17 = vector.load %arg6[%c0_14, %c0_15] : memref<48x64xbf16, #tpu.memory_space<vmem>>, vector<48x64xbf16>
      tpu.vector_store %arg6[%c0_14, %c0_15], %16 {strides = array<i32>} : memref<48x64xbf16, #tpu.memory_space<vmem>>, vector<48x64xbf16>,
    } else {
    }
    return
  }
  func.func @transform_0(%arg0: i32, %arg1: i32, %arg2: i32) -> (i32, i32) {
    %c0_i32 = arith.constant 0 : i32
    return %arg0, %arg2 : i32, i32
  }
  func.func @transform_1(%arg0: i32, %arg1: i32, %arg2: i32) -> (i32, i32) {
    %c0_i32 = arith.constant 0 : i32
    return %arg2, %arg1 : i32, i32
  }
  func.func @transform_2(%arg0: i32, %arg1: i32, %arg2: i32) -> (i32, i32) {
    %c0_i32 = arith.constant 0 : i32
    %c0_i32_0 = arith.constant 0 : i32
    return %c0_i32, %arg1 : i32, i32
  }
  func.func @transform_3(%arg0: i32, %arg1: i32, %arg2: i32) -> (i32, i32) {
    %c0_i32 = arith.constant 0 : i32
    return %arg0, %arg1 : i32, i32
  }
}

</mosaic_0001>

<bundles_post_ra>
// kernel: _lambda_.71
= control target key start
LH: loop header
LB: loop body
LE: loop exit
PB: predicated region body
PF: predicated region fallthrough
CT: control target
= control target key end

     0   :  { %8 = vsyncpa [#allocation4], 0  ;;  %s249_s12 = smov [#allocation3]   ;;  %s329_s0 = inlined_call_operand.vmem [shape: f32[32,64], index: 0, kind: input, shape index: {}]   ;;  %s330_s1 = inlined_call_operand.vmem [shape: bf16[64,64], index: 1, kind: input, shape index: {}]   ;;  %s331_s2 = inlined_call_operand.hbm [shape: f32[1,64], index: 2, kind: input, shape index: {}]   ;;  %s332_s3 = inlined_call_operand.vmem [shape: bf16[32,64], index: 3, kind: output, shape index: {}]  }
   0x1   :  { %s19_s13 = sshll.u32 %s249_s12, 4  ;;  %s225_s16 = scalar_lea.hbm %s331_s2, 16  ;;  %s20_s13 = int_to_ptr.vmem [resolvable:$true] %s19_s13 }
   0x2   :  { %p226_p0 = scmp.ne.s32.totalorder %s331_s2, %s225_s16  ;;  %p229_p1 = scmp.lt.u32.totalorder %s225_s16, %s331_s2 }
   0x4   :  { %p231_p2 = pnand %p229_p1, %p226_p0 }
   0x6   :  { %234 = shalt.err (!%p231_p2)
}
   0x7   :  { %s235_s21 = scalar_lea.vmem %s20_s13, 16  ;;  %s239_s22 = scalar_lea.vmem %s20_s13, 32 }
   0x8   :  { %p236_p3 = scmp.ne.s32.totalorder %s20_s13, %s235_s21  ;;  %p240_p4 = scmp.lt.s32.totalorder %s20_s13, %s20_s13 }
   0x9   :  { %p241_p5 = scmp.lt.s32.totalorder %s239_s22, %s235_s21 }
   0xb   :  { %p242_p6 = por %p241_p5, %p240_p4 }
   0xd   :  { %p243_p7 = pnand %p242_p6, %p236_p3 }
   0xf   :  { %246 = shalt.err (!%p243_p7)
}
  0x10   :  { %22 = dma.hbm_to_vmem [thread:$0]  %s331_s2, 16, %s20_s13, [#allocation4]  }
  0x11   :  { %247 = dma.done.wait [#allocation4], 16  }
  0x12   :  { %248 = vsyncadd [#allocation4], 4294967280  ;;  %vm31_vm0 = vcmask 523264   ;;  %v250_v0 = vmov 0.0   ;;  %v221_v1 = vld [vmem:[%s330_s1] sm:$0xff]   ;;  %v222_v2 = vld [vmem:[%s330_s1 + $0x8] sm:$0xff]  }
  0x13   :  { %34 = vst.msk [vmem:[#allocation2 + $0x10] sm:$0xff] %vm31_vm0, %v250_v0  ;;  %32 = vst.msk [vmem:[#allocation2] sm:$0xff] %vm31_vm0, %v250_v0  ;;  %207 = vmatprep.subr.bf16.mxu0 %v221_v1  ;;  %v223_v3 = vld [vmem:[%s330_s1 + $0x10] sm:$0xff]   ;;  %v36_v4 = vld [vmem:[%s329_s0] sm:$0xff]  ;;  %vm176_vm1 = vcmask 519168  }
  0x14   :  { %33 = vst.msk [vmem:[#allocation2 + $0x8] sm:$0xff] %vm31_vm0, %v250_v0  ;;  %35 = vst.msk [vmem:[#allocation2 + $0x18] sm:$0xff] %vm31_vm0, %v250_v0  ;;  %208 = vmatpush3.bf16.msra.mxu0 %v221_v1  ;;  %v37_v5 = vld [vmem:[%s329_s0 + $0x8] sm:$0xff]  ;;  %v224_v7 = vld [vmem:[%s330_s1 + $0x18] sm:$0xff]  }
  0x15   :  { %209 = vmatprep.subr.bf16.mxu0 %v222_v2  ;;  %v44_v6 = vpack.c.bf16 %v37_v5, %v36_v4  ;;  %v38_v8 = vld [vmem:[%s329_s0 + $0x10] sm:$0xff]  ;;  %v39_v9 = vld [vmem:[%s329_s0 + $0x18] sm:$0xff]  ;;  %v192_v23 = vld [vmem:[#allocation3] ss:$0 sm:$0xff] }
  0x16   :  { %v45_v10 = vpack.c.bf16 %v39_v9, %v38_v8 }
  0x17   :  { %215 = vmatprep.mubr.msk.bf16.mxu0 %vm31_vm0, %v44_v6 }
  0x18   :  { %210 = vmatpush3.bf16.msra.mxu0 %v222_v2 }
  0x19   :  { %211 = vmatprep.subr.bf16.mxu0 %v223_v3 }
  0x1a   :  { %v42_v11 = vld [vmem:[#allocation2 + $0x10] sm:$0xff]  ;;  %v40_v12 = vld [vmem:[#allocation2] sm:$0xff] }
  0x1b   :  { %v43_v14 = vld [vmem:[#allocation2 + $0x18] sm:$0xff]  ;;  %v41_v17 = vld [vmem:[#allocation2 + $0x8] sm:$0xff] }
  0x1c   :  { %212 = vmatpush3.bf16.msra.mxu0 %v223_v3 }
  0x1d   :  { %213 = vmatprep.subr.bf16.mxu0 %v224_v7 }
  0x20   :  { %214 = vmatpush3.bf16.msra.mxu0 %v224_v7 }
  0x23   :  { %216 = vmatmul.mubr.msk.bf16.vlgmr.msra.gmra.mrb[0].mxu0 %vm31_vm0, %v45_v10 }
  0xf6   :  { %v217_v13 = vpop.f32.mrb[0].mxu0 }
  0xf7   :  { %v136_v15 = vadd.f32 %v217_v13, %v42_v11  ;;  %v119_v16 = vpop.f32.mrb[1].mxu0 }
  0xf8   :  { %v134_v18 = vadd.f32 %v119_v16, %v40_v12  ;;  %v218_v19 = vpop.f32.mrb[2].mxu0 }
  0xf9   :  { %140 = vst.msk [vmem:[#allocation2 + $0x10] sm:$0xff] %vm31_vm0, %v136_v15  ;;  %v137_v20 = vadd.f32 %v218_v19, %v43_v14  ;;  %v122_v21 = vpop.f32.mrb[3].mxu0 }
  0xfa   :  { %138 = vst.msk [vmem:[#allocation2] sm:$0xff] %vm31_vm0, %v134_v18  ;;  %v135_v22 = vadd.f32 %v122_v21, %v41_v17 }
  0xfb   :  { %141 = vst.msk [vmem:[#allocation2 + $0x18] sm:$0xff] %vm31_vm0, %v137_v20 }
  0xfc   :  { %139 = vst.msk [vmem:[#allocation2 + $0x8] sm:$0xff] %vm31_vm0, %v135_v22 }
 0x100   :  { %v147_v24 = vld [vmem:[#allocation2 + $0x10] sm:$0xff] }
 0x101   :  { %v158_v25 = vadd.f32 %v192_v23, %v147_v24  ;;  %v145_v26 = vld [vmem:[#allocation2] sm:$0xff] }
 0x102   :  { %v156_v27 = vadd.f32 %v192_v23, %v145_v26  ;;  %v148_v28 = vld [vmem:[#allocation2 + $0x18] sm:$0xff] }
 0x103   :  { %v199_v29 = vpack.c.bf16 %v158_v25, %v158_v25  ;;  %v159_v30 = vadd.f32 %v192_v23, %v148_v28  ;;  %v146_v31 = vld [vmem:[#allocation2 + $0x8] sm:$0xff] }
 0x104   :  { %v197_v32 = vpack.c.bf16 %v156_v27, %v156_v27  ;;  %v157_v33 = vadd.f32 %v192_v23, %v146_v31 }
 0x105   :  { %179 = vst.msk [vmem:[%s332_s3 + $0x8] sm:$0xf] %vm176_vm1, %v199_v29  ;;  %v200_v34 = vpack.c.bf16 %v159_v30, %v159_v30 }
 0x106   :  { %177 = vst.msk [vmem:[%s332_s3] sm:$0xf] %vm176_vm1, %v197_v32  ;;  %v198_v35 = vpack.c.bf16 %v157_v33, %v157_v33 }
 0x107   :  { %180 = vst.msk [vmem:[%s332_s3 + $0xc] sm:$0xf] %vm176_vm1, %v200_v34 }
 0x108   :  { %178 = vst.msk [vmem:[%s332_s3 + $0x4] sm:$0xf] %vm176_vm1, %v198_v35 }
 0x109   :  { %185 = vsyncpa [#allocation4], 1 }

// kernel: _lambda_.70
= control target key start
LH: loop header
LB: loop body
LE: loop exit
PB: predicated region body
PF: predicated region fallthrough
CT: control target
= control target key end

     0   :  { %vm19_vm0 = vcmask 523264   ;;  %v211_v1 = vmov 0.0   ;;  %vm164_vm1 = vcmask 519168   ;;  %s281_s1 = inlined_call_operand.vmem [shape: bf16[64,64], index: 1, kind: input, shape index: {}]   ;;  %s282_s0 = inlined_call_operand.vmem [shape: f32[32,64], index: 0, kind: input, shape index: {}]   ;;  %s283_s2 = inlined_call_operand.vmem [shape: f32[1,64], index: 2, kind: input, shape index: {}]   ;;  %s284_s3 = inlined_call_operand.vmem [shape: bf16[32,64], index: 3, kind: output, shape index: {}]  }
   0x1   :  { %v207_v0 = vld [vmem:[%s281_s1] sm:$0xff]   ;;  %22 = vst.msk [vmem:[#allocation2 + $0x10] sm:$0xff] %vm19_vm0, %v211_v1  ;;  %20 = vst.msk [vmem:[#allocation2] sm:$0xff] %vm19_vm0, %v211_v1  ;;  %v208_v2 = vld [vmem:[%s281_s1 + $0x8] sm:$0xff]  }
   0x2   :  { %21 = vst.msk [vmem:[#allocation2 + $0x8] sm:$0xff] %vm19_vm0, %v211_v1  ;;  %23 = vst.msk [vmem:[#allocation2 + $0x18] sm:$0xff] %vm19_vm0, %v211_v1  ;;  %194 = vmatprep.subr.bf16.mxu0 %v207_v0  ;;  %v209_v3 = vld [vmem:[%s281_s1 + $0x10] sm:$0xff]   ;;  %v24_v4 = vld [vmem:[%s282_s0] sm:$0xff] }
   0x3   :  { %195 = vmatpush3.bf16.msra.mxu0 %v207_v0  ;;  %v25_v5 = vld [vmem:[%s282_s0 + $0x8] sm:$0xff]  ;;  %v210_v7 = vld [vmem:[%s281_s1 + $0x18] sm:$0xff]   ;;  %v26_v8 = vld [vmem:[%s282_s0 + $0x10] sm:$0xff] }
   0x4   :  { %196 = vmatprep.subr.bf16.mxu0 %v208_v2  ;;  %v32_v6 = vpack.c.bf16 %v25_v5, %v24_v4  ;;  %v27_v9 = vld [vmem:[%s282_s0 + $0x18] sm:$0xff]  ;;  %v179_v23 = vld [vmem:[%s283_s2] ss:$0 sm:$0xff] }
   0x5   :  { %v33_v10 = vpack.c.bf16 %v27_v9, %v26_v8 }
   0x6   :  { %202 = vmatprep.mubr.msk.bf16.mxu0 %vm19_vm0, %v32_v6 }
   0x7   :  { %197 = vmatpush3.bf16.msra.mxu0 %v208_v2 }
   0x8   :  { %198 = vmatprep.subr.bf16.mxu0 %v209_v3  ;;  %v30_v11 = vld [vmem:[#allocation2 + $0x10] sm:$0xff]  ;;  %v28_v12 = vld [vmem:[#allocation2] sm:$0xff] }
   0x9   :  { %v31_v14 = vld [vmem:[#allocation2 + $0x18] sm:$0xff]  ;;  %v29_v17 = vld [vmem:[#allocation2 + $0x8] sm:$0xff] }
   0xb   :  { %199 = vmatpush3.bf16.msra.mxu0 %v209_v3 }
   0xc   :  { %200 = vmatprep.subr.bf16.mxu0 %v210_v7 }
   0xf   :  { %201 = vmatpush3.bf16.msra.mxu0 %v210_v7 }
  0x12   :  { %203 = vmatmul.mubr.msk.bf16.vlgmr.msra.gmra.mrb[0].mxu0 %vm19_vm0, %v33_v10 }
  0xe5   :  { %v204_v13 = vpop.f32.mrb[0].mxu0 }
  0xe6   :  { %v124_v15 = vadd.f32 %v204_v13, %v30_v11  ;;  %v107_v16 = vpop.f32.mrb[1].mxu0 }
  0xe7   :  { %v122_v18 = vadd.f32 %v107_v16, %v28_v12  ;;  %v205_v19 = vpop.f32.mrb[2].mxu0 }
  0xe8   :  { %128 = vst.msk [vmem:[#allocation2 + $0x10] sm:$0xff] %vm19_vm0, %v124_v15  ;;  %v125_v20 = vadd.f32 %v205_v19, %v31_v14  ;;  %v110_v21 = vpop.f32.mrb[3].mxu0 }
  0xe9   :  { %126 = vst.msk [vmem:[#allocation2] sm:$0xff] %vm19_vm0, %v122_v18  ;;  %v123_v22 = vadd.f32 %v110_v21, %v29_v17 }
  0xea   :  { %129 = vst.msk [vmem:[#allocation2 + $0x18] sm:$0xff] %vm19_vm0, %v125_v20 }
  0xeb   :  { %127 = vst.msk [vmem:[#allocation2 + $0x8] sm:$0xff] %vm19_vm0, %v123_v22 }
  0xef   :  { %v135_v24 = vld [vmem:[#allocation2 + $0x10] sm:$0xff] }
  0xf0   :  { %v146_v25 = vadd.f32 %v179_v23, %v135_v24  ;;  %v133_v26 = vld [vmem:[#allocation2] sm:$0xff] }
  0xf1   :  { %v144_v27 = vadd.f32 %v179_v23, %v133_v26  ;;  %v136_v28 = vld [vmem:[#allocation2 + $0x18] sm:$0xff] }
  0xf2   :  { %v186_v29 = vpack.c.bf16 %v146_v25, %v146_v25  ;;  %v147_v30 = vadd.f32 %v179_v23, %v136_v28  ;;  %v134_v31 = vld [vmem:[#allocation2 + $0x8] sm:$0xff] }
  0xf3   :  { %v184_v32 = vpack.c.bf16 %v144_v27, %v144_v27  ;;  %v145_v33 = vadd.f32 %v179_v23, %v134_v31 }
  0xf4   :  { %167 = vst.msk [vmem:[%s284_s3 + $0x8] sm:$0xf] %vm164_vm1, %v186_v29  ;;  %v187_v34 = vpack.c.bf16 %v147_v30, %v147_v30 }
  0xf5   :  { %165 = vst.msk [vmem:[%s284_s3] sm:$0xf] %vm164_vm1, %v184_v32  ;;  %v185_v35 = vpack.c.bf16 %v145_v33, %v145_v33 }
  0xf6   :  { %168 = vst.msk [vmem:[%s284_s3 + $0xc] sm:$0xf] %vm164_vm1, %v187_v34 }
  0xf7   :  { %166 = vst.msk [vmem:[%s284_s3 + $0x4] sm:$0xf] %vm164_vm1, %v185_v35 }

// kernel: _lambda_.63
= control target key start
LH: loop header
LB: loop body
LE: loop exit
PB: predicated region body
PF: predicated region fallthrough
CT: control target
= control target key end

     0   :  { %vm19_vm0 = vcmask 517120   ;;  %v293_v20 = vmov 0.0   ;;  %s374_s1 = inlined_call_operand.vmem [shape: bf16[256,64], index: 1, kind: input, shape index: {}]   ;;  %s375_s0 = inlined_call_operand.vmem [shape: f32[2,256], index: 0, kind: input, shape index: {}]   ;;  %s376_s2 = inlined_call_operand.vmem [shape: f32[1,64], index: 2, kind: input, shape index: {}]   ;;  %s377_s3 = inlined_call_operand.vmem [shape: f32[2,64], index: 3, kind: output, shape index: {}]  }
   0x1   :  { %v273_v0 = vld [vmem:[%s374_s1 + $0x40] sm:$0xff]   ;;  %v275_v2 = vld [vmem:[%s374_s1 + $0x48] sm:$0xff]   ;;  %v277_v4 = vld [vmem:[%s374_s1 + $0x50] sm:$0xff]   ;;  %20 = vst.msk [vmem:[#allocation2] sm:$0x3] %vm19_vm0, %v293_v20 }
   0x2   :  { %v274_v1 = vld [vmem:[%s374_s1] sm:$0xff]   ;;  %250 = vmatprep.subr.bf16.mxu0 %v273_v0  ;;  %v276_v3 = vld [vmem:[%s374_s1 + $0x8] sm:$0xff]   ;;  %v278_v5 = vld [vmem:[%s374_s1 + $0x10] sm:$0xff]  }
   0x3   :  { %251 = vmatpush3.bf16.msra.mxu0 %v274_v1  ;;  %v279_v6 = vld [vmem:[%s374_s1 + $0x58] sm:$0xff]   ;;  %v281_v8 = vld [vmem:[%s374_s1 + $0x60] sm:$0xff]   ;;  %v283_v10 = vld [vmem:[%s374_s1 + $0x68] sm:$0xff]  }
   0x4   :  { %252 = vmatprep.subr.bf16.mxu0 %v275_v2  ;;  %v280_v7 = vld [vmem:[%s374_s1 + $0x18] sm:$0xff]   ;;  %v282_v9 = vld [vmem:[%s374_s1 + $0x20] sm:$0xff]   ;;  %v284_v13 = vld [vmem:[%s374_s1 + $0x28] sm:$0xff]  }
   0x5   :  { %v231_v11 = vld.sshfl [vmem:[%s375_s0] sm:$0x33 pattern:$0x76325410]  ;;  %v285_v15 = vld [vmem:[%s374_s1 + $0x70] sm:$0xff]   ;;  %v287_v17 = vld [vmem:[%s374_s1 + $0x78] sm:$0xff]  }
   0x6   :  { %v31_v12 = vcombine.high %v231_v11, %v231_v11  ;;  %v286_v16 = vld [vmem:[%s374_s1 + $0x30] sm:$0xff]   ;;  %v288_v18 = vld [vmem:[%s374_s1 + $0x38] sm:$0xff]   ;;  %v34_v19 = vpack.c.bf16 %v231_v11, %v231_v11  ;;  %v248_v28 = vld [vmem:[%s376_s2] ss:$0 sm:$0xff] }
   0x7   :  { %253 = vmatpush3.bf16.msra.mxu0 %v276_v3 }
   0x8   :  { %254 = vmatprep.subr.bf16.mxu0 %v277_v4  ;;  %v35_v14 = vpack.c.bf16 %v31_v12, %v31_v12  ;;  %v22_v22 = vld [vmem:[#allocation2] sm:$0x3] }
   0xa   :  { %196 = vmatprep.mubr.bf16.mxu0 %v35_v14 }
   0xb   :  { %255 = vmatpush3.bf16.msra.mxu0 %v278_v5 }
   0xc   :  { %256 = vmatprep.subr.bf16.mxu0 %v279_v6 }
   0xf   :  { %257 = vmatpush3.bf16.msra.mxu0 %v280_v7 }
  0x10   :  { %258 = vmatprep.subr.bf16.mxu0 %v281_v8 }
  0x13   :  { %259 = vmatpush3.bf16.msra.mxu0 %v282_v9 }
  0x14   :  { %260 = vmatprep.subr.bf16.mxu0 %v283_v10 }
  0x17   :  { %261 = vmatpush3.bf16.msra.mxu0 %v284_v13 }
  0x18   :  { %262 = vmatprep.subr.bf16.mxu0 %v285_v15 }
  0x1b   :  { %263 = vmatpush3.bf16.msra.mxu0 %v286_v16 }
  0x1c   :  { %264 = vmatprep.subr.bf16.mxu0 %v287_v17 }
  0x1f   :  { %265 = vmatpush3.bf16.msra.mxu0 %v288_v18 }
  0x22   :  { %197 = vmatmul.mubr.bf16.vlgmr.msra.gmra.mrb[0].mxu0 %v34_v19 }
  0xf5   :  { %v266_v21 = vpop.f32.mrb[0].mxu0 }
  0xf6   :  { %v267_v23 = vpop.f32.mrb[1].mxu0 }
  0xf7   :  { %v268_v24 = vadd.f32 %v267_v23, %v266_v21  ;;  %v269_v25 = vpop.f32.mrb[2].mxu0 }
  0xf8   :  { %v270_v26 = vpop.f32.mrb[3].mxu0 }
  0xf9   :  { %v204_v27 = vadd.f32 %v268_v24, %v22_v22 }
  0xfb   :  { %206 = vst.msk [vmem:[#allocation2] sm:$0x3] %vm19_vm0, %v204_v27 }
 0x102   :  { %v210_v29 = vld [vmem:[#allocation2] sm:$0x3] }
 0x103   :  { %v218_v30 = vadd.f32 %v248_v28, %v210_v29 }
 0x105   :  { %v249_v31 = vmul.f32 -1.442695, %v218_v30 }
 0x107   :  { %289 = vpow2.f32 %v249_v31 }
 0x111   :  { %v290_v32 = vpop.eup %289 }
 0x112   :  { %v222_v33 = vadd.f32 1.0, %v290_v32 }
 0x114   :  { %291 = vrcp.f32 %v222_v33 }
 0x11e   :  { %v292_v34 = vpop.eup %291 }
 0x11f   :  { %v225_v35 = vmul.f32 %v292_v34, %v218_v30 }
 0x121   :  { %226 = vst.msk [vmem:[%s377_s3] sm:$0x3] %vm19_vm0, %v225_v35 }

// kernel: _lambda_.64
= control target key start
LH: loop header
LB: loop body
LE: loop exit
PB: predicated region body
PF: predicated region fallthrough
CT: control target
= control target key end

     0   :  { %vm19_vm0 = vcmask 517120   ;;  %v149_v0 = vmov 0.0   ;;  %vm150_vm1 = vmmov 0   ;;  %vm56_vm2 = vcmask 523264   ;;  %s195_s1 = inlined_call_operand.vmem [shape: bf16[64,64], index: 1, kind: input, shape index: {}]   ;;  %s196_s0 = inlined_call_operand.vmem [shape: f32[2,64], index: 0, kind: input, shape index: {}]   ;;  %s197_s2 = inlined_call_operand.vmem [shape: f32[1,64], index: 2, kind: input, shape index: {}]   ;;  %s198_s3 = inlined_call_operand.vmem [shape: f32[2,64], index: 3, kind: output, shape index: {}]  }
   0x1   :  { %131 = vmatprep.subr.bf16.mxu0 %v149_v0  ;;  %v145_v1 = vld [vmem:[%s195_s1] sm:$0xff]   ;;  %139 = vmatprep.mubr.msk.bf16.mxu0 %vm150_vm1, %v149_v0  ;;  %20 = vst.msk [vmem:[#allocation2] sm:$0x3] %vm19_vm0, %v149_v0  ;;  %v146_v2 = vld [vmem:[%s195_s1 + $0x8] sm:$0xff]   ;;  %v147_v3 = vld [vmem:[%s195_s1 + $0x10] sm:$0xff]  }
   0x2   :  { %132 = vmatpush3.bf16.msra.mxu0 %v145_v1  ;;  %v148_v4 = vld [vmem:[%s195_s1 + $0x18] sm:$0xff]   ;;  %v21_v5 = vld [vmem:[%s196_s0] sm:$0x3] }
   0x3   :  { %133 = vmatprep.subr.bf16.mxu0 %v149_v0  ;;  %v23_v6 = vpack.c.bf16 %v21_v5, %v21_v5  ;;  %v125_v13 = vld [vmem:[%s197_s2] ss:$0 sm:$0xff] }
   0x6   :  { %134 = vmatpush3.bf16.msra.mxu0 %v146_v2 }
   0x7   :  { %135 = vmatprep.subr.bf16.mxu0 %v149_v0 }
   0x8   :  { %v22_v7 = vld [vmem:[#allocation2] sm:$0x3] }
   0xa   :  { %136 = vmatpush3.bf16.msra.mxu0 %v147_v3 }
   0xb   :  { %137 = vmatprep.subr.bf16.mxu0 %v149_v0 }
   0xe   :  { %138 = vmatpush3.bf16.msra.mxu0 %v148_v4 }
  0x11   :  { %140 = vmatmul.mubr.msk.bf16.vlgmr.msra.gmra.mrb[0].mxu0 %vm56_vm2, %v23_v6 }
  0xe4   :  { %v94_v8 = vpop.f32.mrb[0].mxu0 }
  0xe5   :  { %v100_v9 = vadd.f32 %v94_v8, %v22_v7  ;;  %v141_v10 = vpop.f32.mrb[1].mxu0 }
  0xe6   :  { %v97_v11 = vpop.f32.mrb[2].mxu0 }
  0xe7   :  { %102 = vst.msk [vmem:[#allocation2] sm:$0x3] %vm19_vm0, %v100_v9  ;;  %v142_v12 = vpop.f32.mrb[3].mxu0 }
  0xee   :  { %v106_v14 = vld [vmem:[#allocation2] sm:$0x3] }
  0xef   :  { %v114_v15 = vadd.f32 %v125_v13, %v106_v14 }
  0xf1   :  { %115 = vst.msk [vmem:[%s198_s3] sm:$0x3] %vm19_vm0, %v114_v15 }

// kernel: _lambda_.67
= control target key start
LH: loop header
LB: loop body
LE: loop exit
PB: predicated region body
PF: predicated region fallthrough
CT: control target
= control target key end

     0   :  { %8 = vsyncpa [#allocation4], 0  ;;  %s173_s12 = smov [#allocation3]   ;;  %s223_s0 = inlined_call_operand.vmem [shape: f32[2,32], index: 0, kind: input, shape index: {}]   ;;  %s224_s1 = inlined_call_operand.vmem [shape: bf16[32,64], index: 1, kind: input, shape index: {}]   ;;  %s225_s2 = inlined_call_operand.hbm [shape: f32[1,64], index: 2, kind: input, shape index: {}]   ;;  %s226_s3 = inlined_call_operand.vmem [shape: f32[2,64], index: 3, kind: output, shape index: {}]  }
   0x1   :  { %s19_s13 = sshll.u32 %s173_s12, 4  ;;  %s149_s16 = scalar_lea.hbm %s225_s2, 16  ;;  %s20_s13 = int_to_ptr.vmem [resolvable:$true] %s19_s13 }
   0x2   :  { %p150_p0 = scmp.ne.s32.totalorder %s225_s2, %s149_s16  ;;  %p153_p1 = scmp.lt.u32.totalorder %s149_s16, %s225_s2 }
   0x4   :  { %p155_p2 = pnand %p153_p1, %p150_p0 }
   0x6   :  { %158 = shalt.err (!%p155_p2)
}
   0x7   :  { %s159_s21 = scalar_lea.vmem %s20_s13, 16  ;;  %s163_s22 = scalar_lea.vmem %s20_s13, 32 }
   0x8   :  { %p160_p3 = scmp.ne.s32.totalorder %s20_s13, %s159_s21  ;;  %p164_p4 = scmp.lt.s32.totalorder %s20_s13, %s20_s13 }
   0x9   :  { %p165_p5 = scmp.lt.s32.totalorder %s163_s22, %s159_s21 }
   0xb   :  { %p166_p6 = por %p165_p5, %p164_p4 }
   0xd   :  { %p167_p7 = pnand %p166_p6, %p160_p3 }
   0xf   :  { %170 = shalt.err (!%p167_p7)
}
  0x10   :  { %22 = dma.hbm_to_vmem [thread:$0]  %s225_s2, 16, %s20_s13, [#allocation4]  }
  0x11   :  { %171 = dma.done.wait [#allocation4], 16  }
  0x12   :  { %172 = vsyncadd [#allocation4], 4294967280  ;;  %vm31_vm0 = vcmask 517120   ;;  %v174_v0 = vmov 0.0   ;;  %vm175_vm1 = vmmov 0   ;;  %v143_v1 = vld [vmem:[%s224_s1] sm:$0xff]  }
  0x13   :  { %32 = vst.msk [vmem:[#allocation2] sm:$0x3] %vm31_vm0, %v174_v0  ;;  %132 = vmatprep.subr.bf16.mxu0 %v174_v0  ;;  %136 = vmatprep.mubr.msk.bf16.mxu0 %vm175_vm1, %v174_v0  ;;  %v144_v2 = vld [vmem:[%s224_s1 + $0x8] sm:$0xff]   ;;  %v33_v3 = vld [vmem:[%s223_s0] sm:$0x3]  ;;  %vm52_vm2 = vcmask 261120  }
  0x14   :  { %133 = vmatpush3.bf16.msra.mxu0 %v143_v1  ;;  %v35_v4 = vpack.c.bf16 %v33_v3, %v33_v3  ;;  %v127_v11 = vld [vmem:[#allocation3] ss:$0 sm:$0xff] }
  0x15   :  { %134 = vmatprep.subr.bf16.mxu0 %v174_v0 }
  0x18   :  { %135 = vmatpush3.bf16.msra.mxu0 %v144_v2 }
  0x1a   :  { %v34_v5 = vld [vmem:[#allocation2] sm:$0x3] }
  0x1b   :  { %137 = vmatmul.mubr.msk.bf16.vlgmr.msra.gmra.mrb[0].mxu0 %vm52_vm2, %v35_v4 }
  0xee   :  { %v90_v6 = vpop.f32.mrb[0].mxu0 }
  0xef   :  { %v96_v7 = vadd.f32 %v90_v6, %v34_v5  ;;  %v138_v8 = vpop.f32.mrb[1].mxu0 }
  0xf0   :  { %v93_v9 = vpop.f32.mrb[2].mxu0 }
  0xf1   :  { %98 = vst.msk [vmem:[#allocation2] sm:$0x3] %vm31_vm0, %v96_v7  ;;  %v139_v10 = vpop.f32.mrb[3].mxu0 }
  0xf8   :  { %v102_v12 = vld [vmem:[#allocation2] sm:$0x3] }
  0xf9   :  { %v110_v13 = vadd.f32 %v127_v11, %v102_v12 }
  0xfb   :  { %v128_v14 = vmul.f32 -1.442695, %v110_v13 }
  0xfd   :  { %145 = vpow2.f32 %v128_v14 }
 0x107   :  { %v146_v15 = vpop.eup %145 }
 0x108   :  { %v114_v16 = vadd.f32 1.0, %v146_v15 }
 0x10a   :  { %147 = vrcp.f32 %v114_v16 }
 0x114   :  { %v148_v17 = vpop.eup %147 }
 0x115   :  { %v117_v18 = vmul.f32 %v148_v17, %v110_v13 }
 0x117   :  { %118 = vst.msk [vmem:[%s226_s3] sm:$0x3] %vm31_vm0, %v117_v18 }
 0x118   :  { %123 = vsyncpa [#allocation4], 1 }

// kernel: _lambda_.72
= control target key start
LH: loop header
LB: loop body
LE: loop exit
PB: predicated region body
PF: predicated region fallthrough
CT: control target
= control target key end

     0   :  { %v314_v1 = vmov 0.0   ;;  %v315_v2 = vmov 0   ;;  %vm316_vm0 = vmmov 0   ;;  %vm110_vm1 = vcmask 523264   ;;  %s383_s1 = inlined_call_operand.vmem [shape: bf16[64,384], index: 1, kind: input, shape index: {}]   ;;  %s384_s0 = inlined_call_operand.vmem [shape: f32[2,64], index: 0, kind: input, shape index: {}]   ;;  %s385_s2 = inlined_call_operand.vmem [shape: f32[1,384], index: 2, kind: input, shape index: {}]   ;;  %s386_s3 = inlined_call_operand.vmem [shape: f32[2,384], index: 3, kind: output, shape index: {}]  }
   0x1   :  { %v294_v0 = vld [vmem:[%s383_s1 + $0x4] ss:$12 sps:$4 sm:$0xff]   ;;  %278 = vmatprep.subr.bf16.mxu1 %v314_v1  ;;  %19 = vst [vmem:[#allocation2] sm:$0x3f] %v314_v1  ;;  %146 = vmatprep.mubr.bf16.mxu0 %v315_v2  ;;  %v296_v3 = vld [vmem:[%s383_s1] ss:$12 sps:$4 sm:$0xff]   ;;  %v202_v23 = vlaneseq }
   0x2   :  { %286 = vmatprep.mubr.msk.bf16.mxu1 %vm316_vm0, %v314_v1  ;;  %114 = vmatprep.subr.bf16.mxu0 %v294_v0  ;;  %v297_v4 = vld [vmem:[%s383_s1 + $0x8] ss:$12 sps:$4 sm:$0xff]   ;;  %v300_v6 = vld [vmem:[%s383_s1 + $0x18] ss:$12 sps:$4 sm:$0xff]   ;;  %v301_v7 = vld [vmem:[%s383_s1 + $0x20] ss:$12 sps:$4 sm:$0xff]  }
   0x3   :  { %115 = vmatpush1.bf16.msra.mxu0 %v296_v3  ;;  %v298_v5 = vld [vmem:[%s383_s1 + $0x1c] ss:$12 sps:$4 sm:$0xff]   ;;  %279 = vmatpush3.bf16.msra.mxu1 %v297_v4  ;;  %v302_v8 = vld [vmem:[%s383_s1 + $0x34] ss:$12 sps:$4 sm:$0xff]   ;;  %v305_v10 = vld [vmem:[%s383_s1 + $0x38] ss:$12 sps:$4 sm:$0xff]  }
   0x4   :  { %116 = vmatprep.subr.bf16.mxu0 %v298_v5  ;;  %280 = vmatprep.subr.bf16.mxu1 %v314_v1  ;;  %v304_v9 = vld [vmem:[%s383_s1 + $0x30] ss:$12 sps:$4 sm:$0xff]   ;;  %v306_v11 = vld [vmem:[%s383_s1 + $0x4c] ss:$12 sps:$4 sm:$0xff]   ;;  %v20_v12 = vld [vmem:[%s384_s0] sm:$0x3] }
   0x5   :  { %v258_v13 = vmul.f32 -1.442695, %v20_v12  ;;  %v308_v14 = vld [vmem:[%s383_s1 + $0x48] ss:$12 sps:$4 sm:$0xff]   ;;  %v309_v15 = vld [vmem:[%s383_s1 + $0x50] ss:$12 sps:$4 sm:$0xff]  }
   0x6   :  { %v317_v21 = vmov 1983009808   ;;  %v203_v25 = vshrl.u32 %v202_v23, 7  ;;  %v221_v29 = vld [vmem:[%s385_s2] sm:$0x7] }
   0x7   :  { %117 = vmatpush1.bf16.msra.mxu0 %v300_v6  ;;  %281 = vmatpush3.bf16.msra.mxu1 %v301_v7  ;;  %310 = vpow2.f32 %v258_v13  ;;  %v200_v22 = vunpack.c.l.s4 %v317_v21 }
   0x8   :  { %118 = vmatprep.subr.bf16.mxu0 %v302_v8  ;;  %282 = vmatprep.subr.bf16.mxu1 %v314_v1  ;;  %v225_v27 = vsub.s32 0, %v203_v25  ;;  %v229_v28 = vsub.s32 1, %v203_v25  ;;  %v233_v32 = vsub.s32 2, %v203_v25  ;;  %v28_v44 = vld [vmem:[#allocation2] sm:$0x3f] }
   0x9   :  { %v201_v24 = vunpack.c.0.s8 %v200_v22 }
   0xa   :  { %v226_v36 = vrot.slane %v221_v29, %v225_v27  ;;  %v230_v37 = vrot.slane %v221_v29, %v229_v28  ;;  %v234_v45 = vrot.slane %v221_v29, %v233_v32 }
   0xb   :  { %119 = vmatpush1.bf16.msra.mxu0 %v304_v9  ;;  %283 = vmatpush3.bf16.msra.mxu1 %v305_v10  ;;  %v204_v26 = vsub.s32 %v201_v24, %v203_v25 }
   0xc   :  { %120 = vmatprep.subr.bf16.mxu0 %v306_v11  ;;  %284 = vmatprep.subr.bf16.mxu1 %v314_v1  ;;  %v235_v46 = vcombine.low %v226_v36, %v230_v37 }
   0xd   :  { %v249_v50 = vrot.slane %v234_v45, %v204_v26 }
   0xe   :  { %v242_v49 = vrot.slane %v235_v46, %v204_v26 }
   0xf   :  { %121 = vmatpush1.bf16.msra.mxu0 %v308_v14  ;;  %285 = vmatpush3.bf16.msra.mxu1 %v309_v15 }
  0x10   :  { %v250_v51 = vcombine.low %v242_v49, %v249_v50 }
  0x11   :  { %v311_v16 = vpop.eup %310 }
  0x12   :  { %v24_v17 = vadd.f32 1.0, %v311_v16 }
  0x14   :  { %312 = vrcp.f32 %v24_v17 }
  0x1e   :  { %v313_v18 = vpop.eup %312 }
  0x1f   :  { %v27_v19 = vmul.f32 %v313_v18, %v20_v12 }
  0x21   :  { %v29_v20 = vpack.c.bf16 %v27_v19, %v27_v19 }
  0x23   :  { %271 = vmatmul.mubr.msk.bf16.vlgmr.msra.gmra.mrb[0].mxu0 %vm110_vm1, %v29_v20  ;;  %287 = vmatmul.mubr.msk.bf16.vlgmr.msra.gmra.mrb[0].mxu1 %vm110_vm1, %v29_v20 }
  0xf6   :  { %v148_v30 = vpop.f32.mrb[0].mxu0  ;;  %v189_v31 = vpop.f32.mrb[0].mxu1 }
  0xf7   :  { %v150_v33 = vpop.f32.mrb[1].mxu0  ;;  %v288_v34 = vpop.f32.mrb[1].mxu1  ;;  %v212_v35 = vrot.slane %v189_v31, %v204_v26 }
  0xf8   :  { %v198_v38 = vcombine.low %v148_v30, %v150_v33  ;;  %v152_v39 = vpop.f32.mrb[2].mxu0  ;;  %v192_v40 = vpop.f32.mrb[2].mxu1 }
  0xf9   :  { %v153_v41 = vpop.f32.mrb[3].mxu0  ;;  %v289_v42 = vpop.f32.mrb[3].mxu1 }
  0xfa   :  { %v205_v43 = vrot.slane %v198_v38, %v204_v26 }
  0xfc   :  { %v213_v47 = vcombine.low %v205_v43, %v212_v35 }
  0xfe   :  { %v215_v48 = vadd.f32 %v213_v47, %v28_v44 }
 0x100   :  { %216 = vst [vmem:[#allocation2] sm:$0x3f] %v215_v48 }
 0x107   :  { %v220_v52 = vld [vmem:[#allocation2] sm:$0x3f] }
 0x108   :  { %v252_v53 = vadd.f32 %v250_v51, %v220_v52 }
 0x10a   :  { %253 = vst [vmem:[%s386_s3] sm:$0x3f] %v252_v53 }

// kernel: _lambda_.74
= control target key start
LH: loop header
LB: loop body
LE: loop exit
PB: predicated region body
PF: predicated region fallthrough
CT: control target
= control target key end

     0   :  { %s499_s12 = smov 0   ;;  %s501_s13 = smov 0   ;;  %s551_s0 = inlined_call_operand.vmem [shape: bf16[2,16,64], index: 0, kind: input, shape index: {}]   ;;  %s552_s1 = inlined_call_operand.vmem [shape: f32[2,1,64], index: 1, kind: input, shape index: {}]   ;;  %s553_s2 = inlined_call_operand.vmem [shape: f32[2,1,64], index: 2, kind: input, shape index: {}]   ;;  %s554_s3 = inlined_call_operand.vmem [shape: bf16[2,16,64], index: 3, kind: output, shape index: {}]  }
   0x1   :  { %s503_s14 = smov 0  }
   0x2 LB: > { %s25_s15 = sadd.s32 1, %s473_s13  ;;  %p409_p0 = scmp.ge.s32.totalorder %s477_s14, 1  ;;  %s477_s14 = sphi %s503_s14, %s13_s14   ;;  %s473_s13 = sphi %s501_s13, %s556_s13   ;;  %s469_s12 = sphi %s499_s12, %s555_s12  }
   0x3   : > { %p27_p1 = scmp.ge.s32.totalorder %s25_s15, 2  ;;  %p174_p2 = scmp.lt.s32.totalorder %s477_s14, 3 }
   0x5   : > { %s558_s15 = smov (%p27_p1, %s25_s15), 0  ;;  %p175_p3 = pnand %p409_p0, %p174_p2 }
   0x6   : > { %p213_p4 = scmp.lt.s32.totalorder (!%p175_p3), %s469_s12, 1  ;;  %vm242_vm0 = vcmask (!%p175_p3), 523264   ;;  %v273_v17 = vlaneseq (!%p175_p3)  ;;  %vm297_vm1 = vcmask (!%p175_p3), 519168  }
   0x7   : > { %178 = sbr.rel (%p175_p3) target bundleno = 340 (0x154), region = 32 }
   0x8   : > { %v274_v21 = vshrl.u32 (!%p175_p3), %v273_v17, 7 }
   0xa   : > { %v275_v25 = vsub.s32 (!%p175_p3), 0, %v274_v21 }
   0xe   : > { %s560_s12 = smov (!%p213_p4, %s469_s12), 1 }
   0xf   : > { %s419_s16 = sshll.u32 %s560_s12, 3  ;;  %s224_s22 = scalar_lea.vmem %s552_s1, %s560_s12 }
  0x10   : > { %s220_s19 = scalar_lea.vmem %s551_s0, %s419_s16  ;;  %v270_v22 = vld [vmem:[%s224_s22] sm:$0x1]  ;;  %s227_s25 = scalar_lea.vmem %s553_s2, %s560_s12 }
  0x11   : > { %v424_v0 = vld [vmem:[%s220_s19] sm:$0xff]   ;;  %v271_v24 = vadd.f32 1.0, %v270_v22  ;;  %s236_s28 = scalar_lea.vmem %s554_s3, %s419_s16 }
  0x12   : > { %v425_v1 = vunpack.c.l.bf16 %v424_v0  ;;  %v426_v2 = vunpack.c.h.bf16 %v424_v0  ;;  %v414_v29 = vld [vmem:[%s227_s25] ss:$0 sm:$0xff] }
  0x13   : > { %v276_v26 = vrot.slane %v271_v24, %v275_v25 }
  0x14   : > { %v243_v3 = vsel %vm242_vm0, %v425_v1, 0.0  ;;  %v246_v4 = vsel %vm242_vm0, %v426_v2, 0.0 }
  0x15   : > { %244 = vadd.xlane.f32.xlu0 %v243_v3 }
  0x19   : > { %247 = vadd.xlane.f32.xlu0 %v246_v4 }
  0xa2   : > { %v245_v5 = vpop.xlane.xlu0 %244 }
  0xa3   : > { %v250_v6 = vmul.f32 0.015625, %v245_v5 }
  0xa5   : > { %v252_v7 = vsub.f32 %v425_v1, %v250_v6 }
  0xa6   : > { %v248_v8 = vpop.xlane.xlu0 %247 }
  0xa7   : > { %v251_v9 = vmul.f32 0.015625, %v248_v8  ;;  %v254_v10 = vmul.f32 %v252_v7, %v252_v7 }
  0xa9   : > { %v253_v11 = vsub.f32 %v426_v2, %v251_v9  ;;  %v256_v12 = vsel %vm242_vm0, %v254_v10, 0.0 }
  0xaa   : > { %257 = vadd.xlane.f32.xlu1 %v256_v12 }
  0xab   : > { %v255_v13 = vmul.f32 %v253_v11, %v253_v11 }
  0xad   : > { %v259_v14 = vsel %vm242_vm0, %v255_v13, 0.0 }
  0xae   : > { %260 = vadd.xlane.f32.xlu1 %v259_v14 }
 0x137   : > { %v258_v15 = vpop.xlane.xlu1 %257 }
 0x138   : > { %v262_v16 = vmul.f32 0.015625, %v258_v15 }
 0x13a   : > { %v264_v18 = vadd.f32 1e-06, %v262_v16 }
 0x13b   : > { %v261_v19 = vpop.xlane.xlu1 %260 }
 0x13c   : > { %451 = vrsqrt.f32 %v264_v18  ;;  %v263_v20 = vmul.f32 0.015625, %v261_v19 }
 0x13e   : > { %v265_v23 = vadd.f32 1e-06, %v263_v20 }
 0x140   : > { %453 = vrsqrt.f32 %v265_v23 }
 0x146   : > { %v452_v27 = vpop.eup %451 }
 0x147   : > { %v268_v28 = vmul.f32 %v452_v27, %v252_v7 }
 0x149   : > { %v278_v30 = vmul.f32 %v276_v26, %v268_v28 }
 0x14a   : > { %v454_v31 = vpop.eup %453 }
 0x14b   : > { %v287_v32 = vadd.f32 %v414_v29, %v278_v30  ;;  %v269_v33 = vmul.f32 %v454_v31, %v253_v11 }
 0x14d   : > { %v421_v34 = vpack.c.bf16 %v287_v32, %v287_v32  ;;  %v279_v35 = vmul.f32 %v276_v26, %v269_v33 }
 0x14f   : > { %298 = vst.msk [vmem:[%s236_s28] sm:$0xf] %vm297_vm1, %v421_v34  ;;  %v288_v36 = vadd.f32 %v414_v29, %v279_v35 }
 0x151   : > { %v422_v37 = vpack.c.bf16 %v288_v36, %v288_v36 }
 0x153   : > { %299 = vst.msk [vmem:[%s236_s28 + $0x4] sm:$0xf] %vm297_vm1, %v422_v37 }
 0x154 PF: > { %s13_s14 = sadd.s32 1, %s477_s14   ;;  %s555_s12 = smov %s473_s13 }
 0x155   : > { %p10_p5 = scmp.ge.s32.totalorder %s13_s14, 4   ;;  %s556_s13 = smov %s558_s15 }
 0x157   :  { %12 = sbr.rel (!%p10_p5) target bundleno = 2 (0x2), region = 68 }

// kernel: _lambda_.75
= control target key start
LH: loop header
LB: loop body
LE: loop exit
PB: predicated region body
PF: predicated region fallthrough
CT: control target
= control target key end

     0   :  { %vm20_vm0 = vcmask 523264   ;;  %v284_v1 = vmov 0   ;;  %v285_v2 = vmov 0.0   ;;  %v187_v12 = vlaneseq  ;;  %s361_s1 = inlined_call_operand.vmem [shape: bf16[64,192], index: 1, kind: input, shape index: {}]   ;;  %s362_s0 = inlined_call_operand.vmem [shape: bf16[32,64], index: 0, kind: input, shape index: {}]   ;;  %s363_s2 = inlined_call_operand.vmem [shape: f32[1,192], index: 2, kind: input, shape index: {}]   ;;  %s364_s3 = inlined_call_operand.vmem [shape: bf16[32,192], index: 3, kind: output, shape index: {}]  }
   0x1   :  { %v270_v0 = vld [vmem:[%s361_s1 + $0x4] ss:$8 sps:$4 sm:$0xff]   ;;  %137 = vmatprep.mubr.bf16.mxu0 %v284_v1  ;;  %147 = vmatprep.mubr.bf16.mxu1 %v284_v1  ;;  %21 = vst.msk [vmem:[#allocation2 + $0x8] sm:$0xff] %vm20_vm0, %v285_v2  ;;  %23 = vst.msk [vmem:[#allocation2 + $0x18] sm:$0xff] %vm20_vm0, %v285_v2  ;;  %v272_v3 = vld [vmem:[%s361_s1] ss:$8 sps:$4 sm:$0xff]  }
   0x2   :  { %25 = vst.msk [vmem:[#allocation2 + $0x28] sm:$0xff] %vm20_vm0, %v285_v2  ;;  %27 = vst.msk [vmem:[#allocation2 + $0x38] sm:$0xff] %vm20_vm0, %v285_v2  ;;  %105 = vmatprep.subr.bf16.mxu0 %v270_v0  ;;  %260 = vmatprep.subr.bf16.mxu1 %v270_v0  ;;  %v273_v4 = vld [vmem:[%s361_s1 + $0x14] ss:$8 sps:$4 sm:$0xff]   ;;  %v275_v5 = vld [vmem:[%s361_s1 + $0x10] ss:$8 sps:$4 sm:$0xff]  }
   0x3   :  { %106 = vmatpush1.bf16.msra.mxu0 %v272_v3  ;;  %264 = vmatpush1.bf16.msra.mxu1 %v272_v3  ;;  %v276_v6 = vld [vmem:[%s361_s1 + $0x24] ss:$8 sps:$4 sm:$0xff]   ;;  %v278_v7 = vld [vmem:[%s361_s1 + $0x20] ss:$8 sps:$4 sm:$0xff]   ;;  %v279_v8 = vld [vmem:[%s361_s1 + $0x34] ss:$8 sps:$4 sm:$0xff]  }
   0x4   :  { %107 = vmatprep.subr.bf16.mxu0 %v273_v4  ;;  %261 = vmatprep.subr.bf16.mxu1 %v273_v4  ;;  %v281_v9 = vld [vmem:[%s361_s1 + $0x30] ss:$8 sps:$4 sm:$0xff]   ;;  %v282_v10 = vld [vmem:[%s362_s0] sm:$0xff]   ;;  %v283_v11 = vld [vmem:[%s362_s0 + $0x8] sm:$0xff]   ;;  %v188_v16 = vshrl.u32 %v187_v12, 7  ;;  %vm229_vm1 = vcmask 1043456  }
   0x5   :  { %v185_v32 = vld [vmem:[%s363_s2] sm:$0x3]  ;;  %vm230_vm2 = vcmask 523268  }
   0x6   :  { %v189_v28 = vsub.s32 0, %v188_v16  ;;  %v193_v29 = vsub.s32 1, %v188_v16  ;;  %vm231_vm3 = vmor %vm230_vm2, %vm229_vm1 }
   0x7   :  { %108 = vmatpush1.bf16.msra.mxu0 %v275_v5  ;;  %265 = vmatpush1.bf16.msra.mxu1 %v275_v5 }
   0x8   :  { %109 = vmatprep.subr.bf16.mxu0 %v276_v6  ;;  %262 = vmatprep.subr.bf16.mxu1 %v276_v6  ;;  %v33_v13 = vld [vmem:[#allocation2 + $0x8] sm:$0xff]  ;;  %v35_v20 = vld [vmem:[#allocation2 + $0x18] sm:$0xff]  ;;  %v190_v33 = vrot.slane %v185_v32, %v189_v28  ;;  %v194_v34 = vrot.slane %v185_v32, %v193_v29 }
   0x9   :  { %v37_v14 = vld [vmem:[#allocation2 + $0x28] sm:$0xff]  ;;  %v39_v21 = vld [vmem:[#allocation2 + $0x38] sm:$0xff] }
   0xb   :  { %110 = vmatpush1.bf16.msra.mxu0 %v278_v7  ;;  %266 = vmatpush1.bf16.msra.mxu1 %v278_v7 }
   0xc   :  { %111 = vmatprep.subr.bf16.mxu0 %v279_v8  ;;  %263 = vmatprep.subr.bf16.mxu1 %v279_v8 }
   0xf   :  { %112 = vmatpush1.bf16.msra.mxu0 %v281_v9  ;;  %267 = vmatpush1.bf16.msra.mxu1 %v281_v9 }
  0x12   :  { %250 = vmatmul.mubr.msk.bf16.vlgmr.msra.gmra.mrb[0].mxu0 %vm20_vm0, %v282_v10  ;;  %251 = vmatmul.mubr.msk.bf16.vlgmr.msra.gmra.mrb[0].mxu1 %vm20_vm0, %v283_v11 }
  0xe5   :  { %v139_v15 = vpop.f32.mrb[0].mxu0  ;;  %v149_v17 = vpop.f32.mrb[0].mxu1 }
  0xe6   :  { %v141_v18 = vpop.f32.mrb[1].mxu0  ;;  %v151_v19 = vpop.f32.mrb[1].mxu1  ;;  %v197_v37 = vadd.f32 %v190_v33, %v139_v15  ;;  %v201_v38 = vadd.f32 %v190_v33, %v149_v17 }
  0xe7   :  { %v159_v22 = vadd.f32 %v141_v18, %v33_v13  ;;  %v163_v23 = vadd.f32 %v151_v19, %v37_v14  ;;  %v143_v24 = vpop.f32.mrb[2].mxu0  ;;  %v153_v25 = vpop.f32.mrb[2].mxu1 }
  0xe8   :  { %v145_v26 = vpop.f32.mrb[3].mxu0  ;;  %v155_v27 = vpop.f32.mrb[3].mxu1  ;;  %v199_v41 = vadd.f32 %v190_v33, %v143_v24  ;;  %v203_v42 = vadd.f32 %v190_v33, %v153_v25 }
  0xe9   :  { %167 = vst.msk [vmem:[#allocation2 + $0x8] sm:$0xff] %vm20_vm0, %v159_v22  ;;  %171 = vst.msk [vmem:[#allocation2 + $0x28] sm:$0xff] %vm20_vm0, %v163_v23  ;;  %v161_v30 = vadd.f32 %v145_v26, %v35_v20  ;;  %v165_v31 = vadd.f32 %v155_v27, %v39_v21 }
  0xeb   :  { %169 = vst.msk [vmem:[#allocation2 + $0x18] sm:$0xff] %vm20_vm0, %v161_v30  ;;  %173 = vst.msk [vmem:[#allocation2 + $0x38] sm:$0xff] %vm20_vm0, %v165_v31 }
  0xf0   :  { %v178_v35 = vld [vmem:[#allocation2 + $0x8] sm:$0xff] }
  0xf1   :  { %v182_v36 = vld [vmem:[#allocation2 + $0x28] sm:$0xff]  ;;  %v198_v39 = vadd.f32 %v194_v34, %v178_v35 }
  0xf2   :  { %v202_v40 = vadd.f32 %v194_v34, %v182_v36  ;;  %v180_v43 = vld [vmem:[#allocation2 + $0x18] sm:$0xff] }
  0xf3   :  { %v184_v44 = vld [vmem:[#allocation2 + $0x38] sm:$0xff]  ;;  %v256_v45 = vpack.c.bf16 %v198_v39, %v197_v37  ;;  %v200_v47 = vadd.f32 %v194_v34, %v180_v43 }
  0xf4   :  { %v258_v46 = vpack.c.bf16 %v202_v40, %v201_v38  ;;  %v204_v48 = vadd.f32 %v194_v34, %v184_v44 }
  0xf5   :  { %232 = vst.msk [vmem:[%s364_s3] sm:$0xff] %vm231_vm3, %v256_v45  ;;  %v257_v49 = vpack.c.bf16 %v200_v47, %v199_v41 }
  0xf6   :  { %234 = vst.msk [vmem:[%s364_s3 + $0x10] sm:$0xff] %vm231_vm3, %v258_v46  ;;  %v259_v50 = vpack.c.bf16 %v204_v48, %v203_v42 }
  0xf7   :  { %233 = vst.msk [vmem:[%s364_s3 + $0x8] sm:$0xff] %vm231_vm3, %v257_v49 }
  0xf8   :  { %235 = vst.msk [vmem:[%s364_s3 + $0x18] sm:$0xff] %vm231_vm3, %v259_v50 }

// kernel: _lambda_.76
= control target key start
LH: loop header
LB: loop body
LE: loop exit
PB: predicated region body
PF: predicated region fallthrough
CT: control target
= control target key end

     0   :  { %s434_s12 = smov 0   ;;  %s436_s13 = smov 0   ;;  %s482_s0 = inlined_call_operand.vmem [shape: bf16[2,8,64], index: 0, kind: input, shape index: {}]   ;;  %s483_s1 = inlined_call_operand.vmem [shape: f32[2,1,64], index: 1, kind: input, shape index: {}]   ;;  %s484_s2 = inlined_call_operand.vmem [shape: f32[2,1,64], index: 2, kind: input, shape index: {}]   ;;  %s485_s3 = inlined_call_operand.vmem [shape: bf16[2,8,64], index: 3, kind: output, shape index: {}]  }
   0x1   :  { %s438_s14 = smov 0  }
   0x2 LB: > { %s25_s15 = sadd.s32 1, %s408_s13  ;;  %p358_p0 = scmp.ge.s32.totalorder %s412_s14, 1  ;;  %s412_s14 = sphi %s438_s14, %s13_s14   ;;  %s408_s13 = sphi %s436_s13, %s487_s13   ;;  %s404_s12 = sphi %s434_s12, %s486_s12  }
   0x3   : > { %p27_p1 = scmp.ge.s32.totalorder %s25_s15, 2  ;;  %p171_p2 = scmp.lt.s32.totalorder %s412_s14, 3 }
   0x5   : > { %s489_s15 = smov (%p27_p1, %s25_s15), 0  ;;  %p172_p3 = pnand %p358_p0, %p171_p2 }
   0x6   : > { %p205_p4 = scmp.lt.s32.totalorder (!%p172_p3), %s404_s12, 1  ;;  %vm227_vm0 = vcmask (!%p172_p3), 523264   ;;  %v245_v10 = vlaneseq (!%p172_p3)  ;;  %vm260_vm1 = vcmask (!%p172_p3), 519168  }
   0x7   : > { %175 = sbr.rel (%p172_p3) target bundleno = 336 (0x150), region = 32 }
   0x8   : > { %v246_v12 = vshrl.u32 (!%p172_p3), %v245_v10, 7 }
   0xa   : > { %v247_v15 = vsub.s32 (!%p172_p3), 0, %v246_v12 }
   0xe   : > { %s491_s12 = smov (!%p205_p4, %s404_s12), 1 }
   0xf   : > { %s359_s16 = sshll.u32 %s491_s12, 2  ;;  %s214_s22 = scalar_lea.vmem %s483_s1, %s491_s12 }
  0x10   : > { %s211_s19 = scalar_lea.vmem %s482_s0, %s359_s16  ;;  %v242_v13 = vld [vmem:[%s214_s22] sm:$0x1]  ;;  %s217_s25 = scalar_lea.vmem %s484_s2, %s491_s12 }
  0x11   : > { %v225_v0 = vld [vmem:[%s211_s19] sm:$0xf]  ;;  %v243_v14 = vadd.f32 1.0, %v242_v13  ;;  %s224_s28 = scalar_lea.vmem %s485_s3, %s359_s16 }
  0x12   : > { %v226_v1 = vunpack.c.l.bf16 %v225_v0  ;;  %v361_v19 = vld [vmem:[%s217_s25] ss:$0 sm:$0xff] }
  0x13   : > { %v248_v16 = vrot.slane %v243_v14, %v247_v15 }
  0x14   : > { %v228_v2 = vsel %vm227_vm0, %v226_v1, 0.0 }
  0x15   : > { %229 = vadd.xlane.f32.xlu0 %v228_v2 }
  0xa2   : > { %v230_v3 = vpop.xlane.xlu0 %229 }
  0xa3   : > { %v232_v4 = vmul.f32 0.015625, %v230_v3 }
  0xa5   : > { %v233_v5 = vsub.f32 %v226_v1, %v232_v4 }
  0xa7   : > { %v234_v6 = vmul.f32 %v233_v5, %v233_v5 }
  0xa9   : > { %v235_v7 = vsel %vm227_vm0, %v234_v6, 0.0 }
  0xaa   : > { %236 = vadd.xlane.f32.xlu0 %v235_v7 }
 0x137   : > { %v237_v8 = vpop.xlane.xlu0 %236 }
 0x138   : > { %v238_v9 = vmul.f32 0.015625, %v237_v8 }
 0x13a   : > { %v239_v11 = vadd.f32 1e-06, %v238_v9 }
 0x13c   : > { %388 = vrsqrt.f32 %v239_v11 }
 0x146   : > { %v389_v17 = vpop.eup %388 }
 0x147   : > { %v241_v18 = vmul.f32 %v389_v17, %v233_v5 }
 0x149   : > { %v250_v20 = vmul.f32 %v248_v16, %v241_v18 }
 0x14b   : > { %v258_v21 = vadd.f32 %v361_v19, %v250_v20 }
 0x14d   : > { %v259_v22 = vpack.c.bf16 %v258_v21, %v258_v21 }
 0x14f   : > { %261 = vst.msk [vmem:[%s224_s28] sm:$0xf] %vm260_vm1, %v259_v22 }
 0x150 PF: > { %s13_s14 = sadd.s32 1, %s412_s14   ;;  %s486_s12 = smov %s408_s13 }
 0x151   : > { %p10_p5 = scmp.ge.s32.totalorder %s13_s14, 4   ;;  %s487_s13 = smov %s489_s15 }
 0x153   :  { %12 = sbr.rel (!%p10_p5) target bundleno = 2 (0x2), region = 68 }

// kernel: _lambda_.69
= control target key start
LH: loop header
LB: loop body
LE: loop exit
PB: predicated region body
PF: predicated region fallthrough
CT: control target
= control target key end

     0   :  { %8 = vsyncpa [#allocation4], 0  ;;  %s196_s12 = smov [#allocation3]   ;;  %s256_s0 = inlined_call_operand.vmem [shape: f32[16,48], index: 0, kind: input, shape index: {}]   ;;  %s257_s1 = inlined_call_operand.vmem [shape: bf16[48,64], index: 1, kind: input, shape index: {}]   ;;  %s258_s2 = inlined_call_operand.hbm [shape: f32[1,64], index: 2, kind: input, shape index: {}]   ;;  %s259_s3 = inlined_call_operand.vmem [shape: bf16[16,64], index: 3, kind: output, shape index: {}]  }
   0x1   :  { %s19_s13 = sshll.u32 %s196_s12, 4  ;;  %s172_s16 = scalar_lea.hbm %s258_s2, 16  ;;  %s20_s13 = int_to_ptr.vmem [resolvable:$true] %s19_s13 }
   0x2   :  { %p173_p0 = scmp.ne.s32.totalorder %s258_s2, %s172_s16  ;;  %p176_p1 = scmp.lt.u32.totalorder %s172_s16, %s258_s2 }
   0x4   :  { %p178_p2 = pnand %p176_p1, %p173_p0 }
   0x6   :  { %181 = shalt.err (!%p178_p2)
}
   0x7   :  { %s182_s21 = scalar_lea.vmem %s20_s13, 16  ;;  %s186_s22 = scalar_lea.vmem %s20_s13, 32 }
   0x8   :  { %p183_p3 = scmp.ne.s32.totalorder %s20_s13, %s182_s21  ;;  %p187_p4 = scmp.lt.s32.totalorder %s20_s13, %s20_s13 }
   0x9   :  { %p188_p5 = scmp.lt.s32.totalorder %s186_s22, %s182_s21 }
   0xb   :  { %p189_p6 = por %p188_p5, %p187_p4 }
   0xd   :  { %p190_p7 = pnand %p189_p6, %p183_p3 }
   0xf   :  { %193 = shalt.err (!%p190_p7)
}
  0x10   :  { %22 = dma.hbm_to_vmem [thread:$0]  %s258_s2, 16, %s20_s13, [#allocation4]  }
  0x11   :  { %194 = dma.done.wait [#allocation4], 16  }
  0x12   :  { %195 = vsyncadd [#allocation4], 4294967280  ;;  %vm31_vm0 = vcmask 523264   ;;  %v197_v0 = vmov 0.0   ;;  %vm198_vm1 = vmmov 0   ;;  %v169_v1 = vld [vmem:[%s257_s1] sm:$0xff]  }
  0x13   :  { %156 = vmatprep.subr.bf16.mxu0 %v197_v0  ;;  %162 = vmatprep.mubr.msk.bf16.mxu0 %vm198_vm1, %v197_v0  ;;  %32 = vst.msk [vmem:[#allocation2] sm:$0xff] %vm31_vm0, %v197_v0  ;;  %33 = vst.msk [vmem:[#allocation2 + $0x8] sm:$0xff] %vm31_vm0, %v197_v0  ;;  %v170_v2 = vld [vmem:[%s257_s1 + $0x8] sm:$0xff]   ;;  %v171_v3 = vld [vmem:[%s257_s1 + $0x10] sm:$0xff]   ;;  %vm63_vm2 = vcmask 392192   ;;  %vm135_vm3 = vcmask 519168  }
  0x14   :  { %157 = vmatpush3.bf16.msra.mxu0 %v169_v1  ;;  %v34_v4 = vld [vmem:[%s256_s0] sm:$0xff]  ;;  %v35_v5 = vld [vmem:[%s256_s0 + $0x8] sm:$0xff]  ;;  %v147_v15 = vld [vmem:[#allocation3] ss:$0 sm:$0xff] }
  0x15   :  { %158 = vmatprep.subr.bf16.mxu0 %v197_v0  ;;  %v38_v6 = vpack.c.bf16 %v35_v5, %v34_v4 }
  0x18   :  { %159 = vmatpush3.bf16.msra.mxu0 %v170_v2 }
  0x19   :  { %160 = vmatprep.subr.bf16.mxu0 %v197_v0 }
  0x1a   :  { %v36_v7 = vld [vmem:[#allocation2] sm:$0xff]  ;;  %v37_v9 = vld [vmem:[#allocation2 + $0x8] sm:$0xff] }
  0x1c   :  { %161 = vmatpush3.bf16.msra.mxu0 %v171_v3 }
  0x1f   :  { %163 = vmatmul.mubr.msk.bf16.vlgmr.msra.gmra.mrb[0].mxu0 %vm63_vm2, %v38_v6 }
  0xf2   :  { %v101_v8 = vpop.f32.mrb[0].mxu0 }
  0xf3   :  { %v108_v10 = vadd.f32 %v101_v8, %v36_v7  ;;  %v164_v11 = vpop.f32.mrb[1].mxu0 }
  0xf4   :  { %v104_v12 = vpop.f32.mrb[2].mxu0 }
  0xf5   :  { %111 = vst.msk [vmem:[#allocation2] sm:$0xff] %vm31_vm0, %v108_v10  ;;  %v109_v13 = vadd.f32 %v104_v12, %v37_v9  ;;  %v165_v14 = vpop.f32.mrb[3].mxu0 }
  0xf7   :  { %112 = vst.msk [vmem:[#allocation2 + $0x8] sm:$0xff] %vm31_vm0, %v109_v13 }
  0xfc   :  { %v116_v16 = vld [vmem:[#allocation2] sm:$0xff] }
  0xfd   :  { %v125_v17 = vadd.f32 %v147_v15, %v116_v16 }
  0xfe   :  { %v117_v18 = vld [vmem:[#allocation2 + $0x8] sm:$0xff] }
  0xff   :  { %v150_v19 = vpack.c.bf16 %v125_v17, %v125_v17  ;;  %v126_v20 = vadd.f32 %v147_v15, %v117_v18 }
 0x101   :  { %136 = vst.msk [vmem:[%s259_s3] sm:$0xf] %vm135_vm3, %v150_v19  ;;  %v151_v21 = vpack.c.bf16 %v126_v20, %v126_v20 }
 0x103   :  { %137 = vst.msk [vmem:[%s259_s3 + $0x4] sm:$0xf] %vm135_vm3, %v151_v21 }
 0x104   :  { %142 = vsyncpa [#allocation4], 1 }

// kernel: _lambda_.77
= control target key start
LH: loop header
LB: loop body
LE: loop exit
PB: predicated region body
PF: predicated region fallthrough
CT: control target
= control target key end

     0   :  { %vm20_vm0 = vcmask 523264   ;;  %v211_v1 = vmov 0   ;;  %v212_v2 = vmov 0.0   ;;  %v147_v11 = vlaneseq  ;;  %s274_s1 = inlined_call_operand.vmem [shape: bf16[64,192], index: 1, kind: input, shape index: {}]   ;;  %s275_s0 = inlined_call_operand.vmem [shape: bf16[16,64], index: 0, kind: input, shape index: {}]   ;;  %s276_s2 = inlined_call_operand.vmem [shape: f32[1,192], index: 2, kind: input, shape index: {}]   ;;  %s277_s3 = inlined_call_operand.vmem [shape: bf16[16,192], index: 3, kind: output, shape index: {}]  }
   0x1   :  { %v198_v0 = vld [vmem:[%s274_s1 + $0x4] ss:$8 sps:$4 sm:$0xff]   ;;  %119 = vmatprep.mubr.bf16.mxu0 %v211_v1  ;;  %21 = vst.msk [vmem:[#allocation2 + $0x8] sm:$0xff] %vm20_vm0, %v212_v2  ;;  %23 = vst.msk [vmem:[#allocation2 + $0x18] sm:$0xff] %vm20_vm0, %v212_v2  ;;  %v200_v3 = vld [vmem:[%s274_s1] ss:$8 sps:$4 sm:$0xff]  }
   0x2   :  { %87 = vmatprep.subr.bf16.mxu0 %v198_v0  ;;  %v201_v4 = vld [vmem:[%s274_s1 + $0x14] ss:$8 sps:$4 sm:$0xff]   ;;  %v203_v5 = vld [vmem:[%s274_s1 + $0x10] ss:$8 sps:$4 sm:$0xff]   ;;  %v204_v6 = vld [vmem:[%s274_s1 + $0x24] ss:$8 sps:$4 sm:$0xff]  }
   0x3   :  { %88 = vmatpush1.bf16.msra.mxu0 %v200_v3  ;;  %v206_v7 = vld [vmem:[%s274_s1 + $0x20] ss:$8 sps:$4 sm:$0xff]   ;;  %v207_v8 = vld [vmem:[%s274_s1 + $0x34] ss:$8 sps:$4 sm:$0xff]   ;;  %v209_v9 = vld [vmem:[%s274_s1 + $0x30] ss:$8 sps:$4 sm:$0xff]  }
   0x4   :  { %89 = vmatprep.subr.bf16.mxu0 %v201_v4  ;;  %v210_v10 = vld [vmem:[%s275_s0] sm:$0xff]   ;;  %v148_v14 = vshrl.u32 %v147_v11, 7  ;;  %vm173_vm1 = vcmask 1043456   ;;  %vm174_vm2 = vcmask 523268  }
   0x5   :  { %v145_v23 = vld [vmem:[%s276_s2] sm:$0x3]  ;;  %vm175_vm3 = vmor %vm174_vm2, %vm173_vm1 }
   0x6   :  { %v149_v20 = vsub.s32 0, %v148_v14  ;;  %v153_v21 = vsub.s32 1, %v148_v14 }
   0x7   :  { %90 = vmatpush1.bf16.msra.mxu0 %v203_v5 }
   0x8   :  { %91 = vmatprep.subr.bf16.mxu0 %v204_v6  ;;  %v27_v12 = vld [vmem:[#allocation2 + $0x8] sm:$0xff]  ;;  %v29_v16 = vld [vmem:[#allocation2 + $0x18] sm:$0xff]  ;;  %v150_v24 = vrot.slane %v145_v23, %v149_v20  ;;  %v154_v25 = vrot.slane %v145_v23, %v153_v21 }
   0xb   :  { %92 = vmatpush1.bf16.msra.mxu0 %v206_v7 }
   0xc   :  { %93 = vmatprep.subr.bf16.mxu0 %v207_v8 }
   0xf   :  { %94 = vmatpush1.bf16.msra.mxu0 %v209_v9 }
  0x12   :  { %191 = vmatmul.mubr.msk.bf16.vlgmr.msra.gmra.mrb[0].mxu0 %vm20_vm0, %v210_v10 }
  0xe5   :  { %v121_v13 = vpop.f32.mrb[0].mxu0 }
  0xe6   :  { %v123_v15 = vpop.f32.mrb[1].mxu0  ;;  %v157_v27 = vadd.f32 %v150_v24, %v121_v13 }
  0xe7   :  { %v131_v17 = vadd.f32 %v123_v15, %v27_v12  ;;  %v125_v18 = vpop.f32.mrb[2].mxu0 }
  0xe8   :  { %v127_v19 = vpop.f32.mrb[3].mxu0  ;;  %v159_v31 = vadd.f32 %v150_v24, %v125_v18 }
  0xe9   :  { %135 = vst.msk [vmem:[#allocation2 + $0x8] sm:$0xff] %vm20_vm0, %v131_v17  ;;  %v133_v22 = vadd.f32 %v127_v19, %v29_v16 }
  0xeb   :  { %137 = vst.msk [vmem:[#allocation2 + $0x18] sm:$0xff] %vm20_vm0, %v133_v22 }
  0xf0   :  { %v142_v26 = vld [vmem:[#allocation2 + $0x8] sm:$0xff] }
  0xf1   :  { %v158_v28 = vadd.f32 %v154_v25, %v142_v26 }
  0xf2   :  { %v144_v29 = vld [vmem:[#allocation2 + $0x18] sm:$0xff] }
  0xf3   :  { %v194_v30 = vpack.c.bf16 %v158_v28, %v157_v27  ;;  %v160_v32 = vadd.f32 %v154_v25, %v144_v29 }
  0xf5   :  { %176 = vst.msk [vmem:[%s277_s3] sm:$0xff] %vm175_vm3, %v194_v30  ;;  %v195_v33 = vpack.c.bf16 %v160_v32, %v159_v31 }
  0xf7   :  { %177 = vst.msk [vmem:[%s277_s3 + $0x8] sm:$0xff] %vm175_vm3, %v195_v33 }

// kernel: _lambda_.79
= control target key start
LH: loop header
LB: loop body
LE: loop exit
PB: predicated region body
PF: predicated region fallthrough
CT: control target
= control target key end

     0   :  { %vm19_vm0 = vcmask 523264   ;;  %v223_v1 = vmov 0.0   ;;  %vm172_vm1 = vcmask 519168   ;;  %s287_s1 = inlined_call_operand.vmem [shape: bf16[64,64], index: 1, kind: input, shape index: {}]   ;;  %s288_s0 = inlined_call_operand.vmem [shape: bf16[32,64], index: 0, kind: input, shape index: {}]   ;;  %s289_s2 = inlined_call_operand.vmem [shape: f32[1,64], index: 2, kind: input, shape index: {}]   ;;  %s290_s3 = inlined_call_operand.vmem [shape: bf16[32,64], index: 3, kind: output, shape index: {}]  }
   0x1   :  { %v217_v0 = vld [vmem:[%s287_s1] sm:$0xff]   ;;  %22 = vst.msk [vmem:[#allocation2 + $0x10] sm:$0xff] %vm19_vm0, %v223_v1  ;;  %20 = vst.msk [vmem:[#allocation2] sm:$0xff] %vm19_vm0, %v223_v1  ;;  %v218_v2 = vld [vmem:[%s287_s1 + $0x8] sm:$0xff]  }
   0x2   :  { %21 = vst.msk [vmem:[#allocation2 + $0x8] sm:$0xff] %vm19_vm0, %v223_v1  ;;  %23 = vst.msk [vmem:[#allocation2 + $0x18] sm:$0xff] %vm19_vm0, %v223_v1  ;;  %204 = vmatprep.subr.bf16.mxu0 %v217_v0  ;;  %v219_v3 = vld [vmem:[%s287_s1 + $0x10] sm:$0xff]   ;;  %v221_v4 = vld [vmem:[%s288_s0] sm:$0xff]  }
   0x3   :  { %205 = vmatpush3.bf16.msra.mxu0 %v217_v0  ;;  %212 = vmatprep.mubr.msk.bf16.mxu0 %vm19_vm0, %v221_v4  ;;  %v220_v5 = vld [vmem:[%s287_s1 + $0x18] sm:$0xff]   ;;  %v222_v6 = vld [vmem:[%s288_s0 + $0x8] sm:$0xff]   ;;  %v189_v19 = vld [vmem:[%s289_s2] ss:$0 sm:$0xff] }
   0x4   :  { %206 = vmatprep.subr.bf16.mxu0 %v218_v2 }
   0x7   :  { %207 = vmatpush3.bf16.msra.mxu0 %v218_v2 }
   0x8   :  { %208 = vmatprep.subr.bf16.mxu0 %v219_v3  ;;  %v30_v7 = vld [vmem:[#allocation2 + $0x10] sm:$0xff]  ;;  %v28_v8 = vld [vmem:[#allocation2] sm:$0xff] }
   0x9   :  { %v31_v10 = vld [vmem:[#allocation2 + $0x18] sm:$0xff]  ;;  %v29_v13 = vld [vmem:[#allocation2 + $0x8] sm:$0xff] }
   0xb   :  { %209 = vmatpush3.bf16.msra.mxu0 %v219_v3 }
   0xc   :  { %210 = vmatprep.subr.bf16.mxu0 %v220_v5 }
   0xf   :  { %211 = vmatpush3.bf16.msra.mxu0 %v220_v5 }
  0x12   :  { %213 = vmatmul.mubr.msk.bf16.vlgmr.msra.gmra.mrb[0].mxu0 %vm19_vm0, %v222_v6 }
  0xe5   :  { %v214_v9 = vpop.f32.mrb[0].mxu0 }
  0xe6   :  { %v132_v11 = vadd.f32 %v214_v9, %v30_v7  ;;  %v115_v12 = vpop.f32.mrb[1].mxu0 }
  0xe7   :  { %v130_v14 = vadd.f32 %v115_v12, %v28_v8  ;;  %v215_v15 = vpop.f32.mrb[2].mxu0 }
  0xe8   :  { %136 = vst.msk [vmem:[#allocation2 + $0x10] sm:$0xff] %vm19_vm0, %v132_v11  ;;  %v133_v16 = vadd.f32 %v215_v15, %v31_v10  ;;  %v118_v17 = vpop.f32.mrb[3].mxu0 }
  0xe9   :  { %134 = vst.msk [vmem:[#allocation2] sm:$0xff] %vm19_vm0, %v130_v14  ;;  %v131_v18 = vadd.f32 %v118_v17, %v29_v13 }
  0xea   :  { %137 = vst.msk [vmem:[#allocation2 + $0x18] sm:$0xff] %vm19_vm0, %v133_v16 }
  0xeb   :  { %135 = vst.msk [vmem:[#allocation2 + $0x8] sm:$0xff] %vm19_vm0, %v131_v18 }
  0xef   :  { %v143_v20 = vld [vmem:[#allocation2 + $0x10] sm:$0xff] }
  0xf0   :  { %v154_v21 = vadd.f32 %v189_v19, %v143_v20  ;;  %v141_v22 = vld [vmem:[#allocation2] sm:$0xff] }
  0xf1   :  { %v152_v23 = vadd.f32 %v189_v19, %v141_v22  ;;  %v144_v24 = vld [vmem:[#allocation2 + $0x18] sm:$0xff] }
  0xf2   :  { %v196_v25 = vpack.c.bf16 %v154_v21, %v154_v21  ;;  %v155_v26 = vadd.f32 %v189_v19, %v144_v24  ;;  %v142_v27 = vld [vmem:[#allocation2 + $0x8] sm:$0xff] }
  0xf3   :  { %v194_v28 = vpack.c.bf16 %v152_v23, %v152_v23  ;;  %v153_v29 = vadd.f32 %v189_v19, %v142_v27 }
  0xf4   :  { %175 = vst.msk [vmem:[%s290_s3 + $0x8] sm:$0xf] %vm172_vm1, %v196_v25  ;;  %v197_v30 = vpack.c.bf16 %v155_v26, %v155_v26 }
  0xf5   :  { %173 = vst.msk [vmem:[%s290_s3] sm:$0xf] %vm172_vm1, %v194_v28  ;;  %v195_v31 = vpack.c.bf16 %v153_v29, %v153_v29 }
  0xf6   :  { %176 = vst.msk [vmem:[%s290_s3 + $0xc] sm:$0xf] %vm172_vm1, %v197_v30 }
  0xf7   :  { %174 = vst.msk [vmem:[%s290_s3 + $0x4] sm:$0xf] %vm172_vm1, %v195_v31 }

// kernel: _lambda_.78
= control target key start
LH: loop header
LB: loop body
LE: loop exit
PB: predicated region body
PF: predicated region fallthrough
CT: control target
= control target key end

     0   :  { %s1288_s12 = smov 0   ;;  %s1290_s13 = smov 0   ;;  %s1502_s0 = inlined_call_operand.vmem [shape: bf16[2,24,64], index: 0, kind: input, shape index: {}]   ;;  %s1503_s1 = inlined_call_operand.vmem [shape: bf16[2,24,64], index: 1, kind: input, shape index: {}]   ;;  %s1504_s2 = inlined_call_operand.vmem [shape: bf16[2,24,64], index: 2, kind: input, shape index: {}]   ;;  %s1505_s3 = inlined_call_operand.vmem [shape: bf16[2,24,64], index: 3, kind: output, shape index: {}]  }
   0x1   :  { %s1292_s14 = smov 0  }
   0x2 LB: > { %s32_s15 = sadd.s32 1, %s1257_s13  ;;  %p1066_p0 = scmp.ge.s32.totalorder %s1261_s14, 1  ;;  %s1261_s14 = sphi %s1292_s14, %s13_s14   ;;  %s1257_s13 = sphi %s1290_s13, %s1507_s13   ;;  %s1253_s12 = sphi %s1288_s12, %s1506_s12  }
   0x3   : > { %p34_p1 = scmp.ge.s32.totalorder %s32_s15, 2  ;;  %p199_p2 = scmp.lt.s32.totalorder %s1261_s14, 3 }
   0x5   : > { %s1509_s15 = smov (%p34_p1, %s32_s15), 0  ;;  %p200_p3 = pnand %p1066_p0, %p199_p2 }
   0x6   : > { %p250_p4 = scmp.lt.s32.totalorder (!%p200_p3), %s1253_s12, 1  ;;  %vm307_vm0 = vcmask (!%p200_p3), 261120   ;;  %vm294_vm1 = vcmask (!%p200_p3), 7168   ;;  %v1263_v14 = vmov (!%p200_p3), -1e+30   ;;  %vm403_vm2 = vcmask (!%p200_p3), 195584  }
   0x7   : > { %203 = sbr.rel (%p200_p3) target bundleno = 1479 (0x5c7), region = 32  ;;  %297 = vst.msk [vmem:[#allocation2 + $0x10] sm:$0xff] (!%p200_p3), %vm294_vm1, %v1263_v14  ;;  %295 = vst.msk [vmem:[#allocation2] sm:$0xff] (!%p200_p3), %vm294_vm1, %v1263_v14  ;;  %v1264_v22 = vmov (!%p200_p3), 0   ;;  %v1265_v23 = vmov (!%p200_p3), 0.0   ;;  %s1266_s26 = smov (!%p200_p3), 96  }
   0x8   : > { %296 = vst.msk [vmem:[#allocation2 + $0x8] sm:$0xff] (!%p200_p3), %vm294_vm1, %v1263_v14  ;;  %298 = vst.msk [vmem:[#allocation2 + $0x18] sm:$0xff] (!%p200_p3), %vm294_vm1, %v1263_v14  ;;  %1193 = vset.pattern.permute.xlu1 (!%p200_p3), %v1264_v22  ;;  %1194 = vset.pattern.permute.xlu0 (!%p200_p3), %v1264_v22  ;;  %vm509_vm3 = vcmask (!%p200_p3), 1043456   ;;  %s1267_s27 = smov (!%p200_p3), 32   ;;  %vm882_vm4 = vcmask (!%p200_p3), 257024   ;;  %vm932_vm5 = vcmask (!%p200_p3), 519424  }
   0x9   : > { %299 = vst.msk [vmem:[#allocation2 + $0x20] sm:$0xff] (!%p200_p3), %vm294_vm1, %v1263_v14  ;;  %300 = vst.msk [vmem:[#allocation2 + $0x28] sm:$0xff] (!%p200_p3), %vm294_vm1, %v1263_v14 }
   0xa   : > { %304 = vst.msk [vmem:[#allocation3 + $0x18] sm:$0xff] (!%p200_p3), %vm294_vm1, %v1265_v23  ;;  %301 = vst.msk [vmem:[#allocation3] sm:$0xff] (!%p200_p3), %vm294_vm1, %v1265_v23 }
   0xb   : > { %302 = vst.msk [vmem:[#allocation3 + $0x8] sm:$0xff] (!%p200_p3), %vm294_vm1, %v1265_v23  ;;  %303 = vst.msk [vmem:[#allocation3 + $0x10] sm:$0xff] (!%p200_p3), %vm294_vm1, %v1265_v23 }
   0xc   : > { %305 = vst.msk [vmem:[#allocation3 + $0x20] sm:$0xff] (!%p200_p3), %vm294_vm1, %v1265_v23  ;;  %306 = vst.msk [vmem:[#allocation3 + $0x28] sm:$0xff] (!%p200_p3), %vm294_vm1, %v1265_v23 }
   0xd   : > { %308 = vst.msk [vmem:[#allocation4] sm:$0xff] (!%p200_p3), %vm307_vm0, %v1265_v23  ;;  %309 = vst.msk [vmem:[#allocation4 + $0x8] sm:$0xff] (!%p200_p3), %vm307_vm0, %v1265_v23 }
   0xe   : > { %s1511_s12 = smov (!%p250_p4, %s1253_s12), 1  ;;  %310 = vst.msk [vmem:[#allocation4 + $0x10] sm:$0xff] %vm307_vm0, %v1265_v23  ;;  %311 = vst.msk [vmem:[#allocation4 + $0x18] sm:$0xff] %vm307_vm0, %v1265_v23  ;;  %v1363_v24 = vld [vmem:[#allocation2 + $0x10] sm:$0xff]  ;;  %v1365_v25 = vld [vmem:[#allocation2] sm:$0xff] }
   0xf   : > { %s1306_s16 = smul.u32 12, %s1511_s12  ;;  %312 = vst.msk [vmem:[#allocation4 + $0x20] sm:$0xff] %vm307_vm0, %v1265_v23  ;;  %313 = vst.msk [vmem:[#allocation4 + $0x28] sm:$0xff] %vm307_vm0, %v1265_v23  ;;  %v1377_v31 = vld [vmem:[#allocation2 + $0x8] sm:$0xff] }
  0x10   : > { %v667_v14 = vld [vmem:[#allocation2 + $0x20] sm:$0xff] }
  0x11   : > { %s1312_s19 = scalar_lea.vmem %s1503_s1, %s1306_s16  ;;  %s1318_s22 = scalar_lea.vmem %s1502_s0, %s1306_s16 }
  0x12   : > { %v1195_v0 = vld [vmem:[%s1312_s19] sm:$0xff]   ;;  %v1196_v1 = vld [vmem:[%s1312_s19 + $0x8] ss:$0 sps:$4 sm:$0xff]   ;;  %s1400_s25 = scalar_lea.vmem %s1504_s2, %s1306_s16  ;;  %s287_s30 = scalar_lea.vmem %s1505_s3, %s1306_s16 }
  0x13   : > { %v1102_v2 = vld [vmem:[%s1318_s22] sm:$0xff]   ;;  %1157 = vmatprep.subr.msk.bf16.mxu0 %vm307_vm0, %v1195_v0  ;;  %v347_v3 = vsel %vm307_vm0, %v1195_v0, 0  ;;  %v316_v6 = vld [vmem:[%s1318_s22 + $0x8] sm:$0xf]  ;;  %v350_v11 = vsel %vm307_vm0, %v1196_v1, 0 }
  0x14   : > { %v1103_v4 = vunpack.c.l.bf16 %v1102_v2  ;;  %v1104_v5 = vunpack.c.h.bf16 %v1102_v2  ;;  %1126 = vmatpush3.bf16.xpose.msra.mxu0 %v347_v3  ;;  %v319_v10 = vunpack.c.l.bf16 %v316_v6  ;;  %v1197_v36 = vld [vmem:[%s1312_s19] sm:$0xff]   ;;  %v572_v37 = vld [vmem:[%s1318_s22 + $0x8] sm:$0xf] }
  0x15   : > { %1158 = vmatprep.subr.msk.bf16.mxu0 %vm307_vm0, %v1196_v1  ;;  %v1198_v38 = vld [vmem:[%s1312_s19 + $0x8] ss:$0 sps:$4 sm:$0xff]   ;;  %v1199_v39 = vld [vmem:[%s1400_s25] sm:$0xff]   ;;  %v575_v40 = vunpack.c.l.bf16 %v572_v37 }
  0x16   : > { %v320_v7 = vmul.f32 0.17677669, %v1103_v4  ;;  %v321_v8 = vmul.f32 0.17677669, %v1104_v5  ;;  %v322_v12 = vmul.f32 0.17677669, %v319_v10  ;;  %1133 = vmatprep.subr.bf16.mxu1 %v1199_v39 }
  0x17   : > { %v1200_v41 = vld [vmem:[%s1400_s25 + $0x8] ss:$0 sps:$4 sm:$0xff]   ;;  %1134 = vmatpush3.bf16.msra.mxu1 %v1199_v39  ;;  %v578_v43 = vmul.f32 0.17677669, %v575_v40 }
  0x18   : > { %v1327_v9 = vpack.c.bf16 %v321_v8, %v320_v7  ;;  %v330_v13 = vpack.c.bf16 %v322_v12, %v322_v12  ;;  %1159 = vmatprep.subr.msk.bf16.mxu1 %vm509_vm3, %v1200_v41  ;;  %v511_v42 = vsel %vm509_vm3, %v1200_v41, 0  ;;  %v1441_v12 = vld [vmem:[#allocation2 + $0x18] sm:$0xff]  ;;  %v1202_v23 = vld [vmem:[%s1400_s25 + $0x8] ss:$0 sps:$4 sm:$0xff]  }
  0x19   : > { %v586_v44 = vpack.c.bf16 %v578_v43, %v578_v43 }
  0x1a   : > { %1129 = vmatprep.mubr.msk.bf16.mxu0 %vm307_vm0, %v1327_v9 }
  0x1b   : > { %1136 = vmatpush3.bf16.msra.mxu1 %v511_v42 }
  0x1c   : > { %1128 = vmatpush3.bf16.xpose.msra.mxu0 %v350_v11 }
  0x23   : > { %1130 = vmatmul.mubr.msk.bf16.vlgmr.msra.gmra.mrb[0].mxu0 %vm307_vm0, %v330_v13 }
  0xf6   : > { %v1339_v15 = vpop.f32.mrb[0].mxu0 }
  0xf7   : > { %v1341_v16 = vpop.f32.mrb[1].mxu0  ;;  %v410_v17 = vsel %vm403_vm2, %v1339_v15, -inf }
  0xf8   : > { %411 = vmax.xlane.f32.xlu1 %v410_v17  ;;  %v1132_v18 = vpop.f32.mrb[2].mxu0  ;;  %v404_v19 = vsel %vm403_vm2, %v1341_v16, -inf  ;;  %v668_v17 = vld [vmem:[#allocation2 + $0x28] sm:$0xff] }
  0xf9   : > { %405 = vmax.xlane.f32.xlu0 %v404_v19  ;;  %v1347_v20 = vpop.f32.mrb[3].mxu0 }
  0xfa   : > { %v407_v21 = vsel %vm403_vm2, %v1347_v20, -inf }
  0xfd   : > { %408 = vmax.xlane.f32.xlu0 %v407_v21 }
 0x185   : > { %v412_v26 = vpop.xlane.xlu1 %411 }
 0x186   : > { %v1368_v27 = vmax.f32 %v1363_v24, %v412_v26  ;;  %v406_v28 = vpop.xlane.xlu0 %405 }
 0x187   : > { %v1371_v29 = vmax.f32 %v1365_v25, %v406_v28  ;;  %v1201_v28 = vld [vmem:[%s1400_s25] sm:$0xff]  }
 0x188   : > { %v418_v30 = vsub.f32 %v1363_v24, %v1368_v27  ;;  %569 = vst.msk [vmem:[#allocation2 + $0x10] sm:$0xff] %vm294_vm1, %v1368_v27 }
 0x189   : > { %v416_v32 = vsub.f32 %v1365_v25, %v1371_v29  ;;  %567 = vst.msk [vmem:[#allocation2] sm:$0xff] %vm294_vm1, %v1371_v29  ;;  %427 = vperm.xlu1 %1193, %v1371_v29  }
 0x18a   : > { %v409_v33 = vpop.xlane.xlu0 %408 }
 0x18b   : > { %v1385_v34 = vmax.f32 %v1377_v31, %v409_v33 }
 0x18d   : > { %v417_v35 = vsub.f32 %v1377_v31, %v1385_v34  ;;  %568 = vst.msk [vmem:[#allocation2 + $0x8] sm:$0xff] %vm294_vm1, %v1385_v34  ;;  %437 = vperm.xlu1 %1193, %v1368_v27   ;;  %432 = vperm.xlu0 %1194, %v1385_v34   ;;  %v451_v31 = vld [vmem:[#allocation3 + $0x10] sm:$0xff] }
 0x191   : > { %601 = vrot.lane.b32.xlu1 %v1197_v36, %s1266_s26 }
 0x195   : > { %603 = vrot.lane.b32.xlu1 %v1198_v38, %s1266_s26 }
 0x199   : > { %589 = vrot.lane.b32.xlu1 %v1327_v9, %s1266_s26 }
 0x19d   : > { %591 = vrot.lane.b32.xlu1 %v586_v44, %s1266_s26 }
 0x208   : > { %v428_v45 = vpop.permute.xlu1 %427 }
 0x209   : > { %v440_v46 = vsub.f32 %v1341_v16, %v428_v45 }
 0x20b   : > { %v443_v47 = vmul.f32 1.442695, %v440_v46 }
 0x20c   : > { %v438_v48 = vpop.permute.xlu1 %437  ;;  %v433_v49 = vpop.permute.xlu0 %432 }
 0x20d   : > { %v442_v50 = vsub.f32 %v1339_v15, %v438_v48  ;;  %v441_v51 = vsub.f32 %v1347_v20, %v433_v49  ;;  %1203 = vpow2.f32 %v443_v47 }
 0x20f   : > { %v447_v52 = vmul.f32 1.442695, %v442_v50  ;;  %v445_v53 = vmul.f32 1.442695, %v441_v51 }
 0x210   : > { %v602_v54 = vpop.permute.xlu1 %601 }
 0x211   : > { %1205 = vpow2.f32 %v447_v52  ;;  %1160 = vmatprep.subr.msk.bf16.mxu1 %vm307_vm0, %v602_v54  ;;  %v612_v61 = vsel %vm307_vm0, %v602_v54, 0 }
 0x212   : > { %1207 = vpow2.f32 %v445_v53 }
 0x214   : > { %v604_v55 = vpop.permute.xlu1 %603 }
 0x215   : > { %v615_v63 = vsel %vm307_vm0, %v604_v55, 0 }
 0x217   : > { %v1415_v56 = vpop.eup %1203 }
 0x218   : > { %v590_v62 = vpop.permute.xlu1 %589  ;;  %v455_v53 = vsel %vm403_vm2, %v1415_v56, 0.0 }
 0x21b   : > { %v1417_v57 = vpop.eup %1205 }
 0x21c   : > { %v1419_v58 = vpop.eup %1207  ;;  %v493_v59 = vpack.c.bf16 %v1417_v57, %v1417_v57  ;;  %v592_v0 = vpop.permute.xlu1 %591 }
 0x21d   : > { %v492_v60 = vpack.c.bf16 %v1419_v58, %v1415_v56 }
 0x21f   : > { %1137 = vmatprep.mubr.msk.bf16.mxu1 %vm403_vm2, %v492_v60  ;;  %v458_v60 = vsel %vm403_vm2, %v1419_v58, 0.0  ;;  %v423_v58 = vmul.f32 1.442695, %v418_v30 }
 0x220   : > { %1138 = vmatmul.mubr.msk.bf16.vlgmr.msra.gmra.mrb[0].mxu1 %vm403_vm2, %v493_v59  ;;  %v461_v59 = vsel %vm403_vm2, %v1417_v57, 0.0  ;;  %v419_v57 = vmul.f32 1.442695, %v416_v32  ;;  %v717_v32 = vld [vmem:[#allocation3 + $0x28] sm:$0xff] }
 0x221   : > { %1142 = vmatpush3.bf16.xpose.msra.mxu1 %v612_v61  ;;  %1145 = vmatprep.mubr.msk.bf16.mxu1 %vm307_vm0, %v590_v62 }
 0x222   : > { %1161 = vmatprep.subr.msk.bf16.mxu1 %vm307_vm0, %v604_v55 }
 0x229   : > { %1144 = vmatpush3.bf16.xpose.msra.mxu1 %v615_v63 }
 0x230   : > { %1146 = vmatmul.mubr.msk.bf16.vlgmr.msra.gmra.mrb[4].mxu1 %vm307_vm0, %v592_v0 }
 0x2f3   : > { %v1432_v1 = vpop.f32.mrb[0].mxu1 }
 0x2f4   : > { %v1434_v2 = vpop.f32.mrb[1].mxu1 }
 0x2f5   : > { %v1140_v3 = vpop.f32.mrb[2].mxu1 }
 0x2f6   : > { %v1436_v4 = vpop.f32.mrb[3].mxu1 }
 0x303   : > { %v1147_v5 = vpop.f32.mrb[4].mxu1 }
 0x304   : > { %v651_v6 = vpop.f32.mrb[5].mxu1  ;;  %v675_v11 = vsel %vm403_vm2, %v1147_v5, -inf }
 0x305   : > { %v1148_v7 = vpop.f32.mrb[6].mxu1  ;;  %v669_v8 = vsel %vm403_vm2, %v651_v6, -inf }
 0x306   : > { %670 = vmax.xlane.f32.xlu1 %v669_v8  ;;  %v654_v9 = vpop.f32.mrb[7].mxu1  ;;  %v716_v7 = vld [vmem:[#allocation3 + $0x20] sm:$0xff] }
 0x307   : > { %v672_v10 = vsel %vm403_vm2, %v654_v9, -inf }
 0x308   : > { %673 = vmax.xlane.f32.xlu0 %v672_v10 }
 0x30a   : > { %676 = vmax.xlane.f32.xlu1 %v675_v11  ;;  %v449_v11 = vld [vmem:[#allocation3] sm:$0xff] }
 0x393   : > { %v671_v13 = vpop.xlane.xlu1 %670 }
 0x394   : > { %v678_v15 = vmax.f32 %v1441_v12, %v671_v13 }
 0x395   : > { %v674_v16 = vpop.xlane.xlu0 %673 }
 0x396   : > { %v681_v18 = vsub.f32 %v1441_v12, %v678_v15  ;;  %836 = vst.msk [vmem:[#allocation2 + $0x18] sm:$0xff] %vm294_vm1, %v678_v15  ;;  %v679_v19 = vmax.f32 %v667_v14, %v674_v16  ;;  %692 = vperm.xlu1 %1193, %v678_v15   ;;  %v450_v16 = vld [vmem:[#allocation3 + $0x8] sm:$0xff] }
 0x397   : > { %v677_v20 = vpop.xlane.xlu1 %676 }
 0x398   : > { %v682_v21 = vsub.f32 %v667_v14, %v679_v19  ;;  %837 = vst.msk [vmem:[#allocation2 + $0x20] sm:$0xff] %vm294_vm1, %v679_v19  ;;  %v680_v22 = vmax.f32 %v668_v17, %v677_v20  ;;  %697 = vperm.xlu0 %1194, %v679_v19   ;;  %v684_v63 = vmul.f32 1.442695, %v681_v18 }
 0x39a   : > { %v683_v26 = vsub.f32 %v668_v17, %v680_v22  ;;  %838 = vst.msk [vmem:[#allocation2 + $0x28] sm:$0xff] %vm294_vm1, %v680_v22  ;;  %702 = vperm.xlu1 %1193, %v680_v22   ;;  %v686_v61 = vmul.f32 1.442695, %v682_v21 }
 0x39c   : > { %770 = vrot.lane.b32.xlu0 %v1202_v23, %s1266_s26  ;;  %v688_v62 = vmul.f32 1.442695, %v683_v26 }
 0x39e   : > { %768 = vrot.lane.b32.xlu1 %v1201_v28, %s1266_s26 }
 0x415   : > { %v693_v33 = vpop.permute.xlu1 %692 }
 0x416   : > { %v705_v36 = vsub.f32 %v651_v6, %v693_v33  ;;  %v715_v6 = vld [vmem:[#allocation3 + $0x18] sm:$0xff] }
 0x417   : > { %v698_v37 = vpop.permute.xlu0 %697 }
 0x418   : > { %v708_v38 = vmul.f32 1.442695, %v705_v36  ;;  %v706_v39 = vsub.f32 %v654_v9, %v698_v37 }
 0x419   : > { %v703_v40 = vpop.permute.xlu1 %702 }
 0x41a   : > { %1209 = vpow2.f32 %v708_v38  ;;  %v710_v41 = vmul.f32 1.442695, %v706_v39  ;;  %v707_v42 = vsub.f32 %v1147_v5, %v703_v40  ;;  %v421_v5 = vmul.f32 1.442695, %v417_v35 }
 0x41b   : > { %v771_v45 = vpop.permute.xlu0 %770 }
 0x41c   : > { %1211 = vpow2.f32 %v710_v41  ;;  %v712_v43 = vmul.f32 1.442695, %v707_v42  ;;  %v780_v46 = vsel %vm509_vm3, %v771_v45, 0 }
 0x41d   : > { %v769_v44 = vpop.permute.xlu1 %768 }
 0x41e   : > { %1213 = vpow2.f32 %v712_v43  ;;  %1149 = vmatprep.subr.bf16.mxu0 %v769_v44 }
 0x41f   : > { %1150 = vmatpush3.bf16.msra.mxu0 %v769_v44  ;;  %1215 = vpow2.f32 %v686_v61 }
 0x420   : > { %1162 = vmatprep.subr.msk.bf16.mxu0 %vm509_vm3, %v771_v45  ;;  %1217 = vpow2.f32 %v688_v62 }
 0x421   : > { %1219 = vpow2.f32 %v684_v63 }
 0x422   : > { %1221 = vpow2.f32 %v419_v57 }
 0x423   : > { %1152 = vmatpush3.bf16.msra.mxu0 %v780_v46  ;;  %1223 = vpow2.f32 %v423_v58  ;;  %v739_v46 = vld [vmem:[#allocation4 + $0x28] sm:$0xff] }
 0x424   : > { %v1210_v47 = vpop.eup %1209  ;;  %1225 = vpow2.f32 %v421_v5 }
 0x425   : > { %v721_v48 = vsel %vm403_vm2, %v1210_v47, 0.0 }
 0x426   : > { %v1212_v49 = vpop.eup %1211  ;;  %722 = vadd.xlane.f32.xlu1 %v721_v48  ;;  %v737_v48 = vld [vmem:[#allocation4 + $0x18] sm:$0xff] }
 0x427   : > { %v724_v50 = vsel %vm403_vm2, %v1212_v49, 0.0  ;;  %v758_v51 = vpack.c.bf16 %v1212_v49, %v1210_v47 }
 0x428   : > { %v1214_v52 = vpop.eup %1213  ;;  %725 = vadd.xlane.f32.xlu0 %v724_v50  ;;  %v738_v50 = vld [vmem:[#allocation4 + $0x20] sm:$0xff] }
 0x429   : > { %1153 = vmatprep.mubr.msk.bf16.mxu0 %vm403_vm2, %v758_v51  ;;  %v759_v54 = vpack.c.bf16 %v1214_v52, %v1214_v52  ;;  %v727_v55 = vsel %vm403_vm2, %v1214_v52, 0.0  ;;  %v1216_v56 = vpop.eup %1215 }
 0x42a   : > { %456 = vadd.xlane.f32.xlu1 %v455_v53  ;;  %v1218_v0 = vpop.eup %1217  ;;  %v719_v25 = vmul.f32 %v1216_v56, %v716_v7  ;;  %v471_v7 = vld [vmem:[#allocation4] sm:$0xff] }
 0x42b   : > { %1154 = vmatmul.mubr.msk.bf16.vlgmr.msra.gmra.mrb[4].mxu0 %vm403_vm2, %v759_v54  ;;  %v1220_v3 = vpop.eup %1219  ;;  %v720_v35 = vmul.f32 %v1218_v0, %v717_v32  ;;  %v472_v32 = vld [vmem:[#allocation4 + $0x8] sm:$0xff] }
 0x42c   : > { %728 = vadd.xlane.f32.xlu0 %v727_v55  ;;  %v718_v8 = vmul.f32 %v1220_v3, %v715_v6  ;;  %v1222_v9 = vpop.eup %1221 }
 0x42d   : > { %v452_v27 = vmul.f32 %v1222_v9, %v449_v11  ;;  %v1224_v30 = vpop.eup %1223 }
 0x42e   : > { %462 = vadd.xlane.f32.xlu1 %v461_v59  ;;  %v1226_v14 = vpop.eup %1225  ;;  %v454_v18 = vmul.f32 %v1224_v30, %v451_v31 }
 0x42f   : > { %v453_v21 = vmul.f32 %v1226_v14, %v450_v16 }
 0x430   : > { %459 = vadd.xlane.f32.xlu0 %v458_v60 }
 0x43f   : > { %747 = vperm.xlu1 %1193, %v1216_v56  }
 0x443   : > { %752 = vperm.xlu1 %1193, %v1218_v0  }
 0x446   : > { %742 = vperm.xlu0 %1194, %v1220_v3  }
 0x4b3   : > { %v723_v10 = vpop.xlane.xlu1 %722 }
 0x4b4   : > { %v730_v12 = vadd.f32 %v723_v10, %v718_v8 }
 0x4b5   : > { %v726_v29 = vpop.xlane.xlu0 %725 }
 0x4b6   : > { %733 = vst.msk [vmem:[#allocation3 + $0x18] sm:$0xff] %vm294_vm1, %v730_v12  ;;  %v731_v24 = vadd.f32 %v726_v29, %v719_v25  ;;  %v473_v29 = vld [vmem:[#allocation4 + $0x10] sm:$0xff] }
 0x4b7   : > { %v457_v13 = vpop.xlane.xlu1 %456 }
 0x4b8   : > { %734 = vst.msk [vmem:[#allocation3 + $0x20] sm:$0xff] %vm294_vm1, %v731_v24  ;;  %v464_v34 = vadd.f32 %v457_v13, %v452_v27 }
 0x4b9   : > { %v729_v15 = vpop.xlane.xlu0 %728 }
 0x4ba   : > { %468 = vst.msk [vmem:[#allocation3] sm:$0xff] %vm294_vm1, %v464_v34  ;;  %v732_v17 = vadd.f32 %v729_v15, %v720_v35 }
 0x4bb   : > { %v463_v19 = vpop.xlane.xlu1 %462 }
 0x4bc   : > { %735 = vst.msk [vmem:[#allocation3 + $0x28] sm:$0xff] %vm294_vm1, %v732_v17  ;;  %v466_v20 = vadd.f32 %v463_v19, %v454_v18 }
 0x4bd   : > { %v460_v22 = vpop.xlane.xlu0 %459  ;;  %v886_v23 = vld [vmem:[#allocation3 + $0x18] sm:$0xff] }
 0x4be   : > { %470 = vst.msk [vmem:[#allocation3 + $0x10] sm:$0xff] %vm294_vm1, %v466_v20  ;;  %v465_v26 = vadd.f32 %v460_v22, %v453_v21  ;;  %1227 = vrcp.f32 %v886_v23 }
 0x4bf   : > { %v887_v28 = vld [vmem:[#allocation3 + $0x20] sm:$0xff]  ;;  %v748_v45 = vpop.permute.xlu1 %747 }
 0x4c0   : > { %469 = vst.msk [vmem:[#allocation3 + $0x8] sm:$0xff] %vm294_vm1, %v465_v26  ;;  %1229 = vrcp.f32 %v887_v28  ;;  %v756_v59 = vmul.f32 %v748_v45, %v738_v50 }
 0x4c1   : > { %v842_v37 = vld [vmem:[#allocation3] sm:$0xff] }
 0x4c3   : > { %v888_v33 = vld [vmem:[#allocation3 + $0x28] sm:$0xff]  ;;  %v753_v47 = vpop.permute.xlu1 %752 }
 0x4c4   : > { %1231 = vrcp.f32 %v888_v33  ;;  %v757_v51 = vmul.f32 %v753_v47, %v739_v46 }
 0x4c5   : > { %1233 = vrcp.f32 %v842_v37  ;;  %v844_v40 = vld [vmem:[#allocation3 + $0x10] sm:$0xff]  ;;  %v743_v49 = vpop.permute.xlu0 %742 }
 0x4c6   : > { %v755_v52 = vmul.f32 %v743_v49, %v737_v48 }
 0x4c7   : > { %v843_v38 = vld [vmem:[#allocation3 + $0x8] sm:$0xff] }
 0x4c8   : > { %v1228_v36 = vpop.eup %1227  ;;  %1235 = vrcp.f32 %v843_v38 }
 0x4c9   : > { %897 = vperm.xlu0 %1194, %v1228_v36   ;;  %1237 = vrcp.f32 %v844_v40 }
 0x4ca   : > { %v1230_v39 = vpop.eup %1229 }
 0x4cb   : > { %902 = vperm.xlu1 %1193, %v1230_v39  }
 0x4ce   : > { %v1232_v41 = vpop.eup %1231 }
 0x4cf   : > { %476 = vperm.xlu1 %1193, %v1222_v9   ;;  %907 = vperm.xlu0 %1194, %v1232_v41   ;;  %v1234_v42 = vpop.eup %1233 }
 0x4d2   : > { %v1236_v43 = vpop.eup %1235 }
 0x4d3   : > { %486 = vperm.xlu1 %1193, %v1224_v30   ;;  %481 = vperm.xlu0 %1194, %v1226_v14   ;;  %v1238_v44 = vpop.eup %1237 }
 0x4d7   : > { %853 = vperm.xlu0 %1194, %v1234_v42   ;;  %858 = vperm.xlu1 %1193, %v1236_v43  }
 0x4db   : > { %863 = vperm.xlu0 %1194, %v1238_v44  }
 0x4fe   : > { %v1155_v53 = vpop.f32.mrb[4].mxu0 }
 0x4ff   : > { %v832_v54 = vadd.f32 %v1155_v53, %v757_v51  ;;  %v816_v55 = vpop.f32.mrb[5].mxu0 }
 0x500   : > { %v830_v60 = vadd.f32 %v816_v55, %v755_v52  ;;  %v1156_v61 = vpop.f32.mrb[6].mxu0 }
 0x501   : > { %835 = vst.msk [vmem:[#allocation4 + $0x28] sm:$0xff] %vm307_vm0, %v832_v54  ;;  %v819_v62 = vpop.f32.mrb[7].mxu0 }
 0x502   : > { %833 = vst.msk [vmem:[#allocation4 + $0x18] sm:$0xff] %vm307_vm0, %v830_v60  ;;  %v831_v63 = vadd.f32 %v819_v62, %v756_v59 }
 0x504   : > { %834 = vst.msk [vmem:[#allocation4 + $0x20] sm:$0xff] %vm307_vm0, %v831_v63 }
 0x508   : > { %v894_v10 = vld [vmem:[#allocation4 + $0x28] sm:$0xff] }
 0x509   : > { %v892_v56 = vld [vmem:[#allocation4 + $0x18] sm:$0xff] }
 0x50b   : > { %v893_v57 = vld [vmem:[#allocation4 + $0x20] sm:$0xff] }
 0x548   : > { %v898_v0 = vpop.permute.xlu0 %897 }
 0x549   : > { %v910_v3 = vmul.f32 %v898_v0, %v892_v56 }
 0x54a   : > { %v903_v58 = vpop.permute.xlu1 %902 }
 0x54b   : > { %v1098_v5 = vpack.c.bf16 %v910_v3, %v910_v3  ;;  %v911_v6 = vmul.f32 %v903_v58, %v893_v57 }
 0x54d   : > { %v1099_v8 = vpack.c.bf16 %v911_v6, %v911_v6  ;;  %923 = vrot.lane.b32.xlu1 %v1098_v5, %s1267_s27 }
 0x54e   : > { %v477_v9 = vpop.permute.xlu1 %476  ;;  %v908_v11 = vpop.permute.xlu0 %907 }
 0x54f   : > { %v489_v12 = vmul.f32 %v477_v9, %v471_v7  ;;  %v912_v25 = vmul.f32 %v908_v11, %v894_v10  ;;  %925 = vrot.lane.b32.xlu0 %v1099_v8, %s1267_s27 }
 0x551   : > { %v561_v24 = vadd.f32 %v1434_v2, %v489_v12  ;;  %v1100_v27 = vpack.c.bf16 %v912_v25, %v912_v25 }
 0x552   : > { %v487_v30 = vpop.permute.xlu1 %486  ;;  %v482_v13 = vpop.permute.xlu0 %481 }
 0x553   : > { %564 = vst.msk [vmem:[#allocation4] sm:$0xff] %vm307_vm0, %v561_v24  ;;  %v491_v31 = vmul.f32 %v487_v30, %v473_v29  ;;  %v490_v34 = vmul.f32 %v482_v13, %v472_v32  ;;  %927 = vrot.lane.b32.xlu1 %v1100_v27, %s1267_s27 }
 0x555   : > { %v563_v35 = vadd.f32 %v1432_v1, %v491_v31  ;;  %v562_v14 = vadd.f32 %v1436_v4, %v490_v34 }
 0x556   : > { %v854_v15 = vpop.permute.xlu0 %853  ;;  %v859_v19 = vpop.permute.xlu1 %858 }
 0x557   : > { %566 = vst.msk [vmem:[#allocation4 + $0x10] sm:$0xff] %vm307_vm0, %v563_v35  ;;  %565 = vst.msk [vmem:[#allocation4 + $0x8] sm:$0xff] %vm307_vm0, %v562_v14 }
 0x55a   : > { %v848_v16 = vld [vmem:[#allocation4] sm:$0xff]  ;;  %v864_v21 = vpop.permute.xlu0 %863 }
 0x55b   : > { %v866_v17 = vmul.f32 %v854_v15, %v848_v16 }
 0x55d   : > { %v1095_v2 = vpack.c.bf16 %v866_v17, %v866_v17 }
 0x55e   : > { %v849_v18 = vld [vmem:[#allocation4 + $0x8] sm:$0xff]  ;;  %v850_v20 = vld [vmem:[#allocation4 + $0x10] sm:$0xff] }
 0x55f   : > { %883 = vst.msk [vmem:[%s287_s30] sm:$0xf] %vm882_vm4, %v1095_v2  ;;  %v867_v1 = vmul.f32 %v859_v19, %v849_v18  ;;  %v868_v4 = vmul.f32 %v864_v21, %v850_v20 }
 0x561   : > { %v1096_v22 = vpack.c.bf16 %v867_v1, %v867_v1  ;;  %v1097_v23 = vpack.c.bf16 %v868_v4, %v868_v4 }
 0x563   : > { %884 = vst.msk [vmem:[%s287_s30 + $0x4] sm:$0xf] %vm882_vm4, %v1096_v22  ;;  %885 = vst.msk [vmem:[%s287_s30 + $0x8] sm:$0xf] %vm882_vm4, %v1097_v23 }
 0x5bf   : > { %v924_v26 = vpop.permute.xlu1 %923 }
 0x5c0   : > { %933 = vst.msk [vmem:[%s287_s30] sm:$0xf] %vm932_vm5, %v924_v26 }
 0x5c1   : > { %v926_v28 = vpop.permute.xlu0 %925 }
 0x5c2   : > { %934 = vst.msk [vmem:[%s287_s30 + $0x4] sm:$0xf] %vm932_vm5, %v926_v28 }
 0x5c5   : > { %v928_v33 = vpop.permute.xlu1 %927 }
 0x5c6   : > { %935 = vst.msk [vmem:[%s287_s30 + $0x8] sm:$0xf] %vm932_vm5, %v928_v33 }
 0x5c7 PF: > { %s13_s14 = sadd.s32 1, %s1261_s14   ;;  %s1506_s12 = smov %s1257_s13 }
 0x5c8   : > { %p10_p5 = scmp.ge.s32.totalorder %s13_s14, 4   ;;  %s1507_s13 = smov %s1509_s15 }
 0x5ca   :  { %12 = sbr.rel (!%p10_p5) target bundleno = 2 (0x2), region = 79 }

// kernel: _lambda_.81
= control target key start
LH: loop header
LB: loop body
LE: loop exit
PB: predicated region body
PF: predicated region fallthrough
CT: control target
= control target key end

     0   :  { %vm73_vm0 = vcmask 523264   ;;  %s322_s1 = inlined_call_operand.vmem [shape: bf16[64,128], index: 1, kind: input, shape index: {}]   ;;  %s323_s0 = inlined_call_operand.vmem [shape: bf16[32,64], index: 0, kind: input, shape index: {}]   ;;  %s324_s2 = inlined_call_operand.vmem [shape: f32[1,128], index: 2, kind: input, shape index: {}]   ;;  %s325_s3 = inlined_call_operand.vmem [shape: bf16[32,128], index: 3, kind: output, shape index: {}]  }
   0x1   :  { %v261_v0 = vld [vmem:[%s322_s1] sm:$0xff]   ;;  %v262_v1 = vld [vmem:[%s322_s1 + $0x8] sm:$0xff]   ;;  %v263_v2 = vld [vmem:[%s322_s1 + $0x10] sm:$0xff]  }
   0x2   :  { %249 = vmatprep.subr.bf16.mxu0 %v261_v0  ;;  %v265_v3 = vld [vmem:[%s323_s0] sm:$0xff]   ;;  %v264_v4 = vld [vmem:[%s322_s1 + $0x18] sm:$0xff]   ;;  %v266_v5 = vld [vmem:[%s323_s0 + $0x8] sm:$0xff]  }
   0x3   :  { %250 = vmatpush3.bf16.msra.mxu0 %v261_v0  ;;  %257 = vmatprep.mubr.msk.bf16.mxu0 %vm73_vm0, %v265_v3  ;;  %v223_v6 = vld [vmem:[%s324_s2] ss:$0 sm:$0xff] }
   0x4   :  { %251 = vmatprep.subr.bf16.mxu0 %v262_v1 }
   0x7   :  { %252 = vmatpush3.bf16.msra.mxu0 %v262_v1 }
   0x8   :  { %253 = vmatprep.subr.bf16.mxu0 %v263_v2 }
   0xb   :  { %254 = vmatpush3.bf16.msra.mxu0 %v263_v2 }
   0xc   :  { %255 = vmatprep.subr.bf16.mxu0 %v264_v4 }
   0xf   :  { %256 = vmatpush3.bf16.msra.mxu0 %v264_v4 }
  0x12   :  { %258 = vmatmul.mubr.msk.bf16.vlgmr.msra.gmra.mrb[0].mxu0 %vm73_vm0, %v266_v5 }
  0xe5   :  { %v259_v7 = vpop.f32.mrb[0].mxu0 }
  0xe6   :  { %v153_v8 = vadd.f32 %v259_v7, %v223_v6  ;;  %v114_v9 = vpop.f32.mrb[1].mxu0 }
  0xe7   :  { %v151_v10 = vadd.f32 %v223_v6, %v114_v9  ;;  %v260_v11 = vpop.f32.mrb[2].mxu0 }
  0xe8   :  { %v157_v12 = vmul.f32 %v153_v8, %v153_v8  ;;  %v154_v13 = vadd.f32 %v260_v11, %v223_v6  ;;  %v117_v14 = vpop.f32.mrb[3].mxu0 }
  0xe9   :  { %v155_v15 = vmul.f32 %v151_v10, %v151_v10  ;;  %v152_v16 = vadd.f32 %v223_v6, %v117_v14 }
  0xea   :  { %v161_v17 = vmul.f32 %v157_v12, %v153_v8  ;;  %v158_v18 = vmul.f32 %v154_v13, %v154_v13 }
  0xeb   :  { %v159_v19 = vmul.f32 %v155_v15, %v151_v10  ;;  %v156_v20 = vmul.f32 %v152_v16, %v152_v16 }
  0xec   :  { %v165_v21 = vmul.f32 0.044715, %v161_v17  ;;  %v162_v22 = vmul.f32 %v158_v18, %v154_v13 }
  0xed   :  { %v163_v23 = vmul.f32 0.044715, %v159_v19  ;;  %v160_v24 = vmul.f32 %v156_v20, %v152_v16 }
  0xee   :  { %v169_v25 = vadd.f32 %v165_v21, %v153_v8  ;;  %v166_v26 = vmul.f32 0.044715, %v162_v22 }
  0xef   :  { %v167_v27 = vadd.f32 %v163_v23, %v151_v10  ;;  %v164_v28 = vmul.f32 0.044715, %v160_v24 }
  0xf0   :  { %v173_v29 = vmul.f32 0.7978846, %v169_v25  ;;  %v170_v30 = vadd.f32 %v166_v26, %v154_v13 }
  0xf1   :  { %v171_v31 = vmul.f32 0.7978846, %v167_v27  ;;  %v168_v32 = vadd.f32 %v164_v28, %v152_v16 }
  0xf2   :  { %267 = vtanh.f32 %v173_v29  ;;  %v174_v33 = vmul.f32 0.7978846, %v170_v30 }
  0xf3   :  { %269 = vtanh.f32 %v171_v31  ;;  %v172_v34 = vmul.f32 0.7978846, %v168_v32 }
  0xf4   :  { %271 = vtanh.f32 %v174_v33 }
  0xf5   :  { %273 = vtanh.f32 %v172_v34 }
  0xfc   :  { %v268_v35 = vpop.eup %267 }
  0xfd   :  { %v270_v36 = vpop.eup %269  ;;  %v181_v37 = vadd.f32 1.0, %v268_v35 }
  0xfe   :  { %v272_v38 = vpop.eup %271  ;;  %v179_v39 = vadd.f32 1.0, %v270_v36 }
  0xff   :  { %v274_v40 = vpop.eup %273  ;;  %v185_v41 = vmul.f32 0.5, %v181_v37  ;;  %v182_v42 = vadd.f32 1.0, %v272_v38 }
 0x100   :  { %v183_v43 = vmul.f32 0.5, %v179_v39  ;;  %v180_v44 = vadd.f32 1.0, %v274_v40 }
 0x101   :  { %v186_v45 = vmul.f32 0.5, %v182_v42  ;;  %v189_v47 = vmul.f32 %v185_v41, %v153_v8 }
 0x102   :  { %v184_v46 = vmul.f32 0.5, %v180_v44  ;;  %v187_v49 = vmul.f32 %v183_v43, %v151_v10 }
 0x103   :  { %v190_v48 = vmul.f32 %v186_v45, %v154_v13 }
 0x104   :  { %v188_v50 = vmul.f32 %v184_v46, %v152_v16 }
 0x105   :  { %v240_v51 = vpack.c.bf16 %v190_v48, %v189_v47 }
 0x106   :  { %v235_v52 = vpack.c.bf16 %v188_v50, %v187_v49 }
 0x107   :  { %242 = vst [vmem:[%s325_s3 + $0x8] sm:$0xff] %v240_v51  }
 0x108   :  { %236 = vst [vmem:[%s325_s3] sm:$0xff] %v235_v52  }

// kernel: _lambda_.82
= control target key start
LH: loop header
LB: loop body
LE: loop exit
PB: predicated region body
PF: predicated region fallthrough
CT: control target
= control target key end

     0   :  { %vm19_vm0 = vcmask 523264   ;;  %v269_v1 = vmov 0.0   ;;  %vm200_vm1 = vcmask 519168   ;;  %s343_s1 = inlined_call_operand.vmem [shape: bf16[128,64], index: 1, kind: input, shape index: {}]   ;;  %s344_s0 = inlined_call_operand.vmem [shape: bf16[32,128], index: 0, kind: input, shape index: {}]   ;;  %s345_s2 = inlined_call_operand.vmem [shape: f32[1,64], index: 2, kind: input, shape index: {}]   ;;  %s346_s3 = inlined_call_operand.vmem [shape: bf16[32,64], index: 3, kind: output, shape index: {}]  }
   0x1   :  { %v259_v0 = vld [vmem:[%s343_s1] sm:$0xff]   ;;  %22 = vst.msk [vmem:[#allocation2 + $0x10] sm:$0xff] %vm19_vm0, %v269_v1  ;;  %20 = vst.msk [vmem:[#allocation2] sm:$0xff] %vm19_vm0, %v269_v1  ;;  %v260_v2 = vld [vmem:[%s343_s1 + $0x8] sm:$0xff]  }
   0x2   :  { %21 = vst.msk [vmem:[#allocation2 + $0x8] sm:$0xff] %vm19_vm0, %v269_v1  ;;  %23 = vst.msk [vmem:[#allocation2 + $0x18] sm:$0xff] %vm19_vm0, %v269_v1  ;;  %238 = vmatprep.subr.bf16.mxu0 %v259_v0  ;;  %v261_v3 = vld [vmem:[%s343_s1 + $0x10] sm:$0xff]   ;;  %v262_v4 = vld [vmem:[%s343_s1 + $0x18] sm:$0xff]  }
   0x3   :  { %239 = vmatpush3.bf16.msra.mxu0 %v259_v0  ;;  %v267_v5 = vld [vmem:[%s344_s0] sm:$0xff]   ;;  %v264_v7 = vld [vmem:[%s343_s1 + $0x28] sm:$0xff]   ;;  %v265_v8 = vld [vmem:[%s343_s1 + $0x30] sm:$0xff]  }
   0x4   :  { %240 = vmatprep.subr.bf16.mxu0 %v260_v2  ;;  %254 = vmatprep.mubr.bf16.mxu0 %v267_v5  ;;  %v263_v6 = vld [vmem:[%s343_s1 + $0x20] sm:$0xff]   ;;  %v266_v9 = vld [vmem:[%s343_s1 + $0x38] sm:$0xff]   ;;  %v268_v10 = vld [vmem:[%s344_s0 + $0x8] sm:$0xff]  }
   0x5   :  { %v219_v23 = vld [vmem:[%s345_s2] ss:$0 sm:$0xff] }
   0x7   :  { %241 = vmatpush3.bf16.msra.mxu0 %v260_v2 }
   0x8   :  { %242 = vmatprep.subr.bf16.mxu0 %v261_v3  ;;  %v30_v11 = vld [vmem:[#allocation2 + $0x10] sm:$0xff]  ;;  %v28_v12 = vld [vmem:[#allocation2] sm:$0xff] }
   0x9   :  { %v31_v14 = vld [vmem:[#allocation2 + $0x18] sm:$0xff]  ;;  %v29_v17 = vld [vmem:[#allocation2 + $0x8] sm:$0xff] }
   0xb   :  { %243 = vmatpush3.bf16.msra.mxu0 %v261_v3 }
   0xc   :  { %244 = vmatprep.subr.bf16.mxu0 %v262_v4 }
   0xf   :  { %245 = vmatpush3.bf16.msra.mxu0 %v262_v4 }
  0x10   :  { %246 = vmatprep.subr.bf16.mxu0 %v263_v6 }
  0x13   :  { %247 = vmatpush3.bf16.msra.mxu0 %v263_v6 }
  0x14   :  { %248 = vmatprep.subr.bf16.mxu0 %v264_v7 }
  0x17   :  { %249 = vmatpush3.bf16.msra.mxu0 %v264_v7 }
  0x18   :  { %250 = vmatprep.subr.bf16.mxu0 %v265_v8 }
  0x1b   :  { %251 = vmatpush3.bf16.msra.mxu0 %v265_v8 }
  0x1c   :  { %252 = vmatprep.subr.bf16.mxu0 %v266_v9 }
  0x1f   :  { %253 = vmatpush3.bf16.msra.mxu0 %v266_v9 }
  0x22   :  { %255 = vmatmul.mubr.bf16.vlgmr.msra.gmra.mrb[0].mxu0 %v268_v10 }
  0xf5   :  { %v256_v13 = vpop.f32.mrb[0].mxu0 }
  0xf6   :  { %v159_v15 = vadd.f32 %v256_v13, %v30_v11  ;;  %v142_v16 = vpop.f32.mrb[1].mxu0 }
  0xf7   :  { %v157_v18 = vadd.f32 %v142_v16, %v28_v12  ;;  %v257_v19 = vpop.f32.mrb[2].mxu0 }
  0xf8   :  { %164 = vst.msk [vmem:[#allocation2 + $0x10] sm:$0xff] %vm19_vm0, %v159_v15  ;;  %v160_v20 = vadd.f32 %v257_v19, %v31_v14  ;;  %v145_v21 = vpop.f32.mrb[3].mxu0 }
  0xf9   :  { %162 = vst.msk [vmem:[#allocation2] sm:$0xff] %vm19_vm0, %v157_v18  ;;  %v158_v22 = vadd.f32 %v145_v21, %v29_v17 }
  0xfa   :  { %165 = vst.msk [vmem:[#allocation2 + $0x18] sm:$0xff] %vm19_vm0, %v160_v20 }
  0xfb   :  { %163 = vst.msk [vmem:[#allocation2 + $0x8] sm:$0xff] %vm19_vm0, %v158_v22 }
  0xff   :  { %v171_v24 = vld [vmem:[#allocation2 + $0x10] sm:$0xff] }
 0x100   :  { %v182_v25 = vadd.f32 %v219_v23, %v171_v24  ;;  %v169_v26 = vld [vmem:[#allocation2] sm:$0xff] }
 0x101   :  { %v180_v27 = vadd.f32 %v219_v23, %v169_v26  ;;  %v172_v28 = vld [vmem:[#allocation2 + $0x18] sm:$0xff] }
 0x102   :  { %v226_v29 = vpack.c.bf16 %v182_v25, %v182_v25  ;;  %v183_v30 = vadd.f32 %v219_v23, %v172_v28  ;;  %v170_v31 = vld [vmem:[#allocation2 + $0x8] sm:$0xff] }
 0x103   :  { %v224_v32 = vpack.c.bf16 %v180_v27, %v180_v27  ;;  %v181_v33 = vadd.f32 %v219_v23, %v170_v31 }
 0x104   :  { %203 = vst.msk [vmem:[%s346_s3 + $0x8] sm:$0xf] %vm200_vm1, %v226_v29  ;;  %v227_v34 = vpack.c.bf16 %v183_v30, %v183_v30 }
 0x105   :  { %201 = vst.msk [vmem:[%s346_s3] sm:$0xf] %vm200_vm1, %v224_v32  ;;  %v225_v35 = vpack.c.bf16 %v181_v33, %v181_v33 }
 0x106   :  { %204 = vst.msk [vmem:[%s346_s3 + $0xc] sm:$0xf] %vm200_vm1, %v227_v34 }
 0x107   :  { %202 = vst.msk [vmem:[%s346_s3 + $0x4] sm:$0xf] %vm200_vm1, %v225_v35 }

// kernel: _lambda_.83
= control target key start
LH: loop header
LB: loop body
LE: loop exit
PB: predicated region body
PF: predicated region fallthrough
CT: control target
= control target key end

     0   :  { %vm19_vm0 = vcmask 523264   ;;  %v176_v0 = vmov 0.0   ;;  %vm177_vm1 = vmmov 0   ;;  %vm134_vm2 = vcmask 519168   ;;  %s227_s1 = inlined_call_operand.vmem [shape: bf16[64,64], index: 1, kind: input, shape index: {}]   ;;  %s228_s0 = inlined_call_operand.vmem [shape: bf16[16,64], index: 0, kind: input, shape index: {}]   ;;  %s229_s2 = inlined_call_operand.vmem [shape: f32[1,64], index: 2, kind: input, shape index: {}]   ;;  %s230_s3 = inlined_call_operand.vmem [shape: bf16[16,64], index: 3, kind: output, shape index: {}]  }
   0x1   :  { %157 = vmatprep.subr.bf16.mxu0 %v176_v0  ;;  %v171_v1 = vld [vmem:[%s227_s1] sm:$0xff]   ;;  %165 = vmatprep.mubr.msk.bf16.mxu0 %vm177_vm1, %v176_v0  ;;  %20 = vst.msk [vmem:[#allocation2] sm:$0xff] %vm19_vm0, %v176_v0  ;;  %21 = vst.msk [vmem:[#allocation2 + $0x8] sm:$0xff] %vm19_vm0, %v176_v0  ;;  %v172_v2 = vld [vmem:[%s227_s1 + $0x8] sm:$0xff]  }
   0x2   :  { %158 = vmatpush3.bf16.msra.mxu0 %v171_v1  ;;  %v173_v3 = vld [vmem:[%s227_s1 + $0x10] sm:$0xff]   ;;  %v174_v4 = vld [vmem:[%s227_s1 + $0x18] sm:$0xff]   ;;  %v175_v5 = vld [vmem:[%s228_s0] sm:$0xff]  }
   0x3   :  { %159 = vmatprep.subr.bf16.mxu0 %v176_v0  ;;  %v147_v14 = vld [vmem:[%s229_s2] ss:$0 sm:$0xff] }
   0x6   :  { %160 = vmatpush3.bf16.msra.mxu0 %v172_v2 }
   0x7   :  { %161 = vmatprep.subr.bf16.mxu0 %v176_v0 }
   0x8   :  { %v24_v6 = vld [vmem:[#allocation2] sm:$0xff]  ;;  %v25_v8 = vld [vmem:[#allocation2 + $0x8] sm:$0xff] }
   0xa   :  { %162 = vmatpush3.bf16.msra.mxu0 %v173_v3 }
   0xb   :  { %163 = vmatprep.subr.bf16.mxu0 %v176_v0 }
   0xe   :  { %164 = vmatpush3.bf16.msra.mxu0 %v174_v4 }
  0x11   :  { %166 = vmatmul.mubr.msk.bf16.vlgmr.msra.gmra.mrb[0].mxu0 %vm19_vm0, %v175_v5 }
  0xe4   :  { %v101_v7 = vpop.f32.mrb[0].mxu0 }
  0xe5   :  { %v108_v9 = vadd.f32 %v101_v7, %v24_v6  ;;  %v167_v10 = vpop.f32.mrb[1].mxu0 }
  0xe6   :  { %v104_v11 = vpop.f32.mrb[2].mxu0 }
  0xe7   :  { %110 = vst.msk [vmem:[#allocation2] sm:$0xff] %vm19_vm0, %v108_v9  ;;  %v109_v12 = vadd.f32 %v104_v11, %v25_v8  ;;  %v168_v13 = vpop.f32.mrb[3].mxu0 }
  0xe9   :  { %111 = vst.msk [vmem:[#allocation2 + $0x8] sm:$0xff] %vm19_vm0, %v109_v12 }
  0xee   :  { %v115_v15 = vld [vmem:[#allocation2] sm:$0xff] }
  0xef   :  { %v124_v16 = vadd.f32 %v147_v14, %v115_v15 }
  0xf0   :  { %v116_v17 = vld [vmem:[#allocation2 + $0x8] sm:$0xff] }
  0xf1   :  { %v150_v18 = vpack.c.bf16 %v124_v16, %v124_v16  ;;  %v125_v19 = vadd.f32 %v147_v14, %v116_v17 }
  0xf3   :  { %135 = vst.msk [vmem:[%s230_s3] sm:$0xf] %vm134_vm2, %v150_v18  ;;  %v151_v20 = vpack.c.bf16 %v125_v19, %v125_v19 }
  0xf5   :  { %136 = vst.msk [vmem:[%s230_s3 + $0x4] sm:$0xf] %vm134_vm2, %v151_v20 }

// kernel: _lambda_.86
= control target key start
LH: loop header
LB: loop body
LE: loop exit
PB: predicated region body
PF: predicated region fallthrough
CT: control target
= control target key end

     0   :  { %8 = vsyncpa [#allocation4], 0  ;;  %s263_s12 = smov [#allocation3]   ;;  %s335_s0 = inlined_call_operand.vmem [shape: bf16[16,128], index: 0, kind: input, shape index: {}]   ;;  %s336_s1 = inlined_call_operand.vmem [shape: bf16[128,64], index: 1, kind: input, shape index: {}]   ;;  %s337_s2 = inlined_call_operand.hbm [shape: f32[1,64], index: 2, kind: input, shape index: {}]   ;;  %s338_s3 = inlined_call_operand.vmem [shape: bf16[16,64], index: 3, kind: output, shape index: {}]  }
   0x1   :  { %s19_s13 = sshll.u32 %s263_s12, 4  ;;  %s239_s16 = scalar_lea.hbm %s337_s2, 16  ;;  %s20_s13 = int_to_ptr.vmem [resolvable:$true] %s19_s13 }
   0x2   :  { %p240_p0 = scmp.ne.s32.totalorder %s337_s2, %s239_s16  ;;  %p243_p1 = scmp.lt.u32.totalorder %s239_s16, %s337_s2 }
   0x4   :  { %p245_p2 = pnand %p243_p1, %p240_p0 }
   0x6   :  { %248 = shalt.err (!%p245_p2)
}
   0x7   :  { %s249_s21 = scalar_lea.vmem %s20_s13, 16  ;;  %s253_s22 = scalar_lea.vmem %s20_s13, 32 }
   0x8   :  { %p250_p3 = scmp.ne.s32.totalorder %s20_s13, %s249_s21  ;;  %p254_p4 = scmp.lt.s32.totalorder %s20_s13, %s20_s13 }
   0x9   :  { %p255_p5 = scmp.lt.s32.totalorder %s253_s22, %s249_s21 }
   0xb   :  { %p256_p6 = por %p255_p5, %p254_p4 }
   0xd   :  { %p257_p7 = pnand %p256_p6, %p250_p3 }
   0xf   :  { %260 = shalt.err (!%p257_p7)
}
  0x10   :  { %22 = dma.hbm_to_vmem [thread:$0]  %s337_s2, 16, %s20_s13, [#allocation4]  }
  0x11   :  { %261 = dma.done.wait [#allocation4], 16  }
  0x12   :  { %262 = vsyncadd [#allocation4], 4294967280  ;;  %vm31_vm0 = vcmask 523264   ;;  %v264_v0 = vmov 0.0   ;;  %vm265_vm1 = vmmov 0   ;;  %v230_v1 = vld [vmem:[%s336_s1] sm:$0xff]  }
  0x13   :  { %207 = vmatprep.subr.bf16.mxu0 %v264_v0  ;;  %223 = vmatprep.mubr.msk.bf16.mxu0 %vm265_vm1, %v264_v0  ;;  %32 = vst.msk [vmem:[#allocation2] sm:$0xff] %vm31_vm0, %v264_v0  ;;  %33 = vst.msk [vmem:[#allocation2 + $0x8] sm:$0xff] %vm31_vm0, %v264_v0  ;;  %v231_v2 = vld [vmem:[%s336_s1 + $0x8] sm:$0xff]   ;;  %v232_v3 = vld [vmem:[%s336_s1 + $0x10] sm:$0xff]   ;;  %vm176_vm2 = vcmask 519168  }
  0x14   :  { %208 = vmatpush3.bf16.msra.mxu0 %v230_v1  ;;  %v233_v4 = vld [vmem:[%s336_s1 + $0x18] sm:$0xff]   ;;  %v234_v5 = vld [vmem:[%s336_s1 + $0x20] sm:$0xff]   ;;  %v235_v6 = vld [vmem:[%s336_s1 + $0x28] sm:$0xff]  }
  0x15   :  { %209 = vmatprep.subr.bf16.mxu0 %v264_v0  ;;  %v236_v7 = vld [vmem:[%s336_s1 + $0x30] sm:$0xff]   ;;  %v237_v8 = vld [vmem:[%s336_s1 + $0x38] sm:$0xff]   ;;  %v238_v9 = vld [vmem:[%s335_s0] sm:$0xff]  }
  0x16   :  { %v193_v18 = vld [vmem:[#allocation3] ss:$0 sm:$0xff] }
  0x18   :  { %210 = vmatpush3.bf16.msra.mxu0 %v231_v2 }
  0x19   :  { %211 = vmatprep.subr.bf16.mxu0 %v264_v0 }
  0x1a   :  { %v36_v10 = vld [vmem:[#allocation2] sm:$0xff]  ;;  %v37_v12 = vld [vmem:[#allocation2 + $0x8] sm:$0xff] }
  0x1c   :  { %212 = vmatpush3.bf16.msra.mxu0 %v232_v3 }
  0x1d   :  { %213 = vmatprep.subr.bf16.mxu0 %v264_v0 }
  0x20   :  { %214 = vmatpush3.bf16.msra.mxu0 %v233_v4 }
  0x21   :  { %215 = vmatprep.subr.bf16.mxu0 %v264_v0 }
  0x24   :  { %216 = vmatpush3.bf16.msra.mxu0 %v234_v5 }
  0x25   :  { %217 = vmatprep.subr.bf16.mxu0 %v264_v0 }
  0x28   :  { %218 = vmatpush3.bf16.msra.mxu0 %v235_v6 }
  0x29   :  { %219 = vmatprep.subr.bf16.mxu0 %v264_v0 }
  0x2c   :  { %220 = vmatpush3.bf16.msra.mxu0 %v236_v7 }
  0x2d   :  { %221 = vmatprep.subr.bf16.mxu0 %v264_v0 }
  0x30   :  { %222 = vmatpush3.bf16.msra.mxu0 %v237_v8 }
  0x33   :  { %224 = vmatmul.mubr.bf16.vlgmr.msra.gmra.mrb[0].mxu0 %v238_v9 }
 0x106   :  { %v142_v11 = vpop.f32.mrb[0].mxu0 }
 0x107   :  { %v149_v13 = vadd.f32 %v142_v11, %v36_v10  ;;  %v225_v14 = vpop.f32.mrb[1].mxu0 }
 0x108   :  { %v145_v15 = vpop.f32.mrb[2].mxu0 }
 0x109   :  { %152 = vst.msk [vmem:[#allocation2] sm:$0xff] %vm31_vm0, %v149_v13  ;;  %v150_v16 = vadd.f32 %v145_v15, %v37_v12  ;;  %v226_v17 = vpop.f32.mrb[3].mxu0 }
 0x10b   :  { %153 = vst.msk [vmem:[#allocation2 + $0x8] sm:$0xff] %vm31_vm0, %v150_v16 }
 0x110   :  { %v157_v19 = vld [vmem:[#allocation2] sm:$0xff] }
 0x111   :  { %v166_v20 = vadd.f32 %v193_v18, %v157_v19 }
 0x112   :  { %v158_v21 = vld [vmem:[#allocation2 + $0x8] sm:$0xff] }
 0x113   :  { %v196_v22 = vpack.c.bf16 %v166_v20, %v166_v20  ;;  %v167_v23 = vadd.f32 %v193_v18, %v158_v21 }
 0x115   :  { %177 = vst.msk [vmem:[%s338_s3] sm:$0xf] %vm176_vm2, %v196_v22  ;;  %v197_v24 = vpack.c.bf16 %v167_v23, %v167_v23 }
 0x117   :  { %178 = vst.msk [vmem:[%s338_s3 + $0x4] sm:$0xf] %vm176_vm2, %v197_v24 }
 0x118   :  { %183 = vsyncpa [#allocation4], 1 }

// kernel: _lambda_.85
= control target key start
LH: loop header
LB: loop body
LE: loop exit
PB: predicated region body
PF: predicated region fallthrough
CT: control target
= control target key end

     0   :  { %v201_v0 = vmov 0.0   ;;  %vm202_vm0 = vmmov 0   ;;  %vm62_vm1 = vcmask 523264   ;;  %s244_s1 = inlined_call_operand.vmem [shape: bf16[64,128], index: 1, kind: input, shape index: {}]   ;;  %s245_s0 = inlined_call_operand.vmem [shape: bf16[16,64], index: 0, kind: input, shape index: {}]   ;;  %s246_s2 = inlined_call_operand.vmem [shape: f32[1,128], index: 2, kind: input, shape index: {}]   ;;  %s247_s3 = inlined_call_operand.vmem [shape: bf16[16,128], index: 3, kind: output, shape index: {}]  }
   0x1   :  { %178 = vmatprep.subr.bf16.mxu0 %v201_v0  ;;  %v192_v1 = vld [vmem:[%s244_s1] sm:$0xff]   ;;  %186 = vmatprep.mubr.msk.bf16.mxu0 %vm202_vm0, %v201_v0  ;;  %v193_v2 = vld [vmem:[%s244_s1 + $0x8] sm:$0xff]   ;;  %v194_v3 = vld [vmem:[%s244_s1 + $0x10] sm:$0xff]  }
   0x2   :  { %179 = vmatpush3.bf16.msra.mxu0 %v192_v1  ;;  %v195_v4 = vld [vmem:[%s244_s1 + $0x18] sm:$0xff]   ;;  %v196_v5 = vld [vmem:[%s245_s0] sm:$0xff]  }
   0x3   :  { %180 = vmatprep.subr.bf16.mxu0 %v201_v0  ;;  %v163_v6 = vld [vmem:[%s246_s2] ss:$0 sm:$0xff] }
   0x6   :  { %181 = vmatpush3.bf16.msra.mxu0 %v193_v2 }
   0x7   :  { %182 = vmatprep.subr.bf16.mxu0 %v201_v0 }
   0xa   :  { %183 = vmatpush3.bf16.msra.mxu0 %v194_v3 }
   0xb   :  { %184 = vmatprep.subr.bf16.mxu0 %v201_v0 }
   0xe   :  { %185 = vmatpush3.bf16.msra.mxu0 %v195_v4 }
  0x11   :  { %187 = vmatmul.mubr.msk.bf16.vlgmr.msra.gmra.mrb[0].mxu0 %vm62_vm1, %v196_v5 }
  0xe4   :  { %v100_v7 = vpop.f32.mrb[0].mxu0 }
  0xe5   :  { %v123_v8 = vadd.f32 %v163_v6, %v100_v7  ;;  %v188_v9 = vpop.f32.mrb[1].mxu0 }
  0xe6   :  { %v103_v10 = vpop.f32.mrb[2].mxu0 }
  0xe7   :  { %v125_v11 = vmul.f32 %v123_v8, %v123_v8  ;;  %v124_v12 = vadd.f32 %v163_v6, %v103_v10  ;;  %v189_v13 = vpop.f32.mrb[3].mxu0 }
  0xe9   :  { %v127_v14 = vmul.f32 %v125_v11, %v123_v8  ;;  %v126_v15 = vmul.f32 %v124_v12, %v124_v12 }
  0xeb   :  { %v129_v16 = vmul.f32 0.044715, %v127_v14  ;;  %v128_v17 = vmul.f32 %v126_v15, %v124_v12 }
  0xed   :  { %v131_v18 = vadd.f32 %v129_v16, %v123_v8  ;;  %v130_v19 = vmul.f32 0.044715, %v128_v17 }
  0xef   :  { %v133_v20 = vmul.f32 0.7978846, %v131_v18  ;;  %v132_v21 = vadd.f32 %v130_v19, %v124_v12 }
  0xf1   :  { %197 = vtanh.f32 %v133_v20  ;;  %v134_v22 = vmul.f32 0.7978846, %v132_v21 }
  0xf3   :  { %199 = vtanh.f32 %v134_v22 }
  0xfb   :  { %v198_v23 = vpop.eup %197 }
  0xfc   :  { %v137_v24 = vadd.f32 1.0, %v198_v23 }
  0xfd   :  { %v200_v25 = vpop.eup %199 }
  0xfe   :  { %v139_v26 = vmul.f32 0.5, %v137_v24  ;;  %v138_v27 = vadd.f32 1.0, %v200_v25 }
 0x100   :  { %v140_v28 = vmul.f32 0.5, %v138_v27  ;;  %v141_v29 = vmul.f32 %v139_v26, %v123_v8 }
 0x102   :  { %v142_v30 = vmul.f32 %v140_v28, %v124_v12 }
 0x104   :  { %v171_v31 = vpack.c.bf16 %v142_v30, %v141_v29 }
 0x106   :  { %172 = vst [vmem:[%s247_s3] sm:$0xff] %v171_v31  }

// kernel: _lambda_.101
= control target key start
LH: loop header
LB: loop body
LE: loop exit
PB: predicated region body
PF: predicated region fallthrough
CT: control target
= control target key end

     0   :  { %vm19_vm0 = vcmask 523264   ;;  %v225_v0 = vmov 0.0   ;;  %vm226_vm1 = vmmov 0   ;;  %vm164_vm2 = vcmask 519168   ;;  %s287_s1 = inlined_call_operand.vmem [shape: bf16[128,64], index: 1, kind: input, shape index: {}]   ;;  %s288_s0 = inlined_call_operand.vmem [shape: bf16[16,128], index: 0, kind: input, shape index: {}]   ;;  %s289_s2 = inlined_call_operand.vmem [shape: f32[1,64], index: 2, kind: input, shape index: {}]   ;;  %s290_s3 = inlined_call_operand.vmem [shape: bf16[16,64], index: 3, kind: output, shape index: {}]  }
   0x1   :  { %194 = vmatprep.subr.bf16.mxu0 %v225_v0  ;;  %v216_v1 = vld [vmem:[%s287_s1] sm:$0xff]   ;;  %210 = vmatprep.mubr.msk.bf16.mxu0 %vm226_vm1, %v225_v0  ;;  %20 = vst.msk [vmem:[#allocation2] sm:$0xff] %vm19_vm0, %v225_v0  ;;  %21 = vst.msk [vmem:[#allocation2 + $0x8] sm:$0xff] %vm19_vm0, %v225_v0  ;;  %v217_v2 = vld [vmem:[%s287_s1 + $0x8] sm:$0xff]  }
   0x2   :  { %195 = vmatpush3.bf16.msra.mxu0 %v216_v1  ;;  %v218_v3 = vld [vmem:[%s287_s1 + $0x10] sm:$0xff]   ;;  %v219_v4 = vld [vmem:[%s287_s1 + $0x18] sm:$0xff]   ;;  %v220_v5 = vld [vmem:[%s287_s1 + $0x20] sm:$0xff]  }
   0x3   :  { %196 = vmatprep.subr.bf16.mxu0 %v225_v0  ;;  %v221_v6 = vld [vmem:[%s287_s1 + $0x28] sm:$0xff]   ;;  %v222_v7 = vld [vmem:[%s287_s1 + $0x30] sm:$0xff]   ;;  %v223_v8 = vld [vmem:[%s287_s1 + $0x38] sm:$0xff]  }
   0x4   :  { %v224_v9 = vld [vmem:[%s288_s0] sm:$0xff]  }
   0x5   :  { %v180_v18 = vld [vmem:[%s289_s2] ss:$0 sm:$0xff] }
   0x6   :  { %197 = vmatpush3.bf16.msra.mxu0 %v217_v2 }
   0x7   :  { %198 = vmatprep.subr.bf16.mxu0 %v225_v0 }
   0x8   :  { %v24_v10 = vld [vmem:[#allocation2] sm:$0xff]  ;;  %v25_v12 = vld [vmem:[#allocation2 + $0x8] sm:$0xff] }
   0xa   :  { %199 = vmatpush3.bf16.msra.mxu0 %v218_v3 }
   0xb   :  { %200 = vmatprep.subr.bf16.mxu0 %v225_v0 }
   0xe   :  { %201 = vmatpush3.bf16.msra.mxu0 %v219_v4 }
   0xf   :  { %202 = vmatprep.subr.bf16.mxu0 %v225_v0 }
  0x12   :  { %203 = vmatpush3.bf16.msra.mxu0 %v220_v5 }
  0x13   :  { %204 = vmatprep.subr.bf16.mxu0 %v225_v0 }
  0x16   :  { %205 = vmatpush3.bf16.msra.mxu0 %v221_v6 }
  0x17   :  { %206 = vmatprep.subr.bf16.mxu0 %v225_v0 }
  0x1a   :  { %207 = vmatpush3.bf16.msra.mxu0 %v222_v7 }
  0x1b   :  { %208 = vmatprep.subr.bf16.mxu0 %v225_v0 }
  0x1e   :  { %209 = vmatpush3.bf16.msra.mxu0 %v223_v8 }
  0x21   :  { %211 = vmatmul.mubr.bf16.vlgmr.msra.gmra.mrb[0].mxu0 %v224_v9 }
  0xf4   :  { %v130_v11 = vpop.f32.mrb[0].mxu0 }
  0xf5   :  { %v137_v13 = vadd.f32 %v130_v11, %v24_v10  ;;  %v212_v14 = vpop.f32.mrb[1].mxu0 }
  0xf6   :  { %v133_v15 = vpop.f32.mrb[2].mxu0 }
  0xf7   :  { %140 = vst.msk [vmem:[#allocation2] sm:$0xff] %vm19_vm0, %v137_v13  ;;  %v138_v16 = vadd.f32 %v133_v15, %v25_v12  ;;  %v213_v17 = vpop.f32.mrb[3].mxu0 }
  0xf9   :  { %141 = vst.msk [vmem:[#allocation2 + $0x8] sm:$0xff] %vm19_vm0, %v138_v16 }
  0xfe   :  { %v145_v19 = vld [vmem:[#allocation2] sm:$0xff] }
  0xff   :  { %v154_v20 = vadd.f32 %v180_v18, %v145_v19 }
 0x100   :  { %v146_v21 = vld [vmem:[#allocation2 + $0x8] sm:$0xff] }
 0x101   :  { %v183_v22 = vpack.c.bf16 %v154_v20, %v154_v20  ;;  %v155_v23 = vadd.f32 %v180_v18, %v146_v21 }
 0x103   :  { %165 = vst.msk [vmem:[%s290_s3] sm:$0xf] %vm164_vm2, %v183_v22  ;;  %v184_v24 = vpack.c.bf16 %v155_v23, %v155_v23 }
 0x105   :  { %166 = vst.msk [vmem:[%s290_s3 + $0x4] sm:$0xf] %vm164_vm2, %v184_v24 }

// kernel: _lambda_.102
= control target key start
LH: loop header
LB: loop body
LE: loop exit
PB: predicated region body
PF: predicated region fallthrough
CT: control target
= control target key end

     0   :  { %v200_v1 = vmov 0   ;;  %vm81_vm0 = vcmask 523264   ;;  %vm19_vm1 = vcmask 1041408   ;;  %vm20_vm2 = vcmask 519170   ;;  %s266_s1 = inlined_call_operand.vmem [shape: bf16[64,192], index: 1, kind: input, shape index: {}]   ;;  %s267_s0 = inlined_call_operand.vmem [shape: f32[2,64], index: 0, kind: input, shape index: {}]   ;;  %s268_s2 = inlined_call_operand.vmem [shape: f32[1,192], index: 2, kind: input, shape index: {}]   ;;  %s269_s3 = inlined_call_operand.vmem [shape: f32[2,192], index: 3, kind: output, shape index: {}]  }
   0x1   :  { %v184_v0 = vld [vmem:[%s266_s1 + $0x4] ss:$8 sps:$4 sm:$0xff]   ;;  %117 = vmatprep.mubr.bf16.mxu0 %v200_v1  ;;  %v186_v2 = vld [vmem:[%s266_s1] ss:$8 sps:$4 sm:$0xff]   ;;  %v187_v3 = vld [vmem:[%s266_s1 + $0x14] ss:$8 sps:$4 sm:$0xff]   ;;  %v132_v20 = vlaneseq }
   0x2   :  { %85 = vmatprep.subr.bf16.mxu0 %v184_v0  ;;  %v189_v4 = vld [vmem:[%s266_s1 + $0x10] ss:$8 sps:$4 sm:$0xff]   ;;  %v190_v5 = vld [vmem:[%s266_s1 + $0x24] ss:$8 sps:$4 sm:$0xff]   ;;  %v23_v6 = vld [vmem:[%s267_s0] sm:$0x3] }
   0x3   :  { %86 = vmatpush1.bf16.msra.mxu0 %v186_v2  ;;  %v171_v7 = vmul.f32 -1.442695, %v23_v6  ;;  %v192_v8 = vld [vmem:[%s266_s1 + $0x20] ss:$8 sps:$4 sm:$0xff]   ;;  %v193_v9 = vld [vmem:[%s266_s1 + $0x34] ss:$8 sps:$4 sm:$0xff]   ;;  %vm250_vm3 = vmor %vm20_vm2, %vm19_vm1 }
   0x4   :  { %87 = vmatprep.subr.bf16.mxu0 %v187_v3  ;;  %v195_v10 = vld [vmem:[%s266_s1 + $0x30] ss:$8 sps:$4 sm:$0xff]   ;;  %v201_v17 = vmov 0.0   ;;  %v202_v18 = vmov 1983009808   ;;  %v133_v22 = vshrl.u32 %v132_v20, 7 }
   0x5   :  { %196 = vpow2.f32 %v171_v7  ;;  %22 = vst.msk [vmem:[#allocation2] sm:$0xf] %vm250_vm3, %v201_v17  ;;  %v130_v19 = vunpack.c.l.s4 %v202_v18  ;;  %v146_v28 = vld [vmem:[%s268_s2] sm:$0x3] }
   0x6   :  { %v150_v25 = vsub.s32 0, %v133_v22  ;;  %v154_v26 = vsub.s32 1, %v133_v22 }
   0x7   :  { %88 = vmatpush1.bf16.msra.mxu0 %v189_v4  ;;  %v131_v21 = vunpack.c.0.s8 %v130_v19 }
   0x8   :  { %89 = vmatprep.subr.bf16.mxu0 %v190_v5  ;;  %v151_v34 = vrot.slane %v146_v28, %v150_v25  ;;  %v155_v35 = vrot.slane %v146_v28, %v154_v26 }
   0x9   :  { %v134_v24 = vsub.s32 %v131_v21, %v133_v22 }
   0xa   :  { %v156_v37 = vcombine.low %v151_v34, %v155_v35 }
   0xb   :  { %90 = vmatpush1.bf16.msra.mxu0 %v192_v8 }
   0xc   :  { %91 = vmatprep.subr.bf16.mxu0 %v193_v9  ;;  %v31_v31 = vld [vmem:[#allocation2] sm:$0xf]  ;;  %v163_v38 = vrot.slane %v156_v37, %v134_v24 }
   0xf   :  { %92 = vmatpush1.bf16.msra.mxu0 %v195_v10  ;;  %v197_v11 = vpop.eup %196 }
  0x10   :  { %v27_v12 = vadd.f32 1.0, %v197_v11 }
  0x12   :  { %198 = vrcp.f32 %v27_v12 }
  0x1c   :  { %v199_v13 = vpop.eup %198 }
  0x1d   :  { %v30_v14 = vmul.f32 %v199_v13, %v23_v6 }
  0x1f   :  { %v32_v15 = vpack.c.bf16 %v30_v14, %v30_v14 }
  0x21   :  { %180 = vmatmul.mubr.msk.bf16.vlgmr.msra.gmra.mrb[0].mxu0 %vm81_vm0, %v32_v15 }
  0xf4   :  { %v119_v23 = vpop.f32.mrb[0].mxu0 }
  0xf5   :  { %v121_v27 = vpop.f32.mrb[1].mxu0 }
  0xf6   :  { %v128_v29 = vcombine.low %v119_v23, %v121_v27  ;;  %v123_v30 = vpop.f32.mrb[2].mxu0 }
  0xf7   :  { %v124_v32 = vpop.f32.mrb[3].mxu0 }
  0xf8   :  { %v135_v33 = vrot.slane %v128_v29, %v134_v24 }
  0xfa   :  { %v137_v36 = vadd.f32 %v135_v33, %v31_v31 }
  0xfc   :  { %141 = vst.msk [vmem:[#allocation2] sm:$0xf] %vm250_vm3, %v137_v36 }
 0x103   :  { %v145_v39 = vld [vmem:[#allocation2] sm:$0xf] }
 0x104   :  { %v165_v40 = vadd.f32 %v163_v38, %v145_v39 }
 0x106   :  { %166 = vst.msk [vmem:[%s269_s3] sm:$0xf] %vm250_vm3, %v165_v40 }

// kernel: _lambda_.103
= control target key start
LH: loop header
LB: loop body
LE: loop exit
PB: predicated region body
PF: predicated region fallthrough
CT: control target
= control target key end

     0   :  { %s523_s12 = smov 0   ;;  %s525_s13 = smov 0   ;;  %s577_s0 = inlined_call_operand.vmem [shape: bf16[2,24,64], index: 0, kind: input, shape index: {}]   ;;  %s578_s1 = inlined_call_operand.vmem [shape: f32[2,1,64], index: 1, kind: input, shape index: {}]   ;;  %s579_s2 = inlined_call_operand.vmem [shape: f32[2,1,64], index: 2, kind: input, shape index: {}]   ;;  %s580_s3 = inlined_call_operand.vmem [shape: bf16[2,24,64], index: 3, kind: output, shape index: {}]  }
   0x1   :  { %s527_s14 = smov 0  }
   0x2 LB: > { %s25_s15 = sadd.s32 1, %s497_s13  ;;  %p432_p0 = scmp.ge.s32.totalorder %s501_s14, 1  ;;  %s501_s14 = sphi %s527_s14, %s13_s14   ;;  %s497_s13 = sphi %s525_s13, %s582_s13   ;;  %s493_s12 = sphi %s523_s12, %s581_s12  }
   0x3   : > { %p27_p1 = scmp.ge.s32.totalorder %s25_s15, 2  ;;  %p174_p2 = scmp.lt.s32.totalorder %s501_s14, 3 }
   0x5   : > { %s584_s15 = smov (%p27_p1, %s25_s15), 0  ;;  %p175_p3 = pnand %p432_p0, %p174_p2 }
   0x6   : > { %p213_p4 = scmp.lt.s32.totalorder (!%p175_p3), %s493_s12, 1  ;;  %vm244_vm0 = vcmask (!%p175_p3), 523264   ;;  %v288_v25 = vlaneseq (!%p175_p3)  ;;  %vm319_vm1 = vcmask (!%p175_p3), 519168  }
   0x7   : > { %178 = sbr.rel (%p175_p3) target bundleno = 342 (0x156), region = 32 }
   0x8   : > { %v289_v31 = vshrl.u32 (!%p175_p3), %v288_v25, 7 }
   0xa   : > { %v290_v36 = vsub.s32 (!%p175_p3), 0, %v289_v31 }
   0xe   : > { %s586_s12 = smov (!%p213_p4, %s493_s12), 1 }
   0xf   : > { %s448_s16 = smul.u32 12, %s586_s12  ;;  %s224_s22 = scalar_lea.vmem %s578_s1, %s586_s12 }
  0x10   : > { %v285_v32 = vld [vmem:[%s224_s22] sm:$0x1]  ;;  %s227_s25 = scalar_lea.vmem %s579_s2, %s586_s12 }
  0x11   : > { %s220_s19 = scalar_lea.vmem %s577_s0, %s448_s16  ;;  %v286_v35 = vadd.f32 1.0, %v285_v32  ;;  %v435_v40 = vld [vmem:[%s227_s25] ss:$0 sm:$0xff]  ;;  %s236_s28 = scalar_lea.vmem %s580_s3, %s448_s16 }
  0x12   : > { %v445_v0 = vld [vmem:[%s220_s19] sm:$0xff]   ;;  %v240_v1 = vld [vmem:[%s220_s19 + $0x8] sm:$0xf] }
  0x13   : > { %v446_v2 = vunpack.c.l.bf16 %v445_v0  ;;  %v243_v3 = vunpack.c.l.bf16 %v240_v1  ;;  %v447_v4 = vunpack.c.h.bf16 %v445_v0  ;;  %v291_v37 = vrot.slane %v286_v35, %v290_v36 }
  0x15   : > { %v245_v5 = vsel %vm244_vm0, %v446_v2, 0.0  ;;  %v251_v6 = vsel %vm244_vm0, %v243_v3, 0.0  ;;  %v248_v7 = vsel %vm244_vm0, %v447_v4, 0.0 }
  0x16   : > { %246 = vadd.xlane.f32.xlu0 %v245_v5  ;;  %252 = vadd.xlane.f32.xlu1 %v251_v6 }
  0x1a   : > { %249 = vadd.xlane.f32.xlu0 %v248_v7 }
  0xa3   : > { %v247_v8 = vpop.xlane.xlu0 %246  ;;  %v253_v9 = vpop.xlane.xlu1 %252 }
  0xa4   : > { %v255_v10 = vmul.f32 0.015625, %v247_v8  ;;  %v257_v11 = vmul.f32 0.015625, %v253_v9 }
  0xa6   : > { %v258_v12 = vsub.f32 %v446_v2, %v255_v10  ;;  %v260_v13 = vsub.f32 %v243_v3, %v257_v11 }
  0xa7   : > { %v250_v14 = vpop.xlane.xlu0 %249 }
  0xa8   : > { %v256_v15 = vmul.f32 0.015625, %v250_v14  ;;  %v261_v16 = vmul.f32 %v258_v12, %v258_v12  ;;  %v263_v17 = vmul.f32 %v260_v13, %v260_v13 }
  0xaa   : > { %v259_v18 = vsub.f32 %v447_v4, %v256_v15  ;;  %v264_v19 = vsel %vm244_vm0, %v261_v16, 0.0  ;;  %v270_v20 = vsel %vm244_vm0, %v263_v17, 0.0 }
  0xab   : > { %265 = vadd.xlane.f32.xlu1 %v264_v19 }
  0xac   : > { %v262_v21 = vmul.f32 %v259_v18, %v259_v18 }
  0xae   : > { %v267_v22 = vsel %vm244_vm0, %v262_v21, 0.0 }
  0xaf   : > { %271 = vadd.xlane.f32.xlu1 %v270_v20  ;;  %268 = vadd.xlane.f32.xlu0 %v267_v22 }
 0x138   : > { %v266_v23 = vpop.xlane.xlu1 %265 }
 0x139   : > { %v273_v24 = vmul.f32 0.015625, %v266_v23 }
 0x13b   : > { %v276_v26 = vadd.f32 1e-06, %v273_v24 }
 0x13c   : > { %v272_v27 = vpop.xlane.xlu1 %271  ;;  %v269_v28 = vpop.xlane.xlu0 %268 }
 0x13d   : > { %473 = vrsqrt.f32 %v276_v26  ;;  %v275_v29 = vmul.f32 0.015625, %v272_v27  ;;  %v274_v30 = vmul.f32 0.015625, %v269_v28 }
 0x13f   : > { %v278_v33 = vadd.f32 1e-06, %v275_v29  ;;  %v277_v34 = vadd.f32 1e-06, %v274_v30 }
 0x141   : > { %475 = vrsqrt.f32 %v278_v33 }
 0x142   : > { %477 = vrsqrt.f32 %v277_v34 }
 0x147   : > { %v474_v38 = vpop.eup %473 }
 0x148   : > { %v282_v39 = vmul.f32 %v474_v38, %v258_v12 }
 0x14a   : > { %v293_v41 = vmul.f32 %v291_v37, %v282_v39 }
 0x14b   : > { %v476_v42 = vpop.eup %475 }
 0x14c   : > { %v478_v43 = vpop.eup %477  ;;  %v303_v44 = vadd.f32 %v435_v40, %v293_v41  ;;  %v284_v45 = vmul.f32 %v476_v42, %v260_v13 }
 0x14d   : > { %v283_v46 = vmul.f32 %v478_v43, %v259_v18 }
 0x14e   : > { %v441_v47 = vpack.c.bf16 %v303_v44, %v303_v44  ;;  %v295_v48 = vmul.f32 %v291_v37, %v284_v45 }
 0x14f   : > { %v294_v49 = vmul.f32 %v291_v37, %v283_v46 }
 0x150   : > { %320 = vst.msk [vmem:[%s236_s28] sm:$0xf] %vm319_vm1, %v441_v47  ;;  %v305_v50 = vadd.f32 %v435_v40, %v295_v48 }
 0x151   : > { %v304_v51 = vadd.f32 %v435_v40, %v294_v49 }
 0x152   : > { %v443_v52 = vpack.c.bf16 %v305_v50, %v305_v50 }
 0x153   : > { %v442_v53 = vpack.c.bf16 %v304_v51, %v304_v51 }
 0x154   : > { %322 = vst.msk [vmem:[%s236_s28 + $0x8] sm:$0xf] %vm319_vm1, %v443_v52 }
 0x155   : > { %321 = vst.msk [vmem:[%s236_s28 + $0x4] sm:$0xf] %vm319_vm1, %v442_v53 }
 0x156 PF: > { %s13_s14 = sadd.s32 1, %s501_s14   ;;  %s581_s12 = smov %s497_s13 }
 0x157   : > { %p10_p5 = scmp.ge.s32.totalorder %s13_s14, 4   ;;  %s582_s13 = smov %s584_s15 }
 0x159   :  { %12 = sbr.rel (!%p10_p5) target bundleno = 2 (0x2), region = 68 }

// kernel: _lambda_.104
= control target key start
LH: loop header
LB: loop body
LE: loop exit
PB: predicated region body
PF: predicated region fallthrough
CT: control target
= control target key end

     0   :  { %vm20_vm0 = vcmask 523264   ;;  %v349_v1 = vmov 0   ;;  %v350_v2 = vmov 0.0   ;;  %v227_v13 = vlaneseq  ;;  %s456_s1 = inlined_call_operand.vmem [shape: bf16[64,192], index: 1, kind: input, shape index: {}]   ;;  %s457_s0 = inlined_call_operand.vmem [shape: bf16[48,64], index: 0, kind: input, shape index: {}]   ;;  %s458_s2 = inlined_call_operand.vmem [shape: f32[1,192], index: 2, kind: input, shape index: {}]   ;;  %s459_s3 = inlined_call_operand.vmem [shape: bf16[48,192], index: 3, kind: output, shape index: {}]  }
   0x1   :  { %v334_v0 = vld [vmem:[%s456_s1 + $0x4] ss:$8 sps:$4 sm:$0xff]   ;;  %165 = vmatprep.mubr.bf16.mxu1 %v349_v1  ;;  %155 = vmatprep.mubr.bf16.mxu0 %v349_v1  ;;  %21 = vst.msk [vmem:[#allocation2 + $0x8] sm:$0xff] %vm20_vm0, %v350_v2  ;;  %23 = vst.msk [vmem:[#allocation2 + $0x18] sm:$0xff] %vm20_vm0, %v350_v2  ;;  %v336_v3 = vld [vmem:[%s456_s1] ss:$8 sps:$4 sm:$0xff]  }
   0x2   :  { %25 = vst.msk [vmem:[#allocation2 + $0x28] sm:$0xff] %vm20_vm0, %v350_v2  ;;  %27 = vst.msk [vmem:[#allocation2 + $0x38] sm:$0xff] %vm20_vm0, %v350_v2  ;;  %324 = vmatprep.subr.bf16.mxu1 %v334_v0  ;;  %v337_v4 = vld [vmem:[%s456_s1 + $0x14] ss:$8 sps:$4 sm:$0xff]   ;;  %123 = vmatprep.subr.bf16.mxu0 %v334_v0  ;;  %v339_v5 = vld [vmem:[%s456_s1 + $0x10] ss:$8 sps:$4 sm:$0xff]  }
   0x3   :  { %29 = vst.msk [vmem:[#allocation2 + $0x48] sm:$0xff] %vm20_vm0, %v350_v2  ;;  %31 = vst.msk [vmem:[#allocation2 + $0x58] sm:$0xff] %vm20_vm0, %v350_v2  ;;  %328 = vmatpush1.bf16.msra.mxu1 %v336_v3  ;;  %124 = vmatpush1.bf16.msra.mxu0 %v336_v3  ;;  %v340_v6 = vld [vmem:[%s456_s1 + $0x24] ss:$8 sps:$4 sm:$0xff]   ;;  %v342_v7 = vld [vmem:[%s456_s1 + $0x20] ss:$8 sps:$4 sm:$0xff]  }
   0x4   :  { %325 = vmatprep.subr.bf16.mxu1 %v337_v4  ;;  %125 = vmatprep.subr.bf16.mxu0 %v337_v4  ;;  %v343_v8 = vld [vmem:[%s456_s1 + $0x34] ss:$8 sps:$4 sm:$0xff]   ;;  %v345_v9 = vld [vmem:[%s456_s1 + $0x30] ss:$8 sps:$4 sm:$0xff]   ;;  %v346_v10 = vld [vmem:[%s457_s0 + $0x8] sm:$0xff]   ;;  %v228_v17 = vshrl.u32 %v227_v13, 7 }
   0x5   :  { %v347_v11 = vld [vmem:[%s457_s0] sm:$0xff]   ;;  %v348_v12 = vld [vmem:[%s457_s0 + $0x10] sm:$0xff]   ;;  %vm285_vm1 = vcmask 1043456   ;;  %vm286_vm2 = vcmask 523268  }
   0x6   :  { %v229_v29 = vsub.s32 0, %v228_v17  ;;  %v233_v30 = vsub.s32 1, %v228_v17  ;;  %v225_v33 = vld [vmem:[%s458_s2] sm:$0x3]  ;;  %vm421_vm3 = vmor %vm286_vm2, %vm285_vm1 }
   0x7   :  { %329 = vmatpush1.bf16.msra.mxu1 %v339_v5  ;;  %126 = vmatpush1.bf16.msra.mxu0 %v339_v5 }
   0x8   :  { %326 = vmatprep.subr.bf16.mxu1 %v340_v6  ;;  %127 = vmatprep.subr.bf16.mxu0 %v340_v6  ;;  %v39_v15 = vld [vmem:[#allocation2 + $0x8] sm:$0xff]  ;;  %v41_v22 = vld [vmem:[#allocation2 + $0x18] sm:$0xff]  ;;  %v230_v35 = vrot.slane %v225_v33, %v229_v29  ;;  %v234_v36 = vrot.slane %v225_v33, %v233_v30 }
   0x9   :  { %v43_v14 = vld [vmem:[#allocation2 + $0x28] sm:$0xff]  ;;  %v45_v20 = vld [vmem:[#allocation2 + $0x38] sm:$0xff] }
   0xa   :  { %v47_v34 = vld [vmem:[#allocation2 + $0x48] sm:$0xff]  ;;  %v49_v39 = vld [vmem:[#allocation2 + $0x58] sm:$0xff] }
   0xb   :  { %330 = vmatpush1.bf16.msra.mxu1 %v342_v7  ;;  %128 = vmatpush1.bf16.msra.mxu0 %v342_v7 }
   0xc   :  { %327 = vmatprep.subr.bf16.mxu1 %v343_v8  ;;  %129 = vmatprep.subr.bf16.mxu0 %v343_v8 }
   0xf   :  { %331 = vmatpush1.bf16.msra.mxu1 %v345_v9  ;;  %130 = vmatpush1.bf16.msra.mxu0 %v345_v9 }
  0x12   :  { %310 = vmatmul.mubr.msk.bf16.vlgmr.msra.gmra.mrb[0].mxu1 %vm20_vm0, %v346_v10  ;;  %309 = vmatmul.mubr.msk.bf16.vlgmr.msra.gmra.mrb[0].mxu0 %vm20_vm0, %v347_v11 }
  0x13   :  { %175 = vmatprep.mubr.bf16.mxu1 %v349_v1 }
  0x1a   :  { %311 = vmatmul.mubr.msk.bf16.gmra.mrb[4].mxu1 %vm20_vm0, %v348_v12 }
  0xe5   :  { %v167_v16 = vpop.f32.mrb[0].mxu1  ;;  %v157_v18 = vpop.f32.mrb[0].mxu0 }
  0xe6   :  { %v169_v19 = vpop.f32.mrb[1].mxu1  ;;  %v159_v21 = vpop.f32.mrb[1].mxu0  ;;  %v237_v40 = vadd.f32 %v230_v35, %v157_v18  ;;  %v241_v46 = vadd.f32 %v230_v35, %v167_v16 }
  0xe7   :  { %v191_v23 = vadd.f32 %v169_v19, %v43_v14  ;;  %v171_v24 = vpop.f32.mrb[2].mxu1  ;;  %v187_v25 = vadd.f32 %v159_v21, %v39_v15  ;;  %v161_v26 = vpop.f32.mrb[2].mxu0 }
  0xe8   :  { %v173_v27 = vpop.f32.mrb[3].mxu1  ;;  %v163_v28 = vpop.f32.mrb[3].mxu0  ;;  %v243_v51 = vadd.f32 %v230_v35, %v171_v24  ;;  %v239_v53 = vadd.f32 %v230_v35, %v161_v26 }
  0xe9   :  { %203 = vst.msk [vmem:[#allocation2 + $0x28] sm:$0xff] %vm20_vm0, %v191_v23  ;;  %v193_v31 = vadd.f32 %v173_v27, %v45_v20  ;;  %199 = vst.msk [vmem:[#allocation2 + $0x8] sm:$0xff] %vm20_vm0, %v187_v25  ;;  %v189_v32 = vadd.f32 %v163_v28, %v41_v22 }
  0xeb   :  { %205 = vst.msk [vmem:[#allocation2 + $0x38] sm:$0xff] %vm20_vm0, %v193_v31  ;;  %201 = vst.msk [vmem:[#allocation2 + $0x18] sm:$0xff] %vm20_vm0, %v189_v32 }
  0xed   :  { %v177_v37 = vpop.f32.mrb[4].mxu1 }
  0xee   :  { %v179_v38 = vpop.f32.mrb[5].mxu1  ;;  %v245_v62 = vadd.f32 %v230_v35, %v177_v37 }
  0xef   :  { %v195_v41 = vadd.f32 %v179_v38, %v47_v34  ;;  %v181_v42 = vpop.f32.mrb[6].mxu1 }
  0xf0   :  { %v218_v43 = vld [vmem:[#allocation2 + $0x28] sm:$0xff]  ;;  %v183_v45 = vpop.f32.mrb[7].mxu1  ;;  %v247_v2 = vadd.f32 %v230_v35, %v181_v42 }
  0xf1   :  { %v214_v44 = vld [vmem:[#allocation2 + $0x8] sm:$0xff]  ;;  %v242_v47 = vadd.f32 %v234_v36, %v218_v43  ;;  %207 = vst.msk [vmem:[#allocation2 + $0x48] sm:$0xff] %vm20_vm0, %v195_v41  ;;  %v197_v49 = vadd.f32 %v183_v45, %v49_v39 }
  0xf2   :  { %v238_v48 = vadd.f32 %v234_v36, %v214_v44  ;;  %v220_v52 = vld [vmem:[#allocation2 + $0x38] sm:$0xff] }
  0xf3   :  { %v216_v54 = vld [vmem:[#allocation2 + $0x18] sm:$0xff]  ;;  %v320_v55 = vpack.c.bf16 %v242_v47, %v241_v46  ;;  %v244_v56 = vadd.f32 %v234_v36, %v220_v52  ;;  %209 = vst.msk [vmem:[#allocation2 + $0x58] sm:$0xff] %vm20_vm0, %v197_v49 }
  0xf4   :  { %v318_v57 = vpack.c.bf16 %v238_v48, %v237_v40  ;;  %v240_v58 = vadd.f32 %v234_v36, %v216_v54 }
  0xf5   :  { %290 = vst.msk [vmem:[%s459_s3 + $0x10] sm:$0xff] %vm421_vm3, %v320_v55  ;;  %v321_v59 = vpack.c.bf16 %v244_v56, %v243_v51 }
  0xf6   :  { %288 = vst.msk [vmem:[%s459_s3] sm:$0xff] %vm421_vm3, %v318_v57  ;;  %v319_v60 = vpack.c.bf16 %v240_v58, %v239_v53 }
  0xf7   :  { %291 = vst.msk [vmem:[%s459_s3 + $0x18] sm:$0xff] %vm421_vm3, %v321_v59 }
  0xf8   :  { %289 = vst.msk [vmem:[%s459_s3 + $0x8] sm:$0xff] %vm421_vm3, %v319_v60  ;;  %v222_v61 = vld [vmem:[#allocation2 + $0x48] sm:$0xff] }
  0xf9   :  { %v246_v63 = vadd.f32 %v234_v36, %v222_v61 }
  0xfa   :  { %v224_v0 = vld [vmem:[#allocation2 + $0x58] sm:$0xff] }
  0xfb   :  { %v322_v1 = vpack.c.bf16 %v246_v63, %v245_v62  ;;  %v248_v3 = vadd.f32 %v234_v36, %v224_v0 }
  0xfd   :  { %292 = vst.msk [vmem:[%s459_s3 + $0x20] sm:$0xff] %vm421_vm3, %v322_v1  ;;  %v323_v4 = vpack.c.bf16 %v248_v3, %v247_v2 }
  0xff   :  { %293 = vst.msk [vmem:[%s459_s3 + $0x28] sm:$0xff] %vm421_vm3, %v323_v4 }

// kernel: _lambda_.105
= control target key start
LH: loop header
LB: loop body
LE: loop exit
PB: predicated region body
PF: predicated region fallthrough
CT: control target
= control target key end

     0   :  { %v369_v0 = vmov 0.0   ;;  %vm370_vm0 = vmmov 0   ;;  %vm84_vm1 = vcmask 523264   ;;  %s441_s1 = inlined_call_operand.vmem [shape: bf16[64,128], index: 1, kind: input, shape index: {}]   ;;  %s442_s0 = inlined_call_operand.vmem [shape: bf16[48,64], index: 0, kind: input, shape index: {}]   ;;  %s443_s2 = inlined_call_operand.vmem [shape: f32[1,128], index: 2, kind: input, shape index: {}]   ;;  %s444_s3 = inlined_call_operand.vmem [shape: bf16[48,128], index: 3, kind: output, shape index: {}]  }
   0x1   :  { %320 = vmatprep.subr.bf16.mxu0 %v369_v0  ;;  %340 = vmatprep.subr.bf16.mxu1 %v369_v0  ;;  %v350_v1 = vld [vmem:[%s441_s1] sm:$0xff]   ;;  %v351_v2 = vld [vmem:[%s441_s1 + $0x8] sm:$0xff]   ;;  %v352_v3 = vld [vmem:[%s441_s1 + $0x10] sm:$0xff]  }
   0x2   :  { %328 = vmatprep.mubr.msk.bf16.mxu0 %vm370_vm0, %v369_v0  ;;  %332 = vmatprep.mubr.msk.bf16.mxu1 %vm370_vm0, %v369_v0  ;;  %v353_v4 = vld [vmem:[%s441_s1 + $0x18] sm:$0xff]   ;;  %v354_v5 = vld [vmem:[%s442_s0] sm:$0xff]   ;;  %v355_v6 = vld [vmem:[%s442_s0 + $0x8] sm:$0xff]  }
   0x3   :  { %321 = vmatpush3.bf16.msra.mxu0 %v350_v1  ;;  %344 = vmatpush3.bf16.msra.mxu1 %v350_v1  ;;  %v356_v7 = vld [vmem:[%s442_s0 + $0x10] sm:$0xff]   ;;  %v283_v8 = vld [vmem:[%s443_s2] ss:$0 sm:$0xff] }
   0x4   :  { %322 = vmatprep.subr.bf16.mxu0 %v369_v0  ;;  %341 = vmatprep.subr.bf16.mxu1 %v369_v0 }
   0x7   :  { %323 = vmatpush3.bf16.msra.mxu0 %v351_v2  ;;  %345 = vmatpush3.bf16.msra.mxu1 %v351_v2 }
   0x8   :  { %324 = vmatprep.subr.bf16.mxu0 %v369_v0  ;;  %342 = vmatprep.subr.bf16.mxu1 %v369_v0 }
   0xb   :  { %325 = vmatpush3.bf16.msra.mxu0 %v352_v3  ;;  %346 = vmatpush3.bf16.msra.mxu1 %v352_v3 }
   0xc   :  { %326 = vmatprep.subr.bf16.mxu0 %v369_v0  ;;  %343 = vmatprep.subr.bf16.mxu1 %v369_v0 }
   0xf   :  { %327 = vmatpush3.bf16.msra.mxu0 %v353_v4  ;;  %347 = vmatpush3.bf16.msra.mxu1 %v353_v4 }
  0x12   :  { %329 = vmatmul.mubr.msk.bf16.vlgmr.msra.gmra.mrb[0].mxu0 %vm84_vm1, %v354_v5  ;;  %333 = vmatmul.mubr.msk.bf16.vlgmr.msra.gmra.mrb[0].mxu1 %vm84_vm1, %v355_v6 }
  0x13   :  { %336 = vmatprep.mubr.msk.bf16.mxu1 %vm370_vm0, %v369_v0 }
  0x1a   :  { %337 = vmatmul.mubr.msk.bf16.gmra.mrb[4].mxu1 %vm84_vm1, %v356_v7 }
  0xe5   :  { %v128_v9 = vpop.f32.mrb[0].mxu0  ;;  %v136_v10 = vpop.f32.mrb[0].mxu1 }
  0xe6   :  { %v418_v11 = vadd.f32 %v283_v8, %v128_v9  ;;  %v420_v12 = vadd.f32 %v283_v8, %v136_v10  ;;  %v330_v13 = vpop.f32.mrb[1].mxu0  ;;  %v334_v14 = vpop.f32.mrb[1].mxu1 }
  0xe7   :  { %v131_v15 = vpop.f32.mrb[2].mxu0  ;;  %v139_v16 = vpop.f32.mrb[2].mxu1 }
  0xe8   :  { %v185_v17 = vmul.f32 %v418_v11, %v418_v11  ;;  %v187_v18 = vmul.f32 %v420_v12, %v420_v12  ;;  %v180_v19 = vadd.f32 %v283_v8, %v131_v15  ;;  %v182_v20 = vadd.f32 %v283_v8, %v139_v16  ;;  %v335_v21 = vpop.f32.mrb[3].mxu1  ;;  %v331_v22 = vpop.f32.mrb[3].mxu0 }
  0xea   :  { %v191_v23 = vmul.f32 %v185_v17, %v418_v11  ;;  %v193_v24 = vmul.f32 %v187_v18, %v420_v12  ;;  %v186_v25 = vmul.f32 %v180_v19, %v180_v19  ;;  %v188_v26 = vmul.f32 %v182_v20, %v182_v20 }
  0xec   :  { %v197_v27 = vmul.f32 0.044715, %v191_v23  ;;  %v199_v28 = vmul.f32 0.044715, %v193_v24  ;;  %v192_v29 = vmul.f32 %v186_v25, %v180_v19  ;;  %v194_v30 = vmul.f32 %v188_v26, %v182_v20 }
  0xed   :  { %v144_v31 = vpop.f32.mrb[4].mxu1 }
  0xee   :  { %v203_v32 = vadd.f32 %v197_v27, %v418_v11  ;;  %v205_v33 = vadd.f32 %v199_v28, %v420_v12  ;;  %v198_v34 = vmul.f32 0.044715, %v192_v29  ;;  %v200_v35 = vmul.f32 0.044715, %v194_v30  ;;  %v338_v36 = vpop.f32.mrb[5].mxu1 }
  0xef   :  { %v183_v37 = vadd.f32 %v283_v8, %v144_v31  ;;  %v147_v38 = vpop.f32.mrb[6].mxu1 }
  0xf0   :  { %v209_v39 = vmul.f32 0.7978846, %v203_v32  ;;  %v211_v40 = vmul.f32 0.7978846, %v205_v33  ;;  %v204_v41 = vadd.f32 %v198_v34, %v180_v19  ;;  %v206_v42 = vadd.f32 %v200_v35, %v182_v20  ;;  %v339_v43 = vpop.f32.mrb[7].mxu1 }
  0xf1   :  { %v189_v44 = vmul.f32 %v183_v37, %v183_v37  ;;  %v184_v45 = vadd.f32 %v283_v8, %v147_v38 }
  0xf2   :  { %357 = vtanh.f32 %v209_v39  ;;  %v210_v46 = vmul.f32 0.7978846, %v204_v41  ;;  %v212_v47 = vmul.f32 0.7978846, %v206_v42 }
  0xf3   :  { %359 = vtanh.f32 %v211_v40  ;;  %v195_v48 = vmul.f32 %v189_v44, %v183_v37  ;;  %v190_v49 = vmul.f32 %v184_v45, %v184_v45 }
  0xf4   :  { %361 = vtanh.f32 %v210_v46 }
  0xf5   :  { %363 = vtanh.f32 %v212_v47  ;;  %v201_v50 = vmul.f32 0.044715, %v195_v48  ;;  %v196_v51 = vmul.f32 %v190_v49, %v184_v45 }
  0xf7   :  { %v207_v52 = vadd.f32 %v201_v50, %v183_v37  ;;  %v202_v53 = vmul.f32 0.044715, %v196_v51 }
  0xf9   :  { %v213_v54 = vmul.f32 0.7978846, %v207_v52  ;;  %v208_v55 = vadd.f32 %v202_v53, %v184_v45 }
  0xfb   :  { %365 = vtanh.f32 %v213_v54  ;;  %v214_v56 = vmul.f32 0.7978846, %v208_v55 }
  0xfc   :  { %v358_v57 = vpop.eup %357 }
  0xfd   :  { %v360_v58 = vpop.eup %359  ;;  %v221_v59 = vadd.f32 1.0, %v358_v57  ;;  %367 = vtanh.f32 %v214_v56 }
  0xfe   :  { %v362_v60 = vpop.eup %361  ;;  %v223_v61 = vadd.f32 1.0, %v360_v58 }
  0xff   :  { %v364_v62 = vpop.eup %363  ;;  %v227_v63 = vmul.f32 0.5, %v221_v59  ;;  %v222_v0 = vadd.f32 1.0, %v362_v60 }
 0x100   :  { %v229_v1 = vmul.f32 0.5, %v223_v61  ;;  %v224_v2 = vadd.f32 1.0, %v364_v62 }
 0x101   :  { %v228_v3 = vmul.f32 0.5, %v222_v0  ;;  %v233_v5 = vmul.f32 %v227_v63, %v418_v11 }
 0x102   :  { %v230_v4 = vmul.f32 0.5, %v224_v2  ;;  %v235_v7 = vmul.f32 %v229_v1, %v420_v12 }
 0x103   :  { %v234_v6 = vmul.f32 %v228_v3, %v180_v19 }
 0x104   :  { %v236_v8 = vmul.f32 %v230_v4, %v182_v20 }
 0x105   :  { %v366_v9 = vpop.eup %365  ;;  %v299_v10 = vpack.c.bf16 %v234_v6, %v233_v5 }
 0x106   :  { %v304_v13 = vpack.c.bf16 %v236_v8, %v235_v7  ;;  %v225_v14 = vadd.f32 1.0, %v366_v9 }
 0x107   :  { %v368_v15 = vpop.eup %367  ;;  %300 = vst [vmem:[%s444_s3] sm:$0xff] %v299_v10  }
 0x108   :  { %311 = vst [vmem:[%s444_s3 + $0x8] sm:$0xff] %v304_v13   ;;  %v231_v16 = vmul.f32 0.5, %v225_v14  ;;  %v226_v17 = vadd.f32 1.0, %v368_v15 }
 0x10a   :  { %v232_v11 = vmul.f32 0.5, %v226_v17  ;;  %v237_v18 = vmul.f32 %v231_v16, %v183_v37 }
 0x10c   :  { %v238_v19 = vmul.f32 %v232_v11, %v184_v45 }
 0x10e   :  { %v309_v12 = vpack.c.bf16 %v238_v19, %v237_v18 }
 0x110   :  { %312 = vst [vmem:[%s444_s3 + $0x10] sm:$0xff] %v309_v12  }

// kernel: _lambda_.107
= control target key start
LH: loop header
LB: loop body
LE: loop exit
PB: predicated region body
PF: predicated region fallthrough
CT: control target
= control target key end

     0   :  { %vm19_vm0 = vcmask 523264   ;;  %v378_v0 = vmov 0   ;;  %v379_v2 = vmov 0.0   ;;  %vm286_vm1 = vcmask 519168   ;;  %s520_s1 = inlined_call_operand.vmem [shape: bf16[192,64], index: 1, kind: input, shape index: {}]   ;;  %s521_s0 = inlined_call_operand.vmem [shape: bf16[48,192], index: 0, kind: input, shape index: {}]   ;;  %s522_s2 = inlined_call_operand.vmem [shape: f32[1,64], index: 2, kind: input, shape index: {}]   ;;  %s523_s3 = inlined_call_operand.vmem [shape: bf16[48,64], index: 3, kind: output, shape index: {}]  }
   0x1   :  { %331 = vmatprep.subr.bf16.mxu1 %v378_v0  ;;  %v357_v1 = vld [vmem:[%s520_s1] sm:$0xff]   ;;  %171 = vmatprep.subr.bf16.mxu0 %v378_v0  ;;  %22 = vst.msk [vmem:[#allocation2 + $0x10] sm:$0xff] %vm19_vm0, %v379_v2  ;;  %20 = vst.msk [vmem:[#allocation2] sm:$0xff] %vm19_vm0, %v379_v2  ;;  %v358_v3 = vld [vmem:[%s520_s1 + $0x8] sm:$0xff]  }
   0x2   :  { %21 = vst.msk [vmem:[#allocation2 + $0x8] sm:$0xff] %vm19_vm0, %v379_v2  ;;  %23 = vst.msk [vmem:[#allocation2 + $0x18] sm:$0xff] %vm19_vm0, %v379_v2  ;;  %343 = vmatpush1.bf16.msra.mxu1 %v357_v1  ;;  %172 = vmatpush1.bf16.msra.mxu0 %v357_v1  ;;  %v359_v4 = vld [vmem:[%s520_s1 + $0x10] sm:$0xff]   ;;  %v360_v5 = vld [vmem:[%s520_s1 + $0x18] sm:$0xff]  }
   0x3   :  { %24 = vst.msk [vmem:[#allocation2 + $0x20] sm:$0xff] %vm19_vm0, %v379_v2  ;;  %25 = vst.msk [vmem:[#allocation2 + $0x28] sm:$0xff] %vm19_vm0, %v379_v2  ;;  %332 = vmatprep.subr.bf16.mxu1 %v378_v0  ;;  %173 = vmatprep.subr.bf16.mxu0 %v378_v0  ;;  %v371_v6 = vld [vmem:[%s521_s0 + $0x14] ss:$8 sps:$4 sm:$0xff]   ;;  %v361_v7 = vld [vmem:[%s520_s1 + $0x20] sm:$0xff]  }
   0x4   :  { %v374_v8 = vld [vmem:[%s521_s0 + $0x4] ss:$8 sps:$4 sm:$0xff]   ;;  %316 = vmatprep.mubr.msk.bf16.mxu1 %vm19_vm0, %v371_v6  ;;  %v363_v10 = vld [vmem:[%s520_s1 + $0x30] sm:$0xff]   ;;  %v364_v11 = vld [vmem:[%s520_s1 + $0x38] sm:$0xff]  }
   0x5   :  { %315 = vmatprep.mubr.msk.bf16.mxu0 %vm19_vm0, %v374_v8  ;;  %v362_v9 = vld [vmem:[%s520_s1 + $0x28] sm:$0xff]   ;;  %v365_v12 = vld [vmem:[%s520_s1 + $0x40] sm:$0xff]   ;;  %v367_v14 = vld [vmem:[%s520_s1 + $0x50] sm:$0xff]  }
   0x6   :  { %344 = vmatpush1.bf16.msra.mxu1 %v358_v3  ;;  %174 = vmatpush1.bf16.msra.mxu0 %v358_v3  ;;  %v366_v13 = vld [vmem:[%s520_s1 + $0x48] sm:$0xff]   ;;  %v368_v15 = vld [vmem:[%s520_s1 + $0x58] sm:$0xff]   ;;  %v318_v37 = vld [vmem:[%s522_s2] ss:$0 sm:$0xff] }
   0x7   :  { %333 = vmatprep.subr.bf16.mxu1 %v378_v0  ;;  %175 = vmatprep.subr.bf16.mxu0 %v378_v0  ;;  %v369_v16 = vld [vmem:[%s521_s0 + $0x10] ss:$8 sps:$4 sm:$0xff]   ;;  %v372_v17 = vld [vmem:[%s521_s0] ss:$8 sps:$4 sm:$0xff]   ;;  %v375_v18 = vld [vmem:[%s521_s0 + $0x24] ss:$8 sps:$4 sm:$0xff]  }
   0x8   :  { %v377_v19 = vld [vmem:[%s521_s0 + $0x20] ss:$8 sps:$4 sm:$0xff]   ;;  %v34_v20 = vld [vmem:[#allocation2 + $0x10] sm:$0xff] }
   0x9   :  { %v32_v21 = vld [vmem:[#allocation2] sm:$0xff]  ;;  %v35_v23 = vld [vmem:[#allocation2 + $0x18] sm:$0xff]  ;;  %v33_v25 = vld [vmem:[#allocation2 + $0x8] sm:$0xff] }
   0xa   :  { %345 = vmatpush1.bf16.msra.mxu1 %v359_v4  ;;  %176 = vmatpush1.bf16.msra.mxu0 %v359_v4  ;;  %v36_v36 = vld [vmem:[#allocation2 + $0x20] sm:$0xff]  ;;  %v37_v39 = vld [vmem:[#allocation2 + $0x28] sm:$0xff] }
   0xb   :  { %334 = vmatprep.subr.bf16.mxu1 %v378_v0  ;;  %177 = vmatprep.subr.bf16.mxu0 %v378_v0 }
   0xe   :  { %346 = vmatpush1.bf16.msra.mxu1 %v360_v5  ;;  %178 = vmatpush1.bf16.msra.mxu0 %v360_v5 }
   0xf   :  { %335 = vmatprep.subr.bf16.mxu1 %v378_v0  ;;  %179 = vmatprep.subr.bf16.mxu0 %v378_v0 }
  0x12   :  { %347 = vmatpush1.bf16.msra.mxu1 %v361_v7  ;;  %180 = vmatpush1.bf16.msra.mxu0 %v361_v7 }
  0x13   :  { %336 = vmatprep.subr.bf16.mxu1 %v378_v0  ;;  %181 = vmatprep.subr.bf16.mxu0 %v378_v0 }
  0x16   :  { %348 = vmatpush1.bf16.msra.mxu1 %v362_v9  ;;  %182 = vmatpush1.bf16.msra.mxu0 %v362_v9 }
  0x17   :  { %337 = vmatprep.subr.bf16.mxu1 %v378_v0  ;;  %183 = vmatprep.subr.bf16.mxu0 %v378_v0 }
  0x1a   :  { %349 = vmatpush1.bf16.msra.mxu1 %v363_v10  ;;  %184 = vmatpush1.bf16.msra.mxu0 %v363_v10 }
  0x1b   :  { %338 = vmatprep.subr.bf16.mxu1 %v378_v0  ;;  %185 = vmatprep.subr.bf16.mxu0 %v378_v0 }
  0x1e   :  { %350 = vmatpush1.bf16.msra.mxu1 %v364_v11  ;;  %186 = vmatpush1.bf16.msra.mxu0 %v364_v11 }
  0x1f   :  { %339 = vmatprep.subr.bf16.mxu1 %v378_v0  ;;  %187 = vmatprep.subr.bf16.mxu0 %v378_v0 }
  0x22   :  { %351 = vmatpush1.bf16.msra.mxu1 %v365_v12  ;;  %188 = vmatpush1.bf16.msra.mxu0 %v365_v12 }
  0x23   :  { %340 = vmatprep.subr.bf16.mxu1 %v378_v0  ;;  %189 = vmatprep.subr.bf16.mxu0 %v378_v0 }
  0x26   :  { %352 = vmatpush1.bf16.msra.mxu1 %v366_v13  ;;  %190 = vmatpush1.bf16.msra.mxu0 %v366_v13 }
  0x27   :  { %341 = vmatprep.subr.bf16.mxu1 %v378_v0  ;;  %191 = vmatprep.subr.bf16.mxu0 %v378_v0 }
  0x2a   :  { %353 = vmatpush1.bf16.msra.mxu1 %v367_v14  ;;  %192 = vmatpush1.bf16.msra.mxu0 %v367_v14 }
  0x2b   :  { %342 = vmatprep.subr.bf16.mxu1 %v378_v0  ;;  %193 = vmatprep.subr.bf16.mxu0 %v378_v0 }
  0x2e   :  { %354 = vmatpush1.bf16.msra.mxu1 %v368_v15  ;;  %194 = vmatpush1.bf16.msra.mxu0 %v368_v15 }
  0x31   :  { %212 = vmatmul.mubr.bf16.vlgmr.msra.gmra.mrb[0].mxu1 %v369_v16  ;;  %204 = vmatmul.mubr.bf16.vlgmr.msra.gmra.mrb[0].mxu0 %v372_v17 }
  0x32   :  { %317 = vmatprep.mubr.msk.bf16.mxu1 %vm19_vm0, %v375_v18 }
  0x39   :  { %220 = vmatmul.mubr.bf16.gmra.mrb[4].mxu1 %v377_v19 }
 0x104   :  { %v213_v22 = vpop.f32.mrb[0].mxu1  ;;  %v205_v24 = vpop.f32.mrb[0].mxu0 }
 0x105   :  { %v230_v26 = vadd.f32 %v213_v22, %v34_v20  ;;  %v215_v27 = vpop.f32.mrb[1].mxu1  ;;  %v228_v28 = vadd.f32 %v205_v24, %v32_v21  ;;  %v207_v29 = vpop.f32.mrb[1].mxu0 }
 0x106   :  { %v216_v30 = vpop.f32.mrb[2].mxu1  ;;  %v208_v31 = vpop.f32.mrb[2].mxu0 }
 0x107   :  { %236 = vst.msk [vmem:[#allocation2 + $0x10] sm:$0xff] %vm19_vm0, %v230_v26  ;;  %v231_v32 = vadd.f32 %v216_v30, %v35_v23  ;;  %v218_v33 = vpop.f32.mrb[3].mxu1  ;;  %234 = vst.msk [vmem:[#allocation2] sm:$0xff] %vm19_vm0, %v228_v28  ;;  %v229_v34 = vadd.f32 %v208_v31, %v33_v25  ;;  %v210_v35 = vpop.f32.mrb[3].mxu0 }
 0x109   :  { %237 = vst.msk [vmem:[#allocation2 + $0x18] sm:$0xff] %vm19_vm0, %v231_v32  ;;  %235 = vst.msk [vmem:[#allocation2 + $0x8] sm:$0xff] %vm19_vm0, %v229_v34 }
 0x10c   :  { %v221_v38 = vpop.f32.mrb[4].mxu1 }
 0x10d   :  { %v232_v40 = vadd.f32 %v221_v38, %v36_v36  ;;  %v223_v41 = vpop.f32.mrb[5].mxu1 }
 0x10e   :  { %v245_v42 = vld [vmem:[#allocation2 + $0x10] sm:$0xff]  ;;  %v243_v43 = vld [vmem:[#allocation2] sm:$0xff]  ;;  %v224_v44 = vpop.f32.mrb[6].mxu1 }
 0x10f   :  { %v258_v45 = vadd.f32 %v318_v37, %v245_v42  ;;  %v256_v46 = vadd.f32 %v318_v37, %v243_v43  ;;  %238 = vst.msk [vmem:[#allocation2 + $0x20] sm:$0xff] %vm19_vm0, %v232_v40  ;;  %v233_v47 = vadd.f32 %v224_v44, %v37_v39  ;;  %v226_v48 = vpop.f32.mrb[7].mxu1 }
 0x110   :  { %v246_v49 = vld [vmem:[#allocation2 + $0x18] sm:$0xff]  ;;  %v244_v50 = vld [vmem:[#allocation2 + $0x8] sm:$0xff] }
 0x111   :  { %v327_v51 = vpack.c.bf16 %v258_v45, %v258_v45  ;;  %v259_v52 = vadd.f32 %v318_v37, %v246_v49  ;;  %v325_v53 = vpack.c.bf16 %v256_v46, %v256_v46  ;;  %v257_v54 = vadd.f32 %v318_v37, %v244_v50  ;;  %239 = vst.msk [vmem:[#allocation2 + $0x28] sm:$0xff] %vm19_vm0, %v233_v47 }
 0x113   :  { %289 = vst.msk [vmem:[%s523_s3 + $0x8] sm:$0xf] %vm286_vm1, %v327_v51  ;;  %v328_v55 = vpack.c.bf16 %v259_v52, %v259_v52  ;;  %287 = vst.msk [vmem:[%s523_s3] sm:$0xf] %vm286_vm1, %v325_v53  ;;  %v326_v56 = vpack.c.bf16 %v257_v54, %v257_v54 }
 0x115   :  { %290 = vst.msk [vmem:[%s523_s3 + $0xc] sm:$0xf] %vm286_vm1, %v328_v55  ;;  %288 = vst.msk [vmem:[%s523_s3 + $0x4] sm:$0xf] %vm286_vm1, %v326_v56 }
 0x116   :  { %v247_v57 = vld [vmem:[#allocation2 + $0x20] sm:$0xff] }
 0x117   :  { %v260_v58 = vadd.f32 %v318_v37, %v247_v57 }
 0x118   :  { %v248_v59 = vld [vmem:[#allocation2 + $0x28] sm:$0xff] }
 0x119   :  { %v329_v60 = vpack.c.bf16 %v260_v58, %v260_v58  ;;  %v261_v61 = vadd.f32 %v318_v37, %v248_v59 }
 0x11b   :  { %291 = vst.msk [vmem:[%s523_s3 + $0x10] sm:$0xf] %vm286_vm1, %v329_v60  ;;  %v330_v62 = vpack.c.bf16 %v261_v61, %v261_v61 }
 0x11d   :  { %292 = vst.msk [vmem:[%s523_s3 + $0x14] sm:$0xf] %vm286_vm1, %v330_v62 }

</bundles_post_ra>
